<compile_context>
chip_gen: v5e
topology: v5e:2x2
jax: 0.10.0
libtpu: 0.0.40
codegen_flags: <defaults>
</compile_context>

<pallas_src>
import math

import jax
import jax.numpy as jnp
from jax.experimental import pallas as pl
from jax.experimental.pallas import tpu as pltpu

_LANE = 128  # last dim of every block should be a multiple of this


def _round_up(x, m):
    return (x + m - 1) // m * m


def _mlp_kernel(x_ref, w1_ref, b1_ref, w2_ref, b2_ref, o_ref):
    # fc1: bf16 MXU inputs, f32 accumulation.
    h = jnp.dot(x_ref[...], w1_ref[...], preferred_element_type=jnp.float32)
    h = h + b1_ref[...]                                   # (tm, hid) + (1, hid), f32
    # exact erf-based GELU in f32 (matches PyTorch nn.GELU default)
    h = 0.5 * h * (1.0 + jax.lax.erf(h * (1.0 / math.sqrt(2.0))))
    # dropout(p=0.0) is identity -> no-op
    # fc2: bf16 MXU inputs, f32 accumulation.
    y = jnp.dot(h.astype(jnp.bfloat16), w2_ref[...], preferred_element_type=jnp.float32)
    y = y + b2_ref[...]                                   # (tm, out) + (1, out), f32
    o_ref[...] = y.astype(o_ref.dtype)


def _vmem_limit_bytes(tm, c_in, c_hid, c_out, weight_bufs):
    bf16, f32 = 2, 4
    weights = weight_bufs * (c_in * c_hid * bf16 + c_hid * c_out * bf16
                             + c_hid * f32 + c_out * f32)
    x_bufs = 2 * tm * c_in * bf16          # double-buffered bf16 x tile
    o_bufs = 2 * tm * c_out * f32          # double-buffered f32 out tile
    temps = tm * c_hid * (f32 + bf16)      # f32 hidden + bf16 recast for fc2
    est = weights + x_bufs + o_bufs + temps
    # 2x headroom for compiler temps; clamp to [32 MiB, 64 MiB] (64 MiB is safe on v7x too).
    return int(min(max(2 * est, 32 * 1024 * 1024), 64 * 1024 * 1024))


def mlp_pallas(x, w1, b1, w2, b2, *, tm=256):
    """x: (B, S, C_in) float32, w1: (C_in, C_hid), w2: (C_hid, C_out). Returns (B, S, C_out)."""
    B, S, C_in = x.shape
    C_hid = w1.shape[1]
    C_out = w2.shape[1]
    N = B * S

    # Pad rows to a multiple of the row tile and channels to multiples of 128 lanes.
    C_in_p = _round_up(C_in, _LANE)
    C_hid_p = _round_up(C_hid, _LANE)
    C_out_p = _round_up(C_out, _LANE)
    N_pad = _round_up(N, tm)

    # Cast x to bf16 once here (halves HBM traffic for x; numerically identical to an
    # in-kernel cast since the MXU consumes bf16 either way).
    x2d = jnp.pad(x.reshape(N, C_in), ((0, N_pad - N), (0, C_in_p - C_in))).astype(jnp.bfloat16)
    w1p = jnp.pad(w1, ((0, C_in_p - C_in), (0, C_hid_p - C_hid))).astype(jnp.bfloat16)
    w2p = jnp.pad(w2, ((0, C_hid_p - C_hid), (0, C_out_p - C_out))).astype(jnp.bfloat16)
    b1p = jnp.pad(b1, (0, C_hid_p - C_hid)).reshape(1, C_hid_p).astype(jnp.float32)
    b2p = jnp.pad(b2, (0, C_out_p - C_out)).reshape(1, C_out_p).astype(jnp.float32)

    grid = (N_pad // tm,)

    cost = pl.CostEstimate(
        flops=2 * N_pad * C_in_p * C_hid_p + 2 * N_pad * C_hid_p * C_out_p,
        transcendentals=N_pad * C_hid_p,  # erf per hidden activation
        bytes_accessed=(N_pad * C_in_p * 2 + N_pad * C_out_p * 4
                        + C_in_p * C_hid_p * 2 + C_hid_p * C_out_p * 2
                        + (C_hid_p + C_out_p) * 4),
    )

    def build(weight_pipeline_mode, weight_bufs):
        def wspec(shape):
            if weight_pipeline_mode is None:
                return pl.BlockSpec(shape, lambda i: (0, 0))
            return pl.BlockSpec(shape, lambda i: (0, 0), pipeline_mode=weight_pipeline_mode)

        return pl.pallas_call(
            _mlp_kernel,
            out_shape=jax.ShapeDtypeStruct((N_pad, C_out_p), jnp.float32),
            grid_spec=pltpu.PrefetchScalarGridSpec(
                num_scalar_prefetch=0,
                grid=grid,
                in_specs=[
                    pl.BlockSpec((tm, C_in_p), lambda i: (i, 0)),   # row tile of x (double-buffered)
                    wspec((C_in_p, C_hid_p)),                        # full fc1 weight (resident)
                    wspec((1, C_hid_p)),                             # fc1 bias
                    wspec((C_hid_p, C_out_p)),                       # full fc2 weight (resident)
                    wspec((1, C_out_p)),                             # fc2 bias
                ],
                out_specs=pl.BlockSpec((tm, C_out_p), lambda i: (i, 0)),
            ),
            compiler_params=pltpu.CompilerParams(
                dimension_semantics=("parallel",),
                vmem_limit_bytes=_vmem_limit_bytes(tm, C_in_p, C_hid_p, C_out_p, weight_bufs),
            ),
            cost_estimate=cost,
        )

    try:
        # Preferred: single-buffer the constant-index weight/bias operands.
        out2d = build(pl.Buffered(1), weight_bufs=1)(x2d, w1p, b1p, w2p, b2p)
    except Exception:
        # Fallback for JAX versions that reject Buffered(1): default (double) buffering.
        out2d = build(None, weight_bufs=2)(x2d, w1p, b1p, w2p, b2p)

    return out2d[:N, :C_out].reshape(B, S, C_out)


if __name__ == "__main__":
    # small shapes: batch=2, seq=8, in_features=32, hidden_features=64, out_features=32
    B, S = 2, 8
    in_features, hidden_features, out_features = 32, 64, 32

    key = jax.random.PRNGKey(0)
    kx, kw1, kb1, kw2, kb2 = jax.random.split(key, 5)

    x = jax.random.normal(kx, (B, S, in_features), dtype=jnp.float32)

    # deterministic parameter init (nn.Linear shapes; stored transposed as (in, out))
    bound1 = 1.0 / math.sqrt(in_features)
    w1 = jax.random.uniform(kw1, (in_features, hidden_features), jnp.float32, -bound1, bound1)
    b1 = jax.random.uniform(kb1, (hidden_features,), jnp.float32, -bound1, bound1)
    bound2 = 1.0 / math.sqrt(hidden_features)
    w2 = jax.random.uniform(kw2, (hidden_features, out_features), jnp.float32, -bound2, bound2)
    b2 = jax.random.uniform(kb2, (out_features,), jnp.float32, -bound2, bound2)

    out = mlp_pallas(x, w1, b1, w2, b2)
    jax.block_until_ready(out)

    # Reference 1: same mixed-precision policy (bf16 MXU inputs, f32 accumulation) -> tight match.
    xb = x.reshape(-1, in_features).astype(jnp.bfloat16)
    h_ref = jnp.dot(xb, w1.astype(jnp.bfloat16), preferred_element_type=jnp.float32) + b1
    h_ref = 0.5 * h_ref * (1.0 + jax.lax.erf(h_ref / math.sqrt(2.0)))
    y_ref = jnp.dot(h_ref.astype(jnp.bfloat16), w2.astype(jnp.bfloat16),
                    preferred_element_type=jnp.float32) + b2
    y_ref = y_ref.reshape(B, S, out_features)
    assert jnp.allclose(out, y_ref, atol=5e-3, rtol=5e-3), float(jnp.max(jnp.abs(out - y_ref)))

    # Reference 2: exact-f32 PyTorch-equivalent forward; bf16 matmuls deviate at the ~1e-2 level.
    h_f = x.reshape(-1, in_features) @ w1 + b1
    h_f = 0.5 * h_f * (1.0 + jax.lax.erf(h_f / math.sqrt(2.0)))
    y_f = (h_f @ w2 + b2).reshape(B, S, out_features)
    assert jnp.allclose(out, y_f, atol=5e-2, rtol=5e-2), float(jnp.max(jnp.abs(out - y_f)))

    print("KERNEL_OK")
</pallas_src>

<mosaic_0001>
module attributes {stable_mosaic.version = 11 : i64} {
  func.func @_mlp_kernel(%arg0: i32, %arg1: memref<256x128xbf16, #tpu.memory_space<vmem>>, %arg2: memref<128x128xbf16, #tpu.memory_space<vmem>>, %arg3: memref<1x128xf32, #tpu.memory_space<vmem>>, %arg4: memref<128x128xbf16, #tpu.memory_space<vmem>>, %arg5: memref<1x128xf32, #tpu.memory_space<vmem>>, %arg6: memref<256x128xf32, #tpu.memory_space<vmem>>) attributes {dimension_semantics = [#tpu.dimension_semantics<parallel>], iteration_bounds = array<i64: 1>, scalar_prefetch = 0 : i64, scratch_operands = 0 : i64, tpu.core_type = #tpu.core_type<tc>, window_params = [{transform_indices = @transform_0, window_bounds = array<i64: 256, 128>}, {pipeline_mode = #tpu.pipeline_mode<synchronous>, transform_indices = @transform_1, window_bounds = array<i64: 128, 128>}, {pipeline_mode = #tpu.pipeline_mode<synchronous>, transform_indices = @transform_2, window_bounds = array<i64: 1, 128>}, {pipeline_mode = #tpu.pipeline_mode<synchronous>, transform_indices = @transform_3, window_bounds = array<i64: 128, 128>}, {pipeline_mode = #tpu.pipeline_mode<synchronous>, transform_indices = @transform_4, window_bounds = array<i64: 1, 128>}, {transform_indices = @transform_5, window_bounds = array<i64: 256, 128>}]} {
    %c0 = arith.constant 0 : index
    %c0_0 = arith.constant 0 : index
    %0 = vector.load %arg1[%c0, %c0_0] : memref<256x128xbf16, #tpu.memory_space<vmem>>, vector<256x128xbf16>
    %c0_1 = arith.constant 0 : index
    %c0_2 = arith.constant 0 : index
    %1 = vector.load %arg2[%c0_1, %c0_2] : memref<128x128xbf16, #tpu.memory_space<vmem>>, vector<128x128xbf16>
    %cst = arith.constant dense<0.000000e+00> : vector<256x128xf32>
    %2 = tpu.matmul %0, %1, %cst {dimension_numbers = #tpu.dot_dimension_numbers<[1], [0], [0], [1], [0, 0, 1, 1], [], []>} : vector<256x128xbf16>, vector<128x128xbf16>, vector<256x128xf32> -> vector<256x128xf32>
    %c0_3 = arith.constant 0 : index
    %c0_4 = arith.constant 0 : index
    %3 = vector.load %arg3[%c0_3, %c0_4] : memref<1x128xf32, #tpu.memory_space<vmem>>, vector<1x128xf32>
    %4 = vector.broadcast %3 : vector<1x128xf32> to vector<256x128xf32>
    %5 = arith.addf %2, %4 : vector<256x128xf32>
    %cst_5 = arith.constant 5.000000e-01 : f32
    %6 = vector.broadcast %cst_5 : f32 to vector<256x128xf32>
    %7 = arith.mulf %6, %5 : vector<256x128xf32>
    %cst_6 = arith.constant 0.707106769 : f32
    %8 = vector.broadcast %cst_6 : f32 to vector<256x128xf32>
    %9 = arith.mulf %5, %8 : vector<256x128xf32>
    %10 = math.erf %9 : vector<256x128xf32>
    %cst_7 = arith.constant 1.000000e+00 : f32
    %11 = vector.broadcast %cst_7 : f32 to vector<256x128xf32>
    %12 = arith.addf %11, %10 : vector<256x128xf32>
    %13 = arith.mulf %7, %12 : vector<256x128xf32>
    %14 = arith.truncf %13 : vector<256x128xf32> to vector<256x128xbf16>
    %c0_8 = arith.constant 0 : index
    %c0_9 = arith.constant 0 : index
    %15 = vector.load %arg4[%c0_8, %c0_9] : memref<128x128xbf16, #tpu.memory_space<vmem>>, vector<128x128xbf16>
    %cst_10 = arith.constant dense<0.000000e+00> : vector<256x128xf32>
    %16 = tpu.matmul %14, %15, %cst_10 {dimension_numbers = #tpu.dot_dimension_numbers<[1], [0], [0], [1], [0, 0, 1, 1], [], []>} : vector<256x128xbf16>, vector<128x128xbf16>, vector<256x128xf32> -> vector<256x128xf32>
    %c0_11 = arith.constant 0 : index
    %c0_12 = arith.constant 0 : index
    %17 = vector.load %arg5[%c0_11, %c0_12] : memref<1x128xf32, #tpu.memory_space<vmem>>, vector<1x128xf32>
    %18 = vector.broadcast %17 : vector<1x128xf32> to vector<256x128xf32>
    %19 = arith.addf %16, %18 : vector<256x128xf32>
    %c0_13 = arith.constant 0 : index
    %c0_14 = arith.constant 0 : index
    %20 = vector.load %arg6[%c0_13, %c0_14] : memref<256x128xf32, #tpu.memory_space<vmem>>, vector<256x128xf32>
    tpu.vector_store %arg6[%c0_13, %c0_14], %19 {strides = array<i32>} : memref<256x128xf32, #tpu.memory_space<vmem>>, vector<256x128xf32>,
    return
  }
  func.func @transform_0(%arg0: i32) -> (i32, i32) {
    %c0_i32 = arith.constant 0 : i32
    %c0_i32_0 = arith.constant 0 : i32
    return %arg0, %c0_i32 : i32, i32
  }
  func.func @transform_1(%arg0: i32) -> (i32, i32) {
    %c0_i32 = arith.constant 0 : i32
    %c0_i32_0 = arith.constant 0 : i32
    %c0_i32_1 = arith.constant 0 : i32
    return %c0_i32, %c0_i32_0 : i32, i32
  }
  func.func @transform_2(%arg0: i32) -> (i32, i32) {
    %c0_i32 = arith.constant 0 : i32
    %c0_i32_0 = arith.constant 0 : i32
    %c0_i32_1 = arith.constant 0 : i32
    return %c0_i32, %c0_i32_0 : i32, i32
  }
  func.func @transform_3(%arg0: i32) -> (i32, i32) {
    %c0_i32 = arith.constant 0 : i32
    %c0_i32_0 = arith.constant 0 : i32
    %c0_i32_1 = arith.constant 0 : i32
    return %c0_i32, %c0_i32_0 : i32, i32
  }
  func.func @transform_4(%arg0: i32) -> (i32, i32) {
    %c0_i32 = arith.constant 0 : i32
    %c0_i32_0 = arith.constant 0 : i32
    %c0_i32_1 = arith.constant 0 : i32
    return %c0_i32, %c0_i32_0 : i32, i32
  }
  func.func @transform_5(%arg0: i32) -> (i32, i32) {
    %c0_i32 = arith.constant 0 : i32
    %c0_i32_0 = arith.constant 0 : i32
    return %arg0, %c0_i32 : i32, i32
  }
}

module attributes {stable_mosaic.version = 11 : i64} {
  func.func @_mlp_kernel(%arg0: i32, %arg1: memref<256x128xbf16, #tpu.memory_space<vmem>>, %arg2: memref<128x128xbf16, #tpu.memory_space<vmem>>, %arg3: memref<1x128xf32, #tpu.memory_space<vmem>>, %arg4: memref<128x128xbf16, #tpu.memory_space<vmem>>, %arg5: memref<1x128xf32, #tpu.memory_space<vmem>>, %arg6: memref<256x128xf32, #tpu.memory_space<vmem>>) attributes {dimension_semantics = [#tpu.dimension_semantics<parallel>], iteration_bounds = array<i64: 1>, scalar_prefetch = 0 : i64, scratch_operands = 0 : i64, tpu.core_type = #tpu.core_type<tc>, window_params = [{transform_indices = @transform_0, window_bounds = array<i64: 256, 128>}, {pipeline_mode = #tpu.pipeline_mode<synchronous>, transform_indices = @transform_1, window_bounds = array<i64: 128, 128>}, {pipeline_mode = #tpu.pipeline_mode<synchronous>, transform_indices = @transform_2, window_bounds = array<i64: 1, 128>}, {pipeline_mode = #tpu.pipeline_mode<synchronous>, transform_indices = @transform_3, window_bounds = array<i64: 128, 128>}, {pipeline_mode = #tpu.pipeline_mode<synchronous>, transform_indices = @transform_4, window_bounds = array<i64: 1, 128>}, {transform_indices = @transform_5, window_bounds = array<i64: 256, 128>}]} {
    %c0 = arith.constant 0 : index
    %c0_0 = arith.constant 0 : index
    %0 = vector.load %arg1[%c0, %c0_0] : memref<256x128xbf16, #tpu.memory_space<vmem>>, vector<256x128xbf16>
    %c0_1 = arith.constant 0 : index
    %c0_2 = arith.constant 0 : index
    %1 = vector.load %arg2[%c0_1, %c0_2] : memref<128x128xbf16, #tpu.memory_space<vmem>>, vector<128x128xbf16>
    %cst = arith.constant dense<0.000000e+00> : vector<256x128xf32>
    %2 = tpu.matmul %0, %1, %cst {dimension_numbers = #tpu.dot_dimension_numbers<[1], [0], [0], [1], [0, 0, 1, 1], [], []>} : vector<256x128xbf16>, vector<128x128xbf16>, vector<256x128xf32> -> vector<256x128xf32>
    %c0_3 = arith.constant 0 : index
    %c0_4 = arith.constant 0 : index
    %3 = vector.load %arg3[%c0_3, %c0_4] : memref<1x128xf32, #tpu.memory_space<vmem>>, vector<1x128xf32>
    %4 = vector.broadcast %3 : vector<1x128xf32> to vector<256x128xf32>
    %5 = arith.addf %2, %4 : vector<256x128xf32>
    %cst_5 = arith.constant 5.000000e-01 : f32
    %6 = vector.broadcast %cst_5 : f32 to vector<256x128xf32>
    %7 = arith.mulf %6, %5 : vector<256x128xf32>
    %cst_6 = arith.constant 0.707106769 : f32
    %8 = vector.broadcast %cst_6 : f32 to vector<256x128xf32>
    %9 = arith.mulf %5, %8 : vector<256x128xf32>
    %10 = math.erf %9 : vector<256x128xf32>
    %cst_7 = arith.constant 1.000000e+00 : f32
    %11 = vector.broadcast %cst_7 : f32 to vector<256x128xf32>
    %12 = arith.addf %11, %10 : vector<256x128xf32>
    %13 = arith.mulf %7, %12 : vector<256x128xf32>
    %14 = arith.truncf %13 : vector<256x128xf32> to vector<256x128xbf16>
    %c0_8 = arith.constant 0 : index
    %c0_9 = arith.constant 0 : index
    %15 = vector.load %arg4[%c0_8, %c0_9] : memref<128x128xbf16, #tpu.memory_space<vmem>>, vector<128x128xbf16>
    %cst_10 = arith.constant dense<0.000000e+00> : vector<256x128xf32>
    %16 = tpu.matmul %14, %15, %cst_10 {dimension_numbers = #tpu.dot_dimension_numbers<[1], [0], [0], [1], [0, 0, 1, 1], [], []>} : vector<256x128xbf16>, vector<128x128xbf16>, vector<256x128xf32> -> vector<256x128xf32>
    %c0_11 = arith.constant 0 : index
    %c0_12 = arith.constant 0 : index
    %17 = vector.load %arg5[%c0_11, %c0_12] : memref<1x128xf32, #tpu.memory_space<vmem>>, vector<1x128xf32>
    %18 = vector.broadcast %17 : vector<1x128xf32> to vector<256x128xf32>
    %19 = arith.addf %16, %18 : vector<256x128xf32>
    %c0_13 = arith.constant 0 : index
    %c0_14 = arith.constant 0 : index
    %20 = vector.load %arg6[%c0_13, %c0_14] : memref<256x128xf32, #tpu.memory_space<vmem>>, vector<256x128xf32>
    tpu.vector_store %arg6[%c0_13, %c0_14], %19 {strides = array<i32>} : memref<256x128xf32, #tpu.memory_space<vmem>>, vector<256x128xf32>,
    return
  }
  func.func @transform_0(%arg0: i32) -> (i32, i32) {
    %c0_i32 = arith.constant 0 : i32
    %c0_i32_0 = arith.constant 0 : i32
    return %arg0, %c0_i32 : i32, i32
  }
  func.func @transform_1(%arg0: i32) -> (i32, i32) {
    %c0_i32 = arith.constant 0 : i32
    %c0_i32_0 = arith.constant 0 : i32
    %c0_i32_1 = arith.constant 0 : i32
    return %c0_i32, %c0_i32_0 : i32, i32
  }
  func.func @transform_2(%arg0: i32) -> (i32, i32) {
    %c0_i32 = arith.constant 0 : i32
    %c0_i32_0 = arith.constant 0 : i32
    %c0_i32_1 = arith.constant 0 : i32
    return %c0_i32, %c0_i32_0 : i32, i32
  }
  func.func @transform_3(%arg0: i32) -> (i32, i32) {
    %c0_i32 = arith.constant 0 : i32
    %c0_i32_0 = arith.constant 0 : i32
    %c0_i32_1 = arith.constant 0 : i32
    return %c0_i32, %c0_i32_0 : i32, i32
  }
  func.func @transform_4(%arg0: i32) -> (i32, i32) {
    %c0_i32 = arith.constant 0 : i32
    %c0_i32_0 = arith.constant 0 : i32
    %c0_i32_1 = arith.constant 0 : i32
    return %c0_i32, %c0_i32_0 : i32, i32
  }
  func.func @transform_5(%arg0: i32) -> (i32, i32) {
    %c0_i32 = arith.constant 0 : i32
    %c0_i32_0 = arith.constant 0 : i32
    return %arg0, %c0_i32 : i32, i32
  }
}

</mosaic_0001>

<bundles_post_ra>
// kernel: tpu_custom_call.1
= control target key start
LH: loop header
LB: loop body
LE: loop exit
PB: predicated region body
PF: predicated region fallthrough
CT: control target
= control target key end

     0   :  { %10 = vsyncpa [#allocation3], 0  ;;  %s3779_s0 = inlined_call_operand.hbm [shape: bf16[256,128], index: 0, kind: input, shape index: {}]   ;;  %s3780_s1 = inlined_call_operand.hbm [shape: bf16[128,128], index: 1, kind: input, shape index: {}]   ;;  %s3781_s2 = inlined_call_operand.vmem [shape: f32[1,128], index: 2, kind: input, shape index: {}]   ;;  %s3782_s3 = inlined_call_operand.hbm [shape: bf16[128,128], index: 3, kind: input, shape index: {}]   ;;  %s3783_s4 = inlined_call_operand.vmem [shape: f32[1,128], index: 4, kind: input, shape index: {}]   ;;  %s3784_s5 = inlined_call_operand.hbm [shape: f32[256,128], index: 5, kind: output, shape index: {}]  }
   0x1   :  { %11 = vsyncpa [#allocation6], 0 }
   0x2   :  { %12 = vsyncpa [#allocation4], 0  ;;  %s30_s20 = sshll.u32 %s3780_s1, 4  ;;  %s2371_s21 = smov [#allocation5]   ;;  %s31_s20 = int_to_ptr.hbm [resolvable:$true] %s30_s20 }
   0x3   :  { %s32_s22 = sshll.u32 %s2371_s21, 4  ;;  %s17_s25 = sshll.u32 %s3779_s0, 4  ;;  %s33_s22 = int_to_ptr.vmem [resolvable:$true] %s32_s22  ;;  %s18_s25 = int_to_ptr.hbm [resolvable:$true] %s17_s25 }
   0x4   :  { %s2372_s26 = smov 64   ;;  %s2373_s27 = smov 4  }
   0x5   :  { %38 = dma.hbm_to_vmem [thread:$0]  %s31_s20, 1024, %s33_s22, [#allocation6], %s2372_s26, %s2372_s26, %s2373_s27  }
   0x6   :  { %s2374_s28 = smov [#allocation2]   ;;  %s45_s7 = sshll.u32 %s3782_s3, 4  ;;  %s46_s7 = int_to_ptr.hbm [resolvable:$true] %s45_s7 }
   0x7   :  { %s19_s29 = sshll.u32 %s2374_s28, 4  ;;  %s2375_s1 = smov [#allocation7]   ;;  %s20_s29 = int_to_ptr.vmem [resolvable:$true] %s19_s29 }
   0x8   :  { %25 = dma.hbm_to_vmem [thread:$0]  %s18_s25, 2048, %s20_s29, [#allocation3], %s2372_s26, %s2372_s26, %s2373_s27  }
   0x9   :  { %s47_s8 = sshll.u32 %s2375_s1, 4  ;;  %s48_s8 = int_to_ptr.vmem [resolvable:$true] %s47_s8 }
   0xa   :  { %53 = dma.hbm_to_vmem [thread:$0]  %s46_s7, 1024, %s48_s8, [#allocation6], %s2372_s26, %s2372_s26, %s2373_s27  }
   0xb   :  { %2365 = dma.done.wait [#allocation3], 2048  }
   0xc   :  { %2366 = vsyncadd [#allocation3], 4294965248 }
   0xd   :  { %2367 = dma.done.wait [#allocation6], 2048  }
   0xe   :  { %2368 = vsyncadd [#allocation6], 4294965248  ;;  %v2169_v0 = vld [vmem:[#allocation5 + $0x38] sm:$0xff]  ;;  %v2168_v1 = vld [vmem:[#allocation5 + $0x30] sm:$0xff]  ;;  %s1972_s15 = sshll.u32 %s3784_s5, 4  ;;  %s2377_s16 = smov 128   ;;  %s1973_s15 = int_to_ptr.hbm [resolvable:$true] %s1972_s15 }
   0xf   :  { %264 = vmatpush.bf16.msra.mxu0 %v2169_v0  ;;  %2178 = vmatpush.bf16.msra.mxu2 %v2169_v0  ;;  %v2167_v2 = vld [vmem:[#allocation5 + $0x28] sm:$0xff]  ;;  %v2166_v3 = vld [vmem:[#allocation5 + $0x20] sm:$0xff]  ;;  %v2165_v4 = vld [vmem:[#allocation5 + $0x18] sm:$0xff]  ;;  %s2378_s17 = smov 8  }
  0x10   :  { %v2164_v5 = vld [vmem:[#allocation5 + $0x10] sm:$0xff]  ;;  %v2163_v6 = vld [vmem:[#allocation5 + $0x8] sm:$0xff]  ;;  %v2162_v7 = vld [vmem:[#allocation5] sm:$0xff] }
  0x11   :  { %v2146_v8 = vld [vmem:[#allocation2] sm:$0xff]  ;;  %v2147_v10 = vld [vmem:[#allocation2 + $0x8] sm:$0xff]  ;;  %v2148_v12 = vld [vmem:[#allocation2 + $0x10] sm:$0xff] }
  0x12   :  { %v2154_v9 = vld [vmem:[#allocation2 + $0x40] sm:$0xff]  ;;  %v2155_v11 = vld [vmem:[#allocation2 + $0x48] sm:$0xff]  ;;  %v2156_v13 = vld [vmem:[#allocation2 + $0x50] sm:$0xff] }
  0x13   :  { %265 = vmatpush.bf16.msra.mxu0 %v2168_v1  ;;  %2179 = vmatpush.bf16.msra.mxu2 %v2168_v1  ;;  %v2149_v14 = vld [vmem:[#allocation2 + $0x18] sm:$0xff]  ;;  %v2150_v16 = vld [vmem:[#allocation2 + $0x20] sm:$0xff]  ;;  %v2151_v18 = vld [vmem:[#allocation2 + $0x28] sm:$0xff] }
  0x14   :  { %v2157_v15 = vld [vmem:[#allocation2 + $0x58] sm:$0xff]  ;;  %v2158_v17 = vld [vmem:[#allocation2 + $0x60] sm:$0xff]  ;;  %v2159_v19 = vld [vmem:[#allocation2 + $0x68] sm:$0xff] }
  0x15   :  { %v2152_v20 = vld [vmem:[#allocation2 + $0x30] sm:$0xff]  ;;  %v2153_v22 = vld [vmem:[#allocation2 + $0x38] sm:$0xff]  ;;  %v2421_v24 = vld [vmem:[%s3781_s2] ss:$0 sm:$0xff] }
  0x16   :  { %v2160_v21 = vld [vmem:[#allocation2 + $0x70] sm:$0xff]  ;;  %v2161_v23 = vld [vmem:[#allocation2 + $0x78] sm:$0xff]  ;;  %v2175_v37 = vld [vmem:[#allocation7 + $0x28] sm:$0xff] }
  0x17   :  { %266 = vmatpush.bf16.msra.mxu0 %v2167_v2  ;;  %2180 = vmatpush.bf16.msra.mxu2 %v2167_v2  ;;  %v2177_v27 = vld [vmem:[#allocation7 + $0x38] sm:$0xff]  ;;  %v2176_v30 = vld [vmem:[#allocation7 + $0x30] sm:$0xff]  ;;  %v2174_v43 = vld [vmem:[#allocation7 + $0x20] sm:$0xff] }
  0x18   :  { %1845 = vmatpush.bf16.msra.mxu1 %v2177_v27  ;;  %2186 = vmatpush.bf16.msra.mxu3 %v2177_v27  ;;  %v2173_v51 = vld [vmem:[#allocation7 + $0x18] sm:$0xff]  ;;  %v2172_v59 = vld [vmem:[#allocation7 + $0x10] sm:$0xff] }
  0x1b   :  { %267 = vmatpush.bf16.msra.mxu0 %v2166_v3  ;;  %2181 = vmatpush.bf16.msra.mxu2 %v2166_v3 }
  0x1c   :  { %1846 = vmatpush.bf16.msra.mxu1 %v2176_v30  ;;  %2187 = vmatpush.bf16.msra.mxu3 %v2176_v30 }
  0x1f   :  { %268 = vmatpush.bf16.msra.mxu0 %v2165_v4  ;;  %2182 = vmatpush.bf16.msra.mxu2 %v2165_v4 }
  0x20   :  { %1847 = vmatpush.bf16.msra.mxu1 %v2175_v37  ;;  %2188 = vmatpush.bf16.msra.mxu3 %v2175_v37 }
  0x23   :  { %269 = vmatpush.bf16.msra.mxu0 %v2164_v5  ;;  %2183 = vmatpush.bf16.msra.mxu2 %v2164_v5 }
  0x24   :  { %1848 = vmatpush.bf16.msra.mxu1 %v2174_v43  ;;  %2189 = vmatpush.bf16.msra.mxu3 %v2174_v43 }
  0x27   :  { %270 = vmatpush.bf16.msra.mxu0 %v2163_v6  ;;  %2184 = vmatpush.bf16.msra.mxu2 %v2163_v6 }
  0x28   :  { %1849 = vmatpush.bf16.msra.mxu1 %v2173_v51  ;;  %2190 = vmatpush.bf16.msra.mxu3 %v2173_v51 }
  0x2b   :  { %271 = vmatpush.bf16.msra.mxu0 %v2162_v7  ;;  %2185 = vmatpush.bf16.msra.mxu2 %v2162_v7  ;;  %v2171_v7 = vld [vmem:[#allocation7 + $0x8] sm:$0xff] }
  0x2c   :  { %1850 = vmatpush.bf16.msra.mxu1 %v2172_v59  ;;  %2191 = vmatpush.bf16.msra.mxu3 %v2172_v59 }
  0x2e   :  { %272 = vmatmul.bf16.vlgmr.msra.gmra.mxu0 %v2146_v8  ;;  %312 = vmatmul.bf16.vlgmr.msra.gmra.mxu2 %v2154_v9 }
  0x30   :  { %1851 = vmatpush.bf16.msra.mxu1 %v2171_v7  ;;  %2192 = vmatpush.bf16.msra.mxu3 %v2171_v7 }
  0x3e   :  { %277 = vmatmul.bf16.gmra.mxu0 %v2147_v10  ;;  %317 = vmatmul.bf16.gmra.mxu2 %v2155_v11 }
  0x4e   :  { %282 = vmatmul.bf16.gmra.mxu0 %v2148_v12  ;;  %322 = vmatmul.bf16.gmra.mxu2 %v2156_v13 }
  0x5e   :  { %287 = vmatmul.bf16.gmra.mxu0 %v2149_v14  ;;  %327 = vmatmul.bf16.gmra.mxu2 %v2157_v15 }
  0x6e   :  { %292 = vmatmul.bf16.gmra.mxu0 %v2150_v16  ;;  %332 = vmatmul.bf16.gmra.mxu2 %v2158_v17  ;;  %v2170_v16 = vld [vmem:[#allocation7] sm:$0xff] }
  0x6f   :  { %1852 = vmatpush.bf16.msra.mxu1 %v2170_v16  ;;  %2193 = vmatpush.bf16.msra.mxu3 %v2170_v16 }
  0x7e   :  { %297 = vmatmul.bf16.gmra.mxu0 %v2151_v18  ;;  %337 = vmatmul.bf16.gmra.mxu2 %v2159_v19 }
  0x8e   :  { %302 = vmatmul.bf16.gmra.mxu0 %v2152_v20  ;;  %342 = vmatmul.bf16.gmra.mxu2 %v2160_v21 }
  0x9e   :  { %307 = vmatmul.bf16.gmra.mxu0 %v2153_v22  ;;  %347 = vmatmul.bf16.gmra.mxu2 %v2161_v23 }
  0xab   :  { %v273_v25 = vpop.f32.mrf.mxu0 }
  0xac   :  { %v2424_v26 = vadd.f32 %v2421_v24, %v273_v25 }
  0xae   :  { %v2427_v28 = vmul.f32 0.70710677, %v2424_v26 }
  0xb0   :  { %v417_v29 = vmul.f32 %v2427_v28, %v2427_v28 }
  0xb1   :  { %v313_v31 = vpop.f32.mrf.mxu2 }
  0xb2   :  { %v2432_v32 = vadd.f32 %v2421_v24, %v313_v31  ;;  %v2434_v33 = vmin.f32 %v417_v29, 16.0 }
  0xb3   :  { %v275_v34 = vpop.f32.mrf.mxu0 }
  0xb4   :  { %v2437_v35 = vmul.f32 0.70710677, %v2432_v32  ;;  %v2440_v36 = vadd.f32 %v2421_v24, %v275_v34  ;;  %v419_v38 = vmul.f32 2.1237322e-06, %v2434_v33  ;;  %v430_v41 = vmul.f32 3.8918573e-05, %v2434_v33 }
  0xb5   :  { %v2543_v7 = vmul.f32 0.5, %v2432_v32 }
  0xb6   :  { %v1057_v39 = vmul.f32 %v2437_v35, %v2437_v35  ;;  %v2446_v40 = vmul.f32 0.70710677, %v2440_v36  ;;  %v420_v45 = vadd.f32 0.00028619796, %v419_v38  ;;  %v431_v49 = vadd.f32 0.001143296, %v430_v41 }
  0xb7   :  { %3798 = vst [vmem:[#allocation12_spill] sm:$0xff] %v2543_v7  ;;  %v2555_v32 = vmul.f32 0.5, %v2440_v36 }
  0xb8   :  { %v2452_v46 = vmin.f32 %v1057_v39, 16.0  ;;  %v457_v48 = vmul.f32 %v2446_v40, %v2446_v40  ;;  %v421_v53 = vmul.f32 %v420_v45, %v2434_v33  ;;  %v432_v56 = vmul.f32 %v431_v49, %v2434_v33 }
  0xb9   :  { %v315_v42 = vpop.f32.mrf.mxu2  ;;  %3799 = vst [vmem:[#allocation13_spill] sm:$0xff] %v2555_v32 }
  0xba   :  { %v2450_v44 = vadd.f32 %v2421_v24, %v315_v42  ;;  %v1059_v54 = vmul.f32 2.1237322e-06, %v2452_v46  ;;  %v2464_v55 = vmin.f32 %v457_v48, 16.0  ;;  %v422_v62 = vadd.f32 0.0036580483, %v421_v53 }
  0xbb   :  { %v278_v47 = vpop.f32.mrf.mxu0  ;;  %v433_v2 = vadd.f32 0.014752088, %v432_v56 }
  0xbc   :  { %v2457_v50 = vadd.f32 %v2421_v24, %v278_v47  ;;  %v2460_v52 = vmul.f32 0.70710677, %v2450_v44  ;;  %v1060_v63 = vadd.f32 0.00028619796, %v1059_v54  ;;  %v459_v1 = vmul.f32 2.1237322e-06, %v2464_v55 }
  0xbd   :  { %v423_v8 = vmul.f32 %v422_v62, %v2434_v33  ;;  %v434_v13 = vmul.f32 %v433_v2, %v2434_v33  ;;  %v2527_v54 = vmul.f32 0.5, %v2424_v26 }
  0xbe   :  { %v2468_v57 = vmul.f32 0.70710677, %v2457_v50  ;;  %v1097_v60 = vmul.f32 %v2460_v52, %v2460_v52  ;;  %v1061_v9 = vmul.f32 %v1060_v63, %v2452_v46  ;;  %v460_v11 = vadd.f32 0.00028619796, %v459_v1 }
  0xbf   :  { %v424_v20 = vadd.f32 0.05243302, %v423_v8  ;;  %v435_v27 = vadd.f32 0.112945676, %v434_v13 }
  0xc0   :  { %v497_v3 = vmul.f32 %v2468_v57, %v2468_v57  ;;  %v2484_v6 = vmin.f32 %v1097_v60, 16.0  ;;  %v1062_v21 = vadd.f32 0.0036580483, %v1061_v9  ;;  %v461_v25 = vmul.f32 %v460_v11, %v2464_v55 }
  0xc1   :  { %v318_v58 = vpop.f32.mrf.mxu2  ;;  %v425_v38 = vmul.f32 %v424_v20, %v2434_v33  ;;  %v436_v53 = vmul.f32 %v435_v27, %v2434_v33  ;;  %v2558_v20 = vmul.f32 0.5, %v2450_v44 }
  0xc2   :  { %v2473_v61 = vadd.f32 %v2421_v24, %v318_v58  ;;  %v2494_v14 = vmin.f32 %v497_v3, 16.0  ;;  %v1099_v17 = vmul.f32 2.1237322e-06, %v2484_v6  ;;  %v1063_v39 = vmul.f32 %v1062_v21, %v2452_v46 }
  0xc3   :  { %v280_v0 = vpop.f32.mrf.mxu0  ;;  %v462_v43 = vadd.f32 0.0036580483, %v461_v25  ;;  %v426_v60 = vadd.f32 0.18741608, %v425_v38  ;;  %3800 = vst [vmem:[#allocation14_spill] sm:$0xff] %v2558_v20 }
  0xc4   :  { %v2479_v4 = vmul.f32 0.70710677, %v2473_v61  ;;  %v2482_v5 = vadd.f32 %v2421_v24, %v280_v0  ;;  %v499_v29 = vmul.f32 2.1237322e-06, %v2494_v14  ;;  %v1100_v34 = vadd.f32 0.00028619796, %v1099_v17 }
  0xc5   :  { %v1064_v62 = vadd.f32 0.05243302, %v1063_v39  ;;  %v463_v1 = vmul.f32 %v462_v43, %v2464_v55  ;;  %v427_v17 = vmul.f32 %v426_v60, %v2434_v33 }
  0xc6   :  { %v1137_v10 = vmul.f32 %v2479_v4, %v2479_v4  ;;  %v2491_v12 = vmul.f32 0.70710677, %v2482_v5  ;;  %v500_v47 = vadd.f32 0.00028619796, %v499_v29  ;;  %v1101_v56 = vmul.f32 %v1100_v34, %v2484_v6 }
  0xc7   :  { %v464_v21 = vadd.f32 0.05243302, %v463_v1  ;;  %v2564_v29 = vmul.f32 0.5, %v2457_v50 }
  0xc8   :  { %v537_v18 = vmul.f32 %v2491_v12, %v2491_v12  ;;  %v2502_v22 = vmin.f32 %v1137_v10, 16.0  ;;  %v501_v8 = vmul.f32 %v500_v47, %v2494_v14  ;;  %v437_v10 = vadd.f32 0.4994258, %v436_v53 }
  0xc9   :  { %v320_v15 = vpop.f32.mrf.mxu2  ;;  %v1102_v11 = vadd.f32 0.0036580483, %v1101_v56  ;;  %3801 = vst [vmem:[#allocation15_spill] sm:$0xff] %v2564_v29  ;;  %v428_v56 = vadd.f32 1.1283791, %v427_v17 }
  0xca   :  { %v2500_v19 = vadd.f32 %v2421_v24, %v320_v15  ;;  %v2506_v30 = vmin.f32 %v537_v18, 16.0  ;;  %v1139_v41 = vmul.f32 2.1237322e-06, %v2502_v22  ;;  %v1065_v18 = vmul.f32 %v1064_v62, %v2452_v46 }
  0xcb   :  { %v283_v23 = vpop.f32.mrf.mxu0  ;;  %v502_v34 = vadd.f32 0.0036580483, %v501_v8  ;;  %v438_v43 = vmul.f32 %v437_v10, %v2434_v33 }
  0xcc   :  { %v2509_v31 = vmul.f32 0.70710677, %v2500_v19  ;;  %v2512_v37 = vadd.f32 %v2421_v24, %v283_v23  ;;  %v539_v48 = vmul.f32 2.1237322e-06, %v2506_v30  ;;  %v1140_v63 = vadd.f32 0.00028619796, %v1139_v41 }
  0xcd   :  { %v1103_v41 = vmul.f32 %v1102_v11, %v2484_v6  ;;  %v1066_v47 = vadd.f32 0.18741608, %v1065_v18  ;;  %v2597_v11 = vmul.f32 0.5, %v2482_v5 }
  0xce   :  { %v1177_v42 = vmul.f32 %v2509_v31, %v2509_v31  ;;  %v2520_v45 = vmul.f32 0.70710677, %v2512_v37  ;;  %v540_v9 = vadd.f32 0.00028619796, %v539_v48  ;;  %v1141_v23 = vmul.f32 %v1140_v63, %v2502_v22 }
  0xcf   :  { %v2576_v48 = vmul.f32 0.5, %v2473_v61  ;;  %v503_v63 = vmul.f32 %v502_v34, %v2494_v14  ;;  %v1104_v1 = vadd.f32 0.05243302, %v1103_v41  ;;  %v1067_v10 = vmul.f32 %v1066_v47, %v2452_v46  ;;  %3803 = vst [vmem:[#allocation17_spill] sm:$0xff] %v2597_v11 }
  0xd0   :  { %v2523_v49 = vmin.f32 %v1177_v42, 16.0  ;;  %v577_v58 = vmul.f32 %v2520_v45, %v2520_v45  ;;  %v541_v38 = vmul.f32 %v540_v9, %v2506_v30  ;;  %v1142_v60 = vadd.f32 0.0036580483, %v1141_v23 }
  0xd1   :  { %v323_v51 = vpop.f32.mrf.mxu2  ;;  %3802 = vst [vmem:[#allocation16_spill] sm:$0xff] %v2576_v48  ;;  %v2593_v9 = vadd.f32 1.0, %v438_v43  ;;  %v504_v34 = vadd.f32 0.05243302, %v503_v63  ;;  %v1105_v41 = vmul.f32 %v1104_v1, %v2484_v6 }
  0xd2   :  { %v2533_v59 = vadd.f32 %v2421_v24, %v323_v51  ;;  %v1179_v2 = vmul.f32 2.1237322e-06, %v2523_v49  ;;  %v2537_v3 = vmin.f32 %v577_v58, 16.0  ;;  %v465_v58 = vmul.f32 %v464_v21, %v2464_v55 }
  0xd3   :  { %v285_v0 = vpop.f32.mrf.mxu0  ;;  %v1143_v18 = vmul.f32 %v1142_v60, %v2502_v22  ;;  %2204 = vrcp.f32 %v2593_v9  ;;  %v505_v63 = vmul.f32 %v504_v34, %v2494_v14  ;;  %vm445_vm0 = vweird.f32 %v2593_v9 }
  0xd4   :  { %v2540_v26 = vmul.f32 0.70710677, %v2533_v59  ;;  %v579_v13 = vmul.f32 2.1237322e-06, %v2537_v3  ;;  %v2550_v16 = vadd.f32 %v2421_v24, %v285_v0  ;;  %v1180_v25 = vadd.f32 0.00028619796, %v1179_v2 }
  0xd5   :  { %v542_v0 = vadd.f32 0.0036580483, %v541_v38  ;;  %v466_v17 = vadd.f32 0.18741608, %v465_v58  ;;  %v1144_v60 = vadd.f32 0.05243302, %v1143_v18 }
  0xd6   :  { %v1217_v15 = vmul.f32 %v2540_v26, %v2540_v26  ;;  %v2568_v39 = vmul.f32 0.70710677, %v2550_v16  ;;  %v580_v44 = vadd.f32 0.00028619796, %v579_v13  ;;  %v1181_v62 = vmul.f32 %v1180_v25, %v2523_v49 }
  0xd7   :  { %v2604_v25 = vmul.f32 %v428_v56, %v2427_v28  ;;  %v543_v38 = vmul.f32 %v542_v0, %v2506_v30  ;;  %v1068_v56 = vadd.f32 1.1283791, %v1067_v10  ;;  %v467_v58 = vmul.f32 %v466_v17, %v2464_v55 }
  0xd8   :  { %v2561_v27 = vmin.f32 %v1217_v15, 16.0  ;;  %v617_v51 = vmul.f32 %v2568_v39, %v2568_v39  ;;  %v581_v2 = vmul.f32 %v580_v44, %v2537_v3  ;;  %v1182_v21 = vadd.f32 0.0036580483, %v1181_v62 }
  0xd9   :  { %v325_v36 = vpop.f32.mrf.mxu2  ;;  %v544_v0 = vadd.f32 0.05243302, %v543_v38  ;;  %v2634_v17 = vmul.f32 0.5, %v2500_v19  ;;  %v2638_v38 = vpop.eup %2204  ;;  %v506_v48 = vadd.f32 0.18741608, %v505_v63 }
  0xda   :  { %v2572_v42 = vadd.f32 %v2421_v24, %v325_v36  ;;  %v1219_v50 = vmul.f32 2.1237322e-06, %v2561_v27  ;;  %v2584_v33 = vmin.f32 %v617_v51, 16.0  ;;  %v582_v44 = vadd.f32 0.0036580483, %v581_v2 }
  0xdb   :  { %v288_v53 = vpop.f32.mrf.mxu0  ;;  %v1183_v62 = vmul.f32 %v1182_v21, %v2523_v49  ;;  %3806 = vst [vmem:[#allocation20_spill] sm:$0xff] %v2634_v17  ;;  %v545_v19 = vmul.f32 %v544_v0, %v2506_v30  ;;  %vm446_vm1 = vweird.f32 %v2638_v38 }
  0xdc   :  { %v2587_v61 = vadd.f32 %v2421_v24, %v288_v53  ;;  %v2591_v8 = vmul.f32 0.70710677, %v2572_v42  ;;  %v1220_v13 = vadd.f32 0.00028619796, %v1219_v50  ;;  %v619_v15 = vmul.f32 2.1237322e-06, %v2584_v33  ;;  %vm2768_vm2 = vmor %vm445_vm0, %vm446_vm1 }
  0xde   :  { %v1257_v23 = vmul.f32 %v2591_v8, %v2591_v8  ;;  %v2608_v36 = vmul.f32 0.70710677, %v2587_v61  ;;  %v1221_v47 = vmul.f32 %v1220_v13, %v2561_v27  ;;  %v620_v50 = vadd.f32 0.00028619796, %v619_v15 }
  0xdf   :  { %v1106_v13 = vadd.f32 0.18741608, %v1105_v41  ;;  %v583_v15 = vmul.f32 %v582_v44, %v2537_v3  ;;  %v1145_v41 = vmul.f32 %v1144_v60, %v2502_v22 }
  0xe0   :  { %3804 = vst [vmem:[#allocation18_spill] sm:$0xff] %v2608_v36  ;;  %v2611_v43 = vmin.f32 %v1257_v23, 16.0  ;;  %v657_v28 = vmul.f32 %v2608_v36, %v2608_v36  ;;  %v1222_v18 = vadd.f32 0.0036580483, %v1221_v47  ;;  %v621_v21 = vmul.f32 %v620_v50, %v2584_v33 }
  0xe1   :  { %v328_v5 = vpop.f32.mrf.mxu2  ;;  %v1107_v17 = vmul.f32 %v1106_v13, %v2484_v6  ;;  %v584_v11 = vadd.f32 0.05243302, %v583_v15  ;;  %v1146_v0 = vadd.f32 0.18741608, %v1145_v41  ;;  %v507_v15 = vmul.f32 %v506_v48, %v2494_v14 }
  0xe2   :  { %v2618_v51 = vadd.f32 %v2421_v24, %v328_v5  ;;  %v2623_v1 = vmin.f32 %v657_v28, 16.0  ;;  %v1259_v23 = vmul.f32 2.1237322e-06, %v2611_v43  ;;  %v468_v5 = vadd.f32 1.1283791, %v467_v58 }
  0xe3   :  { %v290_v53 = vpop.f32.mrf.mxu0  ;;  %v1184_v28 = vadd.f32 0.05243302, %v1183_v62  ;;  %v1223_v60 = vmul.f32 %v1222_v18, %v2561_v27  ;;  %v622_v62 = vadd.f32 0.0036580483, %v621_v21  ;;  %v2665_v18 = vmul.f32 0.5, %v2512_v37 }
  0xe4   :  { %v2626_v2 = vadd.f32 %v2421_v24, %v290_v53  ;;  %v2631_v10 = vmul.f32 0.70710677, %v2618_v51  ;;  %v659_v34 = vmul.f32 2.1237322e-06, %v2623_v1  ;;  %v2644_v53 = vmul.f32 %v1068_v56, %v2437_v35 }
  0xe5   :  { %v1260_v58 = vadd.f32 0.00028619796, %v1259_v23  ;;  %v2658_v63 = vmul.f32 %v468_v5, %v2446_v40  ;;  %v1185_v7 = vmul.f32 %v1184_v28, %v2523_v49  ;;  %v546_v23 = vadd.f32 0.18741608, %v545_v19  ;;  %3808 = vst [vmem:[#allocation22_spill] sm:$0xff] %v2665_v18 }
  0xe6   :  { %3805 = vst [vmem:[#allocation19_spill] sm:$0xff] %v2631_v10  ;;  %v1297_v44 = vmul.f32 %v2631_v10, %v2631_v10  ;;  %v2648_v47 = vmul.f32 0.70710677, %v2626_v2  ;;  %v660_v29 = vadd.f32 0.00028619796, %v659_v34  ;;  %v585_v34 = vmul.f32 %v584_v11, %v2537_v3 }
  0xe7   :  { %v1261_v40 = vmul.f32 %v1260_v58, %v2611_v43  ;;  %v1108_v28 = vadd.f32 1.1283791, %v1107_v17  ;;  %v623_v48 = vmul.f32 %v622_v62, %v2584_v33  ;;  %v1147_v37 = vmul.f32 %v1146_v0, %v2502_v22 }
  0xe8   :  { %3807 = vst [vmem:[#allocation21_spill] sm:$0xff] %v2648_v47  ;;  %v2652_v20 = vmin.f32 %v1297_v44, 16.0  ;;  %v697_v13 = vmul.f32 %v2648_v47, %v2648_v47  ;;  %v661_v5 = vmul.f32 %v660_v29, %v2623_v1  ;;  %v1224_v44 = vadd.f32 0.05243302, %v1223_v60 }
  0xe9   :  { %v330_v50 = vpop.f32.mrf.mxu2  ;;  %v508_v58 = vadd.f32 1.1283791, %v507_v15  ;;  %v2684_v29 = vmul.f32 0.5, %v2533_v59  ;;  %v441_v17 = vmul.f32 %v2638_v38, %v2593_v9  ;;  %v547_v60 = vmul.f32 %v546_v23, %v2506_v30 }
  0xea   :  { %v2655_v35 = vadd.f32 %v2421_v24, %v330_v50  ;;  %v1299_v19 = vmul.f32 2.1237322e-06, %v2652_v20  ;;  %v1186_v50 = vadd.f32 0.18741608, %v1185_v7  ;;  %v586_v62 = vadd.f32 0.18741608, %v585_v34 }
  0xeb   :  { %v293_v56 = vpop.f32.mrf.mxu0  ;;  %3810 = vst [vmem:[#allocation24_spill] sm:$0xff] %v2684_v29  ;;  %v1262_v0 = vadd.f32 0.0036580483, %v1261_v40  ;;  %v662_v7 = vadd.f32 0.0036580483, %v661_v5  ;;  %v2701_v32 = vmul.f32 %v508_v58, %v2468_v57  ;;  %v2704_v23 = vmul.f32 0.5, %v2550_v16 }
  0xec   :  { %v2668_v21 = vadd.f32 %v2421_v24, %v293_v56  ;;  %v2674_v41 = vmul.f32 0.70710677, %v2655_v35  ;;  %v2679_v56 = vmin.f32 %v697_v13, 16.0  ;;  %v2693_v13 = vmul.f32 %v1108_v28, %v2460_v52 }
  0xed   :  { %v624_v15 = vadd.f32 0.05243302, %v623_v48  ;;  %v1300_v47 = vadd.f32 0.00028619796, %v1299_v19  ;;  %v1148_v59 = vadd.f32 1.1283791, %v1147_v37  ;;  %v1187_v29 = vmul.f32 %v1186_v50, %v2523_v49 }
  0xee   :  { %3809 = vst [vmem:[#allocation23_spill] sm:$0xff] %v2674_v41  ;;  %v1337_v11 = vmul.f32 %v2674_v41, %v2674_v41  ;;  %v2687_v18 = vmul.f32 0.70710677, %v2668_v21  ;;  %v1225_v41 = vmul.f32 %v1224_v44, %v2561_v27  ;;  %v699_v10 = vmul.f32 2.1237322e-06, %v2679_v56 }
  0xef   :  { %v442_v34 = vsub.f32 1.0, %v441_v17  ;;  %v548_v40 = vadd.f32 1.1283791, %v547_v60  ;;  %v587_v5 = vmul.f32 %v586_v62, %v2537_v3  ;;  %v1263_v28 = vmul.f32 %v1262_v0, %v2611_v43 }
  0xf0   :  { %v2698_v36 = vmin.f32 %v1337_v11, 16.0  ;;  %v737_v52 = vmul.f32 %v2687_v18, %v2687_v18  ;;  %v663_v44 = vmul.f32 %v662_v7, %v2623_v1  ;;  %v1226_v48 = vadd.f32 0.18741608, %v1225_v41 }
  0xf1   :  { %v625_v19 = vmul.f32 %v624_v15, %v2584_v33  ;;  %v2713_v57 = vmul.f32 0.5, %v2572_v42  ;;  %v1301_v16 = vmul.f32 %v1300_v47, %v2652_v20  ;;  %v2717_v37 = vmul.f32 %v1148_v59, %v2479_v4 }
  0xf2   :  { %v1188_v50 = vadd.f32 1.1283791, %v1187_v29  ;;  %v700_v11 = vadd.f32 0.00028619796, %v699_v10  ;;  %v1339_v58 = vmul.f32 2.1237322e-06, %v2698_v36  ;;  %v443_v42 = vmul.f32 %v2638_v38, %v442_v34 }
  0xf3   :  { %3811 = vst [vmem:[#allocation25_spill] sm:$0xff] %v2713_v57  ;;  %v2721_v17 = vmul.f32 0.5, %v2587_v61  ;;  %v2724_v60 = vmul.f32 0.5, %v2618_v51  ;;  %v2726_v41 = vmin.f32 %v737_v52, 16.0  ;;  %v2730_v62 = vmul.f32 %v548_v40, %v2491_v12 }
  0xf4   :  { %v588_v47 = vadd.f32 1.1283791, %v587_v5  ;;  %v1264_v4 = vadd.f32 0.05243302, %v1263_v28  ;;  %v664_v0 = vadd.f32 0.05243302, %v663_v44  ;;  %v1227_v10 = vmul.f32 %v1226_v48, %v2561_v27 }
  0xf5   :  { %3812 = vst [vmem:[#allocation26_spill] sm:$0xff] %v2721_v17  ;;  %v626_v29 = vadd.f32 0.18741608, %v625_v19  ;;  %v1302_v7 = vadd.f32 0.0036580483, %v1301_v16  ;;  %v2735_v15 = vmul.f32 %v1188_v50, %v2509_v31  ;;  %v701_v51 = vmul.f32 %v700_v11, %v2679_v56 }
  0xf6   :  { %3813 = vst [vmem:[#allocation27_spill] sm:$0xff] %v2724_v60  ;;  %v470_v61 = vmul.f32 3.8918573e-05, %v2464_v55  ;;  %v1340_v59 = vadd.f32 0.00028619796, %v1339_v58  ;;  %v2740_v12 = vmul.f32 0.5, %v2626_v2  ;;  %v444_v40 = vadd.f32 %v2638_v38, %v443_v42 }
  0xf7   :  { %v1070_v52 = vmul.f32 3.8918573e-05, %v2452_v46  ;;  %v739_v34 = vmul.f32 2.1237322e-06, %v2726_v41  ;;  %v2745_v28 = vmul.f32 %v588_v47, %v2520_v45  ;;  %v1265_v44 = vmul.f32 %v1264_v4, %v2611_v43 }
  0xf8   :  { %3814 = vst [vmem:[#allocation28_spill] sm:$0xff] %v2740_v12  ;;  %v471_v5 = vadd.f32 0.001143296, %v470_v61  ;;  %v665_v31 = vmul.f32 %v664_v0, %v2623_v1  ;;  %v2749_v19 = vadd.f32 1.1283791, %v1227_v10  ;;  %v627_v16 = vmul.f32 %v626_v29, %v2584_v33 }
  0xf9   :  { %v1071_v48 = vadd.f32 0.001143296, %v1070_v52  ;;  %v1303_v2 = vmul.f32 %v1302_v7, %v2652_v20  ;;  %v702_v11 = vadd.f32 0.0036580483, %v701_v51  ;;  %v1341_v58 = vmul.f32 %v1340_v59, %v2698_v36 }
  0xfa   :  { %v472_v50 = vmul.f32 %v471_v5, %v2464_v55  ;;  %v1110_v45 = vmul.f32 3.8918573e-05, %v2484_v6  ;;  %v740_v47 = vadd.f32 0.00028619796, %v739_v34  ;;  %v449_v4 = vand.u32 2147483647, %v2593_v9 }
  0xfb   :  { %v1072_v42 = vmul.f32 %v1071_v48, %v2452_v46  ;;  %v1266_v10 = vadd.f32 0.18741608, %v1265_v44  ;;  %v666_v61 = vadd.f32 0.18741608, %v665_v31  ;;  %v1304_v7 = vadd.f32 0.05243302, %v1303_v2 }
  0xfc   :  { %v473_v0 = vadd.f32 0.014752088, %v472_v50  ;;  %v451_v51 = vand.u32 2147483648, %v2593_v9  ;;  %v1111_v52 = vadd.f32 0.001143296, %v1110_v45  ;;  %v703_v5 = vmul.f32 %v702_v11, %v2679_v56 }
  0xfd   :  { %v1073_v29 = vadd.f32 0.014752088, %v1072_v42  ;;  %v1342_v48 = vadd.f32 0.0036580483, %v1341_v58  ;;  %v510_v60 = vmul.f32 3.8918573e-05, %v2494_v14  ;;  %v741_v50 = vmul.f32 %v740_v47, %v2726_v41 }
  0xfe   :  { %v474_v59 = vmul.f32 %v473_v0, %v2464_v55  ;;  %vm2772_vm3 = vcmp.eq.f32.partialorder %v449_v4, 8.507059e+37  ;;  %v1112_v11 = vmul.f32 %v1111_v52, %v2484_v6  ;;  %v448_v58 = vsel %vm2768_vm2, %v2638_v38, %v444_v40 }
  0xff   :  { %v1074_v34 = vmul.f32 %v1073_v29, %v2452_v46  ;;  %v511_v45 = vadd.f32 0.001143296, %v510_v60  ;;  %v550_v47 = vmul.f32 3.8918573e-05, %v2506_v30  ;;  %v1305_v9 = vmul.f32 %v1304_v7, %v2652_v20 }
 0x100   :  { %v475_v2 = vadd.f32 0.112945676, %v474_v59  ;;  %v452_v0 = vor.u32 1.1754944e-38, %v451_v51  ;;  %v1113_v4 = vadd.f32 0.014752088, %v1112_v11  ;;  %v1343_v17 = vmul.f32 %v1342_v48, %v2698_v36  ;;  %v333_v51 = vpop.f32.mrf.mxu2 }
 0x101   :  { %v1075_v42 = vadd.f32 0.112945676, %v1074_v34  ;;  %v704_v12 = vadd.f32 0.05243302, %v703_v5  ;;  %v512_v52 = vmul.f32 %v511_v45, %v2494_v14  ;;  %v742_v57 = vadd.f32 0.0036580483, %v741_v50 }
 0x102   :  { %v476_v29 = vmul.f32 %v475_v2, %v2464_v55  ;;  %v453_v38 = vsel %vm2772_vm3, %v452_v0, %v448_v58  ;;  %v1114_v40 = vmul.f32 %v1113_v4, %v2484_v6  ;;  %v1267_v7 = vmul.f32 %v1266_v10, %v2611_v43 }
 0x103   :  { %v1076_v59 = vmul.f32 %v1075_v42, %v2452_v46  ;;  %v513_v44 = vadd.f32 0.014752088, %v512_v52  ;;  %v551_v2 = vadd.f32 0.001143296, %v550_v47  ;;  %v1306_v5 = vadd.f32 0.18741608, %v1305_v9 }
 0x104   :  { %v477_v60 = vadd.f32 0.4994258, %v476_v29  ;;  %v2792_v11 = vadd.f32 %v2421_v24, %v333_v51  ;;  %v1115_v42 = vadd.f32 0.112945676, %v1114_v40  ;;  %v1344_v50 = vadd.f32 0.05243302, %v1343_v17  ;;  %v295_v51 = vpop.f32.mrf.mxu0 }
 0x105   :  { %v1077_v34 = vadd.f32 0.4994258, %v1076_v59  ;;  %v454_v31 = vmul.f32 %v453_v38, %v2604_v25  ;;  %v514_v45 = vmul.f32 %v513_v44, %v2494_v14  ;;  %v743_v10 = vmul.f32 %v742_v57, %v2726_v41 }
 0x106   :  { %v478_v48 = vmul.f32 %v477_v60, %v2464_v55  ;;  %v2801_v47 = vmul.f32 0.70710677, %v2792_v11  ;;  %v1116_v55 = vmul.f32 %v1115_v42, %v2484_v6  ;;  %v628_v9 = vadd.f32 1.1283791, %v627_v16 }
 0x107   :  { %v1078_v58 = vmul.f32 %v1077_v34, %v2452_v46  ;;  %v515_v4 = vadd.f32 0.112945676, %v514_v45  ;;  %v552_v17 = vmul.f32 %v551_v2, %v2506_v30  ;;  %v1268_v25 = vadd.f32 1.1283791, %v1267_v7 }
 0x108   :  { %v2798_v0 = vadd.f32 1.0, %v478_v48  ;;  %v667_v46 = vmul.f32 %v666_v61, %v2623_v1  ;;  %v705_v59 = vmul.f32 %v704_v12, %v2679_v56  ;;  %v1307_v57 = vmul.f32 %v1306_v5, %v2652_v20 }
 0x109   :  { %v2804_v29 = vadd.f32 1.0, %v1078_v58  ;;  %v1345_v52 = vmul.f32 %v1344_v50, %v2698_v36  ;;  %v1377_v38 = vmul.f32 %v2801_v47, %v2801_v47  ;;  %v2816_v16 = vmul.f32 0.5, %v2655_v35 }
 0x10a   :  { %2206 = vrcp.f32 %v2798_v0  ;;  %v744_v60 = vadd.f32 0.05243302, %v743_v10  ;;  %v2082_v40 = vclamps-f32 %v454_v31, 1.0  ;;  %v1117_v7 = vadd.f32 0.4994258, %v1116_v55 }
 0x10b   :  { %2208 = vrcp.f32 %v2804_v29  ;;  %3819 = vst [vmem:[#allocation29_spill] sm:$0xff] %v2816_v16  ;;  %v2820_v12 = vmul.f32 %v2749_v19, %v2540_v26  ;;  %v2823_v61 = vmul.f32 0.5, %v2668_v21  ;;  %v516_v34 = vmul.f32 %v515_v4, %v2494_v14 }
 0x10c   :  { %v553_v44 = vadd.f32 0.014752088, %v552_v17  ;;  %v2827_v2 = vmul.f32 %v628_v9, %v2568_v39  ;;  %v2829_v5 = vadd.f32 1.1283791, %v667_v46  ;;  %v2831_v35 = vmin.f32 %v1377_v38, 16.0 }
 0x10d   :  { %3820 = vst [vmem:[#allocation30_spill] sm:$0xff] %v2820_v12  ;;  %v1118_v48 = vmul.f32 %v1117_v7, %v2484_v6  ;;  %v2835_v42 = vmul.f32 %v1268_v25, %v2591_v8  ;;  %v2837_v26 = vadd.f32 1.1283791, %v1307_v57  ;;  %v2839_v21 = vadd.f32 0.18741608, %v705_v59  ;;  %v335_v6 = vpop.f32.mrf.mxu2 }
 0x10e   :  { %3821 = vst [vmem:[#allocation31_spill] sm:$0xff] %v2823_v61  ;;  %v2841_v19 = vadd.f32 0.18741608, %v1345_v52  ;;  %v2844_v31 = vmul.f32 %v744_v60, %v2726_v41  ;;  %v1697_v39 = vadd.f32 1.0, %v2082_v40  ;;  %v2849_v45 = vadd.f32 %v2421_v24, %v295_v51 }
 0x10f   :  { %3822 = vst [vmem:[#allocation32_spill] sm:$0xff] %v2835_v42  ;;  %v2846_v58 = vadd.f32 1.0, %v1118_v48  ;;  %v517_v55 = vadd.f32 0.4994258, %v516_v34  ;;  %v554_v9 = vmul.f32 %v553_v44, %v2506_v30  ;;  %v1150_v4 = vmul.f32 3.8918573e-05, %v2502_v22 }
 0x110   :  { %v2207_v50 = vpop.eup %2206  ;;  %v489_v17 = vand.u32 2147483647, %v2798_v0  ;;  %v1379_v25 = vmul.f32 2.1237322e-06, %v2831_v35  ;;  %v491_v57 = vand.u32 2147483648, %v2798_v0  ;;  %v2861_v38 = vadd.f32 %v2421_v24, %v335_v6 }
 0x111   :  { %v2209_v10 = vpop.eup %2208  ;;  %v481_v8 = vmul.f32 %v2207_v50, %v2798_v0  ;;  %2210 = vrcp.f32 %v2846_v58  ;;  %v1089_v52 = vand.u32 2147483647, %v2804_v29  ;;  %vm485_vm4 = vweird.f32 %v2798_v0 }
 0x112   :  { %v1081_v46 = vmul.f32 %v2209_v10, %v2804_v29  ;;  %v1091_v40 = vand.u32 2147483648, %v2804_v29  ;;  %v2866_v7 = vmul.f32 0.70710677, %v2849_v45  ;;  %vm486_vm5 = vweird.f32 %v2207_v50 }
 0x113   :  { %v482_v59 = vsub.f32 1.0, %v481_v8  ;;  %vm1085_vm6 = vweird.f32 %v2804_v29  ;;  %v518_v34 = vmul.f32 %v517_v55, %v2494_v14  ;;  %vm2870_vm7 = vcmp.eq.f32.partialorder %v489_v17, 8.507059e+37  ;;  %v298_v8 = vpop.f32.mrf.mxu0  ;;  %vm487_vm10 = vmor %vm485_vm4, %vm486_vm5 }
 0x114   :  { %v1082_v60 = vsub.f32 1.0, %v1081_v46  ;;  %v1380_v48 = vadd.f32 0.00028619796, %v1379_v25  ;;  %vm1086_vm8 = vweird.f32 %v2209_v10  ;;  %v492_v61 = vor.u32 1.1754944e-38, %v491_v57 }
 0x115   :  { %v483_v51 = vmul.f32 %v2207_v50, %v482_v59  ;;  %vm2874_vm9 = vcmp.eq.f32.partialorder %v1089_v52, 8.507059e+37  ;;  %v2879_v59 = vmul.f32 0.70710677, %v2861_v38  ;;  %v1092_v55 = vor.u32 1.1754944e-38, %v1091_v40  ;;  %vm1087_vm11 = vmor %vm1085_vm6, %vm1086_vm8 }
 0x116   :  { %v1083_v6 = vmul.f32 %v2209_v10, %v1082_v60  ;;  %v777_v17 = vmul.f32 %v2866_v7, %v2866_v7  ;;  %v555_v25 = vadd.f32 0.112945676, %v554_v9  ;;  %v2889_v52 = vadd.f32 %v2421_v24, %v298_v8 }
 0x117   :  { %v484_v46 = vadd.f32 %v2207_v50, %v483_v51  ;;  %v2211_v42 = vpop.eup %2210  ;;  %v2891_v51 = vadd.f32 1.0, %v518_v34  ;;  %v1381_v40 = vmul.f32 %v1380_v48, %v2831_v35  ;;  %v1129_v12 = vand.u32 2147483647, %v2846_v58 }
 0x118   :  { %v1084_v14 = vadd.f32 %v2209_v10, %v1083_v6  ;;  %v1121_v57 = vmul.f32 %v2211_v42, %v2846_v58  ;;  %v1417_v8 = vmul.f32 %v2879_v59, %v2879_v59  ;;  %vm1126_vm12 = vweird.f32 %v2211_v42 }
 0x119   :  { %v488_v60 = vsel %vm487_vm10, %v2207_v50, %v484_v46  ;;  %v1131_v44 = vand.u32 2147483648, %v2846_v58  ;;  %v2907_v46 = vmul.f32 0.70710677, %v2889_v52  ;;  %2212 = vrcp.f32 %v2891_v51 }
 0x11a   :  { %v493_v0 = vsel %vm2870_vm7, %v492_v61, %v488_v60  ;;  %v1088_v6 = vsel %vm1087_vm11, %v2209_v10, %v1084_v14  ;;  %v1122_v9 = vsub.f32 1.0, %v1121_v57  ;;  %v2904_v61 = vmin.f32 %v777_v17, 16.0 }
 0x11b   :  { %v494_v50 = vmul.f32 %v493_v0, %v2658_v63  ;;  %v1093_v29 = vsel %vm2874_vm9, %v1092_v55, %v1088_v6  ;;  %v1729_v63 = vmul.f32 %v1697_v39, %v2527_v54  ;;  %v1382_v16 = vadd.f32 0.0036580483, %v1381_v40 }
 0x11c   :  { %v1094_v34 = vmul.f32 %v1093_v29, %v2644_v53  ;;  %v1123_v10 = vmul.f32 %v2211_v42, %v1122_v9  ;;  %v556_v14 = vmul.f32 %v555_v25, %v2506_v30  ;;  %v1151_v55 = vadd.f32 0.001143296, %v1150_v4 }
 0x11d   :  { %v2083_v48 = vclamps-f32 %v494_v50, 1.0  ;;  %vm1125_vm13 = vweird.f32 %v2846_v58  ;;  %v2913_v57 = vmin.f32 %v1417_v8, 16.0  ;;  %v746_v17 = vadd.f32 0.18741608, %v2844_v31  ;;  %v3828_v50 = vld [vmem:[#allocation13_spill] sm:$0xff] }
 0x11e   :  { %v1124_v53 = vadd.f32 %v2211_v42, %v1123_v10  ;;  %vm1127_vm14 = vmor %vm1125_vm13, %vm1126_vm12  ;;  %vm1130_vm15 = vcmp.eq.f32.partialorder %v1129_v12, 8.507059e+37  ;;  %v1132_v0 = vor.u32 1.1754944e-38, %v1131_v44  ;;  %v779_v6 = vmul.f32 2.1237322e-06, %v2904_v61 }
 0x11f   :  { %v1698_v60 = vadd.f32 1.0, %v2083_v48  ;;  %3827 = vst [vmem:[#allocation33_spill] sm:$0xff] %v2913_v57  ;;  %v2098_v39 = vclamps-f32 %v1094_v34, 1.0  ;;  %v817_v4 = vmul.f32 %v2907_v46, %v2907_v46  ;;  %v1383_v25 = vmul.f32 %v1382_v16, %v2831_v35  ;;  %v2923_v31 = vpop.eup %2212 }
 0x120   :  { %v1128_v40 = vsel %vm1127_vm14, %v2211_v42, %v1124_v53  ;;  %v557_v29 = vadd.f32 0.4994258, %v556_v14  ;;  %v1152_v9 = vmul.f32 %v1151_v55, %v2502_v22  ;;  %v707_v12 = vmul.f32 %v2839_v21, %v2679_v56  ;;  %v3829_v42 = vld [vmem:[#allocation18_spill] sm:$0xff] }
 0x121   :  { %v1730_v54 = vmul.f32 %v1698_v60, %v3828_v50  ;;  %v1133_v58 = vsel %vm1130_vm15, %v1132_v0, %v1128_v40  ;;  %v1419_v34 = vmul.f32 2.1237322e-06, %v2913_v57  ;;  %v2931_v48 = vmul.f32 %v2829_v5, %v3829_v42 }
 0x122   :  { %v1134_v44 = vmul.f32 %v1133_v58, %v2693_v13  ;;  %v1347_v10 = vmul.f32 %v2841_v19, %v2698_v36  ;;  %v747_v16 = vmul.f32 %v746_v17, %v2726_v41  ;;  %v521_v14 = vmul.f32 %v2923_v31, %v2891_v51  ;;  %v338_v13 = vpop.f32.mrf.mxu2 }
 0x123   :  { %v1761_v8 = vpack.c.bf16 %v1730_v54, %v1729_v63  ;;  %v1713_v21 = vadd.f32 1.0, %v2098_v39  ;;  %v780_v63 = vadd.f32 0.00028619796, %v779_v6  ;;  %v2938_v60 = vmin.f32 %v817_v4, 16.0  ;;  %v3830_v54 = vld [vmem:[#allocation19_spill] sm:$0xff]  ;;  %v3832_v4 = vld [vmem:[#allocation12_spill] sm:$0xff] }
 0x124   :  { %v2099_v55 = vclamps-f32 %v1134_v44, 1.0  ;;  %v1384_v53 = vadd.f32 0.05243302, %v1383_v25  ;;  %v522_v0 = vsub.f32 1.0, %v521_v14  ;;  %v558_v5 = vmul.f32 %v557_v29, %v2506_v30  ;;  %v3833_v44 = vld [vmem:[#allocation14_spill] sm:$0xff] }
 0x125   :  { %1853 = vmatmul.bf16.vlgmr.msra.gmra.mxu1 %v1761_v8  ;;  %v1153_v50 = vadd.f32 0.014752088, %v1152_v9  ;;  %v2943_v19 = vmul.f32 %v2837_v26, %v3830_v54  ;;  %v708_v17 = vadd.f32 1.1283791, %v707_v12  ;;  %v1420_v58 = vadd.f32 0.00028619796, %v1419_v34 }
 0x126   :  { %v1714_v40 = vadd.f32 1.0, %v2099_v55  ;;  %v1348_v42 = vadd.f32 1.1283791, %v1347_v10  ;;  %v523_v8 = vmul.f32 %v2923_v31, %v522_v0  ;;  %v2946_v39 = vadd.f32 1.0, %v558_v5  ;;  %v3834_v55 = vld [vmem:[#allocation21_spill] sm:$0xff] }
 0x127   :  { %3831 = vst [vmem:[#allocation13_spill] sm:$0xff] %v2943_v19  ;;  %v2949_v6 = vadd.f32 %v2421_v24, %v338_v13  ;;  %v1745_v25 = vmul.f32 %v1713_v21, %v3832_v4  ;;  %v781_v29 = vmul.f32 %v780_v63, %v2904_v61  ;;  %v819_v26 = vmul.f32 2.1237322e-06, %v2938_v60  ;;  %v3836_v63 = vld [vmem:[#allocation23_spill] sm:$0xff] }
 0x128   :  { %v1746_v30 = vmul.f32 %v1714_v40, %v3833_v44  ;;  %v748_v9 = vadd.f32 1.1283791, %v747_v16  ;;  %v1385_v12 = vmul.f32 %v1384_v53, %v2831_v35  ;;  %2214 = vrcp.f32 %v2946_v39 }
 0x129   :  { %v1154_v34 = vmul.f32 %v1153_v50, %v2502_v22  ;;  %v1421_v14 = vmul.f32 %v1420_v58, %v2913_v57  ;;  %v524_v24 = vadd.f32 %v2923_v31, %v523_v8  ;;  %vm526_vm0 = vweird.f32 %v2923_v31 }
 0x12a   :  { %v1769_v10 = vpack.c.bf16 %v1746_v30, %v1745_v25  ;;  %v2962_v21 = vmul.f32 %v708_v17, %v3834_v55  ;;  %v2965_v13 = vmul.f32 %v1348_v42, %v3836_v63  ;;  %v531_v16 = vand.u32 2147483648, %v2891_v51 }
 0x12b   :  { %v2969_v53 = vmul.f32 0.70710677, %v2949_v6  ;;  %v782_v0 = vadd.f32 0.0036580483, %v781_v29  ;;  %v820_v5 = vadd.f32 0.00028619796, %v819_v26  ;;  %vm525_vm1 = vweird.f32 %v2891_v51 }
 0x12c   :  { %3835 = vst [vmem:[#allocation18_spill] sm:$0xff] %v2962_v21  ;;  %1893 = vmatmul.bf16.vlgmr.msra.gmra.mxu3 %v1769_v10  ;;  %v529_v50 = vand.u32 2147483647, %v2891_v51  ;;  %v2974_v54 = vmul.f32 %v748_v9, %v2687_v18  ;;  %v2976_v17 = vadd.f32 0.18741608, %v1385_v12  ;;  %vm2978_vm2 = vmor %vm525_vm1, %vm526_vm0  ;;  %v532_v44 = vor.u32 1.1754944e-38, %v531_v16 }
 0x12d   :  { %3837 = vst [vmem:[#allocation19_spill] sm:$0xff] %v2965_v13  ;;  %v1155_v58 = vadd.f32 0.112945676, %v1154_v34  ;;  %v1190_v42 = vmul.f32 3.8918573e-05, %v2523_v49  ;;  %v528_v4 = vsel %vm2978_vm2, %v2923_v31, %v524_v24  ;;  %v1457_v30 = vmul.f32 %v2969_v53, %v2969_v53 }
 0x12e   :  { %3838 = vst [vmem:[#allocation12_spill] sm:$0xff] %v2974_v54  ;;  %v1422_v8 = vadd.f32 0.0036580483, %v1421_v14  ;;  %v590_v25 = vmul.f32 3.8918573e-05, %v2537_v3  ;;  %v2215_v18 = vpop.eup %2214  ;;  %v783_v9 = vmul.f32 %v782_v0, %v2904_v61  ;;  %v821_v12 = vmul.f32 %v820_v5, %v2938_v60 }
 0x12f   :  { %v630_v51 = vmul.f32 3.8918573e-05, %v2584_v33  ;;  %v1156_v29 = vmul.f32 %v1155_v58, %v2502_v22  ;;  %v1191_v26 = vadd.f32 0.001143296, %v1190_v42  ;;  %vm530_vm3 = vcmp.eq.f32.partialorder %v529_v50, 8.507059e+37 }
 0x130   :  { %v561_v34 = vmul.f32 %v2215_v18, %v2946_v39  ;;  %v533_v31 = vsel %vm530_vm3, %v532_v44, %v528_v4  ;;  %v591_v24 = vadd.f32 0.001143296, %v590_v25  ;;  %v569_v63 = vand.u32 2147483647, %v2946_v39 }
 0x131   :  { %v1157_v10 = vadd.f32 0.4994258, %v1156_v29  ;;  %v1192_v14 = vmul.f32 %v1191_v26, %v2523_v49  ;;  %v571_v16 = vand.u32 2147483648, %v2946_v39  ;;  %v631_v40 = vadd.f32 0.001143296, %v630_v51 }
 0x132   :  { %v562_v55 = vsub.f32 1.0, %v561_v34  ;;  %v2997_v58 = vmin.f32 %v1457_v30, 16.0  ;;  %v592_v5 = vmul.f32 %v591_v24, %v2537_v3  ;;  %v534_v50 = vmul.f32 %v533_v31, %v2701_v32 }
 0x133   :  { %v1158_v0 = vmul.f32 %v1157_v10, %v2502_v22  ;;  %v1193_v42 = vadd.f32 0.014752088, %v1192_v14  ;;  %vm566_vm4 = vweird.f32 %v2215_v18  ;;  %v632_v44 = vmul.f32 %v631_v40, %v2584_v33 }
 0x134   :  { %v563_v4 = vmul.f32 %v2215_v18, %v562_v55  ;;  %v784_v25 = vadd.f32 0.05243302, %v783_v9  ;;  %v593_v34 = vadd.f32 0.014752088, %v592_v5  ;;  %v822_v51 = vadd.f32 0.0036580483, %v821_v12 }
 0x135   :  { %v3003_v29 = vadd.f32 1.0, %v1158_v0  ;;  %v1194_v26 = vmul.f32 %v1193_v42, %v2523_v49  ;;  %vm565_vm5 = vweird.f32 %v2946_v39  ;;  %v633_v22 = vadd.f32 0.014752088, %v632_v44 }
 0x136   :  { %v564_v30 = vadd.f32 %v2215_v18, %v563_v4  ;;  %vm567_vm6 = vmor %vm565_vm5, %vm566_vm4  ;;  %vm570_vm7 = vcmp.eq.f32.partialorder %v569_v63, 8.507059e+37  ;;  %v572_v10 = vor.u32 1.1754944e-38, %v571_v16  ;;  %v1459_v32 = vmul.f32 2.1237322e-06, %v2997_v58 }
 0x137   :  { %2216 = vrcp.f32 %v3003_v29  ;;  %v2084_v31 = vclamps-f32 %v534_v50, 1.0  ;;  %v1195_v9 = vadd.f32 0.112945676, %v1194_v26  ;;  %v594_v24 = vmul.f32 %v593_v34, %v2537_v3 }
 0x138   :  { %v568_v14 = vsel %vm567_vm6, %v2215_v18, %v564_v30  ;;  %v785_v55 = vmul.f32 %v784_v25, %v2904_v61  ;;  %v1423_v12 = vmul.f32 %v1422_v8, %v2913_v57  ;;  %v634_v39 = vmul.f32 %v633_v22, %v2584_v33 }
 0x139   :  { %v573_v40 = vsel %vm570_vm7, %v572_v10, %v568_v14  ;;  %v823_v0 = vmul.f32 %v822_v51, %v2938_v60  ;;  %v1196_v16 = vmul.f32 %v1195_v9, %v2523_v49  ;;  %v595_v42 = vadd.f32 0.112945676, %v594_v24  ;;  %v300_v14 = vpop.f32.mrf.mxu0 }
 0x13a   :  { %v574_v63 = vmul.f32 %v573_v40, %v2730_v62  ;;  %v3017_v5 = vmul.f32 0.5, %v2792_v11  ;;  %v3020_v18 = vmul.f32 0.5, %v2849_v45  ;;  %v1460_v50 = vadd.f32 0.00028619796, %v1459_v32  ;;  %v340_v32 = vpop.f32.mrf.mxu2  ;;  %v3843_v40 = vld [vmem:[#allocation15_spill] sm:$0xff] }
 0x13b   :  { %v635_v4 = vadd.f32 0.112945676, %v634_v39  ;;  %v1699_v8 = vadd.f32 1.0, %v2084_v31  ;;  %v1197_v25 = vadd.f32 0.4994258, %v1196_v16  ;;  %v596_v26 = vmul.f32 %v595_v42, %v2537_v3 }
 0x13c   :  { %3841 = vst [vmem:[#allocation14_spill] sm:$0xff] %v3017_v5  ;;  %v2085_v44 = vclamps-f32 %v574_v63, 1.0  ;;  %v1387_v62 = vmul.f32 %v2976_v17, %v2831_v35  ;;  %v786_v51 = vadd.f32 0.18741608, %v785_v55  ;;  %v1424_v30 = vadd.f32 0.05243302, %v1423_v12 }
 0x13d   :  { %3842 = vst [vmem:[#allocation21_spill] sm:$0xff] %v3020_v18  ;;  %v2217_v34 = vpop.eup %2216  ;;  %v636_v22 = vmul.f32 %v635_v4, %v2584_v33  ;;  %v824_v11 = vadd.f32 0.05243302, %v823_v0  ;;  %v1230_v9 = vmul.f32 3.8918573e-05, %v2561_v27  ;;  %v1461_v31 = vmul.f32 %v1460_v50, %v2997_v58  ;;  %v3844_v0 = vld [vmem:[#allocation17_spill] sm:$0xff] }
 0x13e   :  { %v1700_v10 = vadd.f32 1.0, %v2085_v44  ;;  %v1161_v45 = vmul.f32 %v2217_v34, %v3003_v29  ;;  %v1198_v24 = vmul.f32 %v1197_v25, %v2523_v49  ;;  %v3033_v17 = vld [vmem:[%s3781_s2] ss:$0 sm:$0xff]  ;;  %v1731_v39 = vmul.f32 %v1699_v8, %v3843_v40 }
 0x13f   :  { %v3036_v55 = vadd.f32 %v3033_v17, %v300_v14  ;;  %v3039_v12 = vadd.f32 %v3033_v17, %v340_v32  ;;  %v597_v42 = vadd.f32 0.4994258, %v596_v26  ;;  %v3044_v50 = vmul.f32 0.5, %v2861_v38 }
 0x140   :  { %v1732_v63 = vmul.f32 %v1700_v10, %v3844_v0  ;;  %v1162_v16 = vsub.f32 1.0, %v1161_v45  ;;  %v3046_v49 = vadd.f32 1.0, %v1198_v24  ;;  %v637_v44 = vadd.f32 0.4994258, %v636_v22 }
 0x141   :  { %3845 = vst [vmem:[#allocation23_spill] sm:$0xff] %v3044_v50  ;;  %v3049_v4 = vmul.f32 0.70710677, %v3036_v55  ;;  %vm1166_vm8 = vweird.f32 %v2217_v34  ;;  %v3052_v32 = vmul.f32 0.70710677, %v3039_v12  ;;  %v1171_v10 = vand.u32 2147483648, %v3003_v29 }
 0x142   :  { %v1762_v25 = vpack.c.bf16 %v1732_v63, %v1731_v39  ;;  %v1163_v14 = vmul.f32 %v2217_v34, %v1162_v16  ;;  %v1388_v8 = vadd.f32 1.1283791, %v1387_v62  ;;  %v1462_v40 = vadd.f32 0.0036580483, %v1461_v31  ;;  %v303_v63 = vpop.f32.mrf.mxu0 }
 0x143   :  { %2218 = vrcp.f32 %v3046_v49  ;;  %v1425_v38 = vmul.f32 %v1424_v30, %v2913_v57  ;;  %vm1165_vm9 = vweird.f32 %v3003_v29  ;;  %v1169_v22 = vand.u32 2147483647, %v3003_v29 }
 0x144   :  { %1858 = vmatmul.bf16.gmra.mxu1 %v1762_v25  ;;  %v1164_v26 = vadd.f32 %v2217_v34, %v1163_v14  ;;  %vm3059_vm10 = vmor %vm1165_vm9, %vm1166_vm8  ;;  %v857_v62 = vmul.f32 %v3049_v4, %v3049_v4  ;;  %v1497_v31 = vmul.f32 %v3052_v32, %v3052_v32  ;;  %v598_v24 = vmul.f32 %v597_v42, %v2537_v3 }
 0x145   :  { %v638_v30 = vmul.f32 %v637_v44, %v2584_v33  ;;  %v787_v39 = vmul.f32 %v786_v51, %v2904_v61  ;;  %v825_v0 = vmul.f32 %v824_v11, %v2938_v60  ;;  %v1231_v16 = vadd.f32 0.001143296, %v1230_v9 }
 0x146   :  { %v1168_v29 = vsel %vm3059_vm10, %v2217_v34, %v1164_v26  ;;  %v1463_v25 = vmul.f32 %v1462_v40, %v2997_v58  ;;  %v1172_v14 = vor.u32 1.1754944e-38, %v1171_v10  ;;  %v3075_v50 = vadd.f32 %v3033_v17, %v303_v63 }
 0x147   :  { %v3077_v5 = vadd.f32 1.0, %v598_v24  ;;  %v1426_v3 = vadd.f32 0.18741608, %v1425_v38  ;;  %v3080_v33 = vmul.f32 0.5, %v2889_v52  ;;  %vm1170_vm11 = vcmp.eq.f32.partialorder %v1169_v22, 8.507059e+37 }
 0x148   :  { %v3082_v51 = vadd.f32 1.0, %v638_v30  ;;  %v1173_v42 = vsel %vm1170_vm11, %v1172_v14, %v1168_v29  ;;  %v3084_v34 = vmin.f32 %v857_v62, 16.0  ;;  %v3086_v9 = vmin.f32 %v1497_v31, 16.0 }
 0x149   :  { %3848 = vst [vmem:[#allocation15_spill] sm:$0xff] %v3080_v33  ;;  %v2219_v11 = vpop.eup %2218  ;;  %2220 = vrcp.f32 %v3077_v5  ;;  %v3089_v44 = vadd.f32 1.1283791, %v787_v39  ;;  %v3093_v10 = vmul.f32 0.70710677, %v3075_v50  ;;  %v1232_v52 = vmul.f32 %v1231_v16, %v2561_v27 }
 0x14a   :  { %v1201_v40 = vmul.f32 %v2219_v11, %v3046_v49  ;;  %v3097_v38 = vmul.f32 %v1388_v8, %v2801_v47  ;;  %v3099_v26 = vadd.f32 0.18741608, %v825_v0  ;;  %v1464_v22 = vadd.f32 0.05243302, %v1463_v25 }
 0x14b   :  { %3849 = vst [vmem:[#allocation17_spill] sm:$0xff] %v3093_v10  ;;  %v1270_v45 = vmul.f32 3.8918573e-05, %v2611_v43  ;;  %v1174_v62 = vmul.f32 %v1173_v42, %v2717_v37  ;;  %v1209_v24 = vand.u32 2147483647, %v3046_v49  ;;  %2222 = vrcp.f32 %v3082_v51 }
 0x14c   :  { %3850 = vst [vmem:[#allocation34_spill] sm:$0xff] %v3097_v38  ;;  %v1202_v31 = vsub.f32 1.0, %v1201_v40  ;;  %v3106_v30 = vmul.f32 %v1426_v3, %v2913_v57  ;;  %v1211_v39 = vand.u32 2147483648, %v3046_v49  ;;  %v859_v47 = vmul.f32 2.1237322e-06, %v3084_v34  ;;  %v3852_v57 = vld [vmem:[#allocation20_spill] sm:$0xff] }
 0x14d   :  { %v1499_v8 = vmul.f32 2.1237322e-06, %v3086_v9  ;;  %vm1206_vm12 = vweird.f32 %v2219_v11  ;;  %v897_v29 = vmul.f32 %v3093_v10, %v3093_v10  ;;  %v1233_v37 = vadd.f32 0.014752088, %v1232_v52 }
 0x14e   :  { %v1203_v0 = vmul.f32 %v2219_v11, %v1202_v31  ;;  %v3114_v16 = vmul.f32 %v1464_v22, %v2997_v58  ;;  %vm1205_vm13 = vweird.f32 %v3046_v49  ;;  %v1271_v25 = vadd.f32 0.001143296, %v1270_v45 }
 0x14f   :  { %v2221_v63 = vpop.eup %2220  ;;  %v3118_v14 = vmul.f32 3.8918573e-05, %v2623_v1  ;;  %v2100_v3 = vclamps-f32 %v1174_v62, 1.0  ;;  %vm1210_vm14 = vcmp.eq.f32.partialorder %v1209_v24, 8.507059e+37  ;;  %vm1207_vm15 = vmor %vm1205_vm13, %vm1206_vm12  ;;  %v1212_v31 = vor.u32 1.1754944e-38, %v1211_v39 }
 0x150   :  { %v1204_v42 = vadd.f32 %v2219_v11, %v1203_v0  ;;  %v601_v40 = vmul.f32 %v2221_v63, %v3077_v5  ;;  %v860_v33 = vadd.f32 0.00028619796, %v859_v47  ;;  %v1500_v38 = vadd.f32 0.00028619796, %v1499_v8 }
 0x151   :  { %v611_v52 = vand.u32 2147483648, %v3077_v5  ;;  %v2223_v18 = vpop.eup %2222  ;;  %v3122_v54 = vmin.f32 %v897_v29, 16.0  ;;  %v1234_v45 = vmul.f32 %v1233_v37, %v2561_v27  ;;  %vm605_vm0 = vweird.f32 %v3077_v5 }
 0x152   :  { %v1208_v22 = vsel %vm1207_vm15, %v2219_v11, %v1204_v42  ;;  %v602_v49 = vsub.f32 1.0, %v601_v40  ;;  %v609_v62 = vand.u32 2147483647, %v3077_v5  ;;  %v641_v24 = vmul.f32 %v2223_v18, %v3082_v51 }
 0x153   :  { %v1213_v13 = vsel %vm1210_vm14, %v1212_v31, %v1208_v22  ;;  %v1715_v47 = vadd.f32 1.0, %v2100_v3  ;;  %vm606_vm1 = vweird.f32 %v2221_v63  ;;  %v861_v0 = vmul.f32 %v860_v33, %v3084_v34  ;;  %v3851_v33 = vld [vmem:[#allocation16_spill] sm:$0xff] }
 0x154   :  { %v1214_v39 = vmul.f32 %v1213_v13, %v2735_v15  ;;  %v603_v8 = vmul.f32 %v2221_v63, %v602_v49  ;;  %v1501_v11 = vmul.f32 %v1500_v38, %v3086_v9  ;;  %v612_v29 = vor.u32 1.1754944e-38, %v611_v52  ;;  %vm607_vm2 = vmor %vm605_vm0, %vm606_vm1 }
 0x155   :  { %v642_v42 = vsub.f32 1.0, %v641_v24  ;;  %v899_v37 = vmul.f32 2.1237322e-06, %v3122_v54  ;;  %v651_v22 = vand.u32 2147483648, %v3082_v51  ;;  %vm646_vm3 = vweird.f32 %v2223_v18 }
 0x156   :  { %v2101_v40 = vclamps-f32 %v1214_v39, 1.0  ;;  %v604_v31 = vadd.f32 %v2221_v63, %v603_v8  ;;  %v649_v15 = vand.u32 2147483647, %v3082_v51  ;;  %v1235_v13 = vadd.f32 0.112945676, %v1234_v45  ;;  %v343_v8 = vpop.f32.mrf.mxu2 }
 0x157   :  { %v643_v19 = vmul.f32 %v2223_v18, %v642_v42  ;;  %v1747_v49 = vmul.f32 %v1715_v47, %v3851_v33  ;;  %vm610_vm4 = vcmp.eq.f32.partialorder %v609_v62, 8.507059e+37  ;;  %v862_v52 = vadd.f32 0.0036580483, %v861_v0 }
 0x158   :  { %v1716_v3 = vadd.f32 1.0, %v2101_v40  ;;  %v608_v38 = vsel %vm607_vm2, %v2221_v63, %v604_v31  ;;  %vm645_vm5 = vweird.f32 %v3082_v51  ;;  %v652_v42 = vor.u32 1.1754944e-38, %v651_v22 }
 0x159   :  { %v613_v24 = vsel %vm610_vm4, %v612_v29, %v608_v38  ;;  %v644_v39 = vadd.f32 %v2223_v18, %v643_v19  ;;  %vm647_vm6 = vmor %vm645_vm5, %vm646_vm3  ;;  %v1272_v21 = vmul.f32 %v1271_v25, %v2611_v43  ;;  %v900_v45 = vadd.f32 0.00028619796, %v899_v37 }
 0x15a   :  { %v1748_v10 = vmul.f32 %v1716_v3, %v3852_v57  ;;  %v614_v5 = vmul.f32 %v613_v24, %v2745_v28  ;;  %vm650_vm7 = vcmp.eq.f32.partialorder %v649_v15, 8.507059e+37  ;;  %v1236_v63 = vmul.f32 %v1235_v13, %v2561_v27 }
 0x15b   :  { %v648_v40 = vsel %vm647_vm6, %v2223_v18, %v644_v39  ;;  %v3143_v19 = vadd.f32 %v3033_v17, %v343_v8  ;;  %v1428_v51 = vadd.f32 1.1283791, %v3106_v30  ;;  %v863_v57 = vmul.f32 %v862_v52, %v3084_v34  ;;  %v3853_v39 = vld [vmem:[#allocation22_spill] sm:$0xff] }
 0x15c   :  { %v1770_v62 = vpack.c.bf16 %v1748_v10, %v1747_v49  ;;  %v2086_v47 = vclamps-f32 %v614_v5, 1.0  ;;  %v653_v0 = vsel %vm650_vm7, %v652_v42, %v648_v40  ;;  %v1502_v28 = vadd.f32 0.0036580483, %v1501_v11 }
 0x15d   :  { %v654_v29 = vmul.f32 %v653_v0, %v2827_v2  ;;  %v827_v25 = vmul.f32 %v3099_v26, %v2938_v60  ;;  %v1466_v18 = vadd.f32 0.18741608, %v3114_v16  ;;  %v1237_v37 = vadd.f32 0.4994258, %v1236_v63 }
 0x15e   :  { %1898 = vmatmul.bf16.gmra.mxu3 %v1770_v62  ;;  %v1273_v10 = vadd.f32 0.014752088, %v1272_v21  ;;  %v901_v31 = vmul.f32 %v900_v45, %v3122_v54  ;;  %v1701_v15 = vadd.f32 1.0, %v2086_v47  ;;  %v671_v13 = vadd.f32 0.001143296, %v3118_v14 }
 0x15f   :  { %v2087_v22 = vclamps-f32 %v654_v29, 1.0  ;;  %v3154_v30 = vmul.f32 0.70710677, %v3143_v19  ;;  %v1238_v11 = vmul.f32 %v1237_v37, %v2561_v27  ;;  %v710_v26 = vmul.f32 3.8918573e-05, %v2679_v56 }
 0x160   :  { %v1274_v2 = vmul.f32 %v1273_v10, %v2611_v43  ;;  %v864_v3 = vadd.f32 0.05243302, %v863_v57  ;;  %v1503_v16 = vmul.f32 %v1502_v28, %v3086_v9  ;;  %v672_v21 = vmul.f32 %v671_v13, %v2623_v1 }
 0x161   :  { %v1702_v33 = vadd.f32 1.0, %v2087_v22  ;;  %v1467_v49 = vmul.f32 %v1466_v18, %v2997_v58  ;;  %v3162_v38 = vadd.f32 1.0, %v1238_v11  ;;  %v711_v52 = vadd.f32 0.001143296, %v710_v26  ;;  %v345_v22 = vpop.f32.mrf.mxu2 }
 0x162   :  { %v1275_v14 = vadd.f32 0.112945676, %v1274_v2  ;;  %v902_v24 = vadd.f32 0.0036580483, %v901_v31  ;;  %v1733_v8 = vmul.f32 %v1701_v15, %v3853_v39  ;;  %v673_v5 = vadd.f32 0.014752088, %v672_v21 }
 0x163   :  { %v1734_v27 = vmul.f32 %v1702_v33, %v2704_v23  ;;  %v828_v42 = vadd.f32 1.1283791, %v827_v25  ;;  %v3167_v45 = vmul.f32 0.5, %v2949_v6  ;;  %v1537_v40 = vmul.f32 %v3154_v30, %v3154_v30 }
 0x164   :  { %2224 = vrcp.f32 %v3162_v38  ;;  %v1504_v63 = vadd.f32 0.05243302, %v1503_v16  ;;  %v1276_v47 = vmul.f32 %v1275_v14, %v2611_v43  ;;  %v674_v0 = vmul.f32 %v673_v5, %v2623_v1 }
 0x165   :  { %v1763_v62 = vpack.c.bf16 %v1734_v27, %v1733_v8  ;;  %v3176_v57 = vmul.f32 %v3089_v44, %v2866_v7  ;;  %v1468_v23 = vadd.f32 1.1283791, %v1467_v49  ;;  %v865_v28 = vmul.f32 %v864_v3, %v3084_v34  ;;  %v305_v44 = vpop.f32.mrf.mxu0 }
 0x166   :  { %v712_v6 = vmul.f32 %v711_v52, %v2679_v56  ;;  %v3181_v29 = vmul.f32 %v1428_v51, %v2879_v59  ;;  %v903_v25 = vmul.f32 %v902_v24, %v3122_v54  ;;  %v1277_v18 = vadd.f32 0.4994258, %v1276_v47 }
 0x167   :  { %1863 = vmatmul.bf16.gmra.mxu1 %v1763_v62  ;;  %v675_v37 = vadd.f32 0.112945676, %v674_v0  ;;  %v3185_v10 = vmul.f32 %v828_v42, %v2907_v46  ;;  %v3188_v31 = vmul.f32 0.5, %v3036_v55  ;;  %v3190_v7 = vmin.f32 %v1537_v40, 16.0 }
 0x168   :  { %v713_v15 = vadd.f32 0.014752088, %v712_v6  ;;  %v1505_v13 = vmul.f32 %v1504_v63, %v3086_v9  ;;  %v1278_v59 = vmul.f32 %v1277_v18, %v2611_v43  ;;  %v3195_v51 = vadd.f32 %v3033_v17, %v305_v44 }
 0x169   :  { %v3198_v11 = vadd.f32 %v3033_v17, %v345_v22  ;;  %v3201_v2 = vmul.f32 %v1468_v23, %v2969_v53  ;;  %v866_v55 = vadd.f32 0.18741608, %v865_v28  ;;  %v3204_v26 = vmul.f32 0.5, %v3039_v12 }
 0x16a   :  { %v2225_v46 = vpop.eup %2224  ;;  %v3207_v3 = vmul.f32 0.5, %v3075_v50  ;;  %v904_v16 = vadd.f32 0.05243302, %v903_v25  ;;  %v3210_v33 = vadd.f32 1.0, %v1278_v59  ;;  %v676_v21 = vmul.f32 %v675_v37, %v2623_v1 }
 0x16b   :  { %v1241_v43 = vmul.f32 %v2225_v46, %v3162_v38  ;;  %v1539_v49 = vmul.f32 2.1237322e-06, %v3190_v7  ;;  %v3215_v14 = vmul.f32 0.70710677, %v3195_v51  ;;  %v3218_v53 = vmul.f32 0.70710677, %v3198_v11 }
 0x16c   :  { %v714_v12 = vmul.f32 %v713_v15, %v2679_v56  ;;  %v1506_v52 = vadd.f32 0.18741608, %v1505_v13  ;;  %v1249_v24 = vand.u32 2147483647, %v3162_v38  ;;  %2226 = vrcp.f32 %v3210_v33 }
 0x16d   :  { %v1242_v50 = vsub.f32 1.0, %v1241_v43  ;;  %v1251_v39 = vand.u32 2147483648, %v3162_v38  ;;  %v937_v8 = vmul.f32 %v3215_v14, %v3215_v14  ;;  %v1577_v27 = vmul.f32 %v3218_v53, %v3218_v53  ;;  %v308_v23 = vpop.f32.mrf.mxu0 }
 0x16e   :  { %v1310_v5 = vmul.f32 3.8918573e-05, %v2652_v20  ;;  %v867_v42 = vmul.f32 %v866_v55, %v3084_v34  ;;  %vm1246_vm8 = vweird.f32 %v2225_v46  ;;  %v677_v63 = vadd.f32 0.4994258, %v676_v21 }
 0x16f   :  { %v1243_v40 = vmul.f32 %v2225_v46, %v1242_v50  ;;  %v905_v62 = vmul.f32 %v904_v16, %v3122_v54  ;;  %v1540_v47 = vadd.f32 0.00028619796, %v1539_v49  ;;  %v3231_v0 = vmin.f32 %v937_v8, 16.0  ;;  %v3856_v8 = vld [vmem:[#allocation30_spill] sm:$0xff] }
 0x170   :  { %v715_v28 = vadd.f32 0.112945676, %v714_v12  ;;  %vm1245_vm9 = vweird.f32 %v3162_v38  ;;  %v3235_v25 = vadd.f32 %v3033_v17, %v308_v23  ;;  %v678_v18 = vmul.f32 %v677_v63, %v2623_v1 }
 0x171   :  { %v1244_v6 = vadd.f32 %v2225_v46, %v1243_v40  ;;  %vm1247_vm10 = vmor %vm1245_vm9, %vm1246_vm8  ;;  %vm1250_vm11 = vcmp.eq.f32.partialorder %v1249_v24, 8.507059e+37  ;;  %v1252_v37 = vor.u32 1.1754944e-38, %v1251_v39  ;;  %v3238_v44 = vmin.f32 %v1577_v27, 16.0 }
 0x172   :  { %3854 = vst [vmem:[#allocation16_spill] sm:$0xff] %v3235_v25  ;;  %v1311_v22 = vadd.f32 0.001143296, %v1310_v5  ;;  %v2227_v15 = vpop.eup %2226  ;;  %v939_v59 = vmul.f32 2.1237322e-06, %v3231_v0  ;;  %v3244_v16 = vadd.f32 1.0, %v678_v18  ;;  %v1507_v38 = vmul.f32 %v1506_v52, %v3086_v9 }
 0x173   :  { %v1248_v13 = vsel %vm1247_vm10, %v2225_v46, %v1244_v6  ;;  %v3242_v55 = vmul.f32 0.70710677, %v3235_v25  ;;  %v1281_v1 = vmul.f32 %v2227_v15, %v3210_v33  ;;  %v716_v21 = vmul.f32 %v715_v28, %v2679_v56 }
 0x174   :  { %v1253_v43 = vsel %vm1250_vm11, %v1252_v37, %v1248_v13  ;;  %v906_v49 = vadd.f32 0.18741608, %v905_v62  ;;  %v1541_v12 = vmul.f32 %v1540_v47, %v3190_v7  ;;  %2228 = vrcp.f32 %v3244_v16 }
 0x175   :  { %v977_v46 = vmul.f32 %v3242_v55, %v3242_v55  ;;  %v3254_v50 = vmul.f32 0.5, %v3143_v19  ;;  %v1282_v24 = vsub.f32 1.0, %v1281_v1  ;;  %v1579_v39 = vmul.f32 2.1237322e-06, %v3238_v44 }
 0x176   :  { %v1312_v52 = vmul.f32 %v1311_v22, %v2652_v20  ;;  %v1254_v27 = vmul.f32 %v1253_v43, %v3856_v8  ;;  %v1291_v5 = vand.u32 2147483648, %v3210_v33  ;;  %v940_v40 = vadd.f32 0.00028619796, %v939_v59  ;;  %v348_v43 = vpop.f32.mrf.mxu2 }
 0x177   :  { %3855 = vst [vmem:[#allocation20_spill] sm:$0xff] %v3254_v50  ;;  %v3260_v63 = vmin.f32 %v977_v46, 16.0  ;;  %v1283_v62 = vmul.f32 %v2227_v15, %v1282_v24  ;;  %vm1286_vm12 = vweird.f32 %v2227_v15  ;;  %v1289_v47 = vand.u32 2147483647, %v3210_v33 }
 0x178   :  { %v717_v23 = vadd.f32 0.4994258, %v716_v21  ;;  %v868_v28 = vadd.f32 1.1283791, %v867_v42  ;;  %v1508_v19 = vadd.f32 1.1283791, %v1507_v38  ;;  %v907_v6 = vmul.f32 %v906_v49, %v3122_v54 }
 0x179   :  { %v1542_v18 = vadd.f32 0.0036580483, %v1541_v12  ;;  %v1284_v37 = vadd.f32 %v2227_v15, %v1283_v62  ;;  %vm1285_vm13 = vweird.f32 %v3210_v33  ;;  %v1580_v22 = vadd.f32 0.00028619796, %v1579_v39  ;;  %v3858_v39 = vld [vmem:[#allocation32_spill] sm:$0xff] }
 0x17a   :  { %v718_v13 = vmul.f32 %v717_v23, %v2679_v56  ;;  %v2229_v59 = vpop.eup %2228  ;;  %v2102_v1 = vclamps-f32 %v1254_v27, 1.0  ;;  %vm1287_vm14 = vmor %vm1285_vm13, %vm1286_vm12  ;;  %v1292_v46 = vor.u32 1.1754944e-38, %v1291_v5  ;;  %v941_v24 = vmul.f32 %v940_v40, %v3231_v0 }
 0x17b   :  { %v979_v21 = vmul.f32 2.1237322e-06, %v3260_v63  ;;  %v1288_v42 = vsel %vm1287_vm14, %v2227_v15, %v1284_v37  ;;  %vm1290_vm15 = vcmp.eq.f32.partialorder %v1289_v47, 8.507059e+37  ;;  %v681_v38 = vmul.f32 %v2229_v59, %v3244_v16 }
 0x17c   :  { %v1313_v49 = vadd.f32 0.014752088, %v1312_v52  ;;  %v1293_v12 = vsel %vm1290_vm15, %v1292_v46, %v1288_v42  ;;  %v3269_v8 = vadd.f32 1.0, %v718_v13  ;;  %v3272_v33 = vadd.f32 %v3033_v17, %v348_v43 }
 0x17d   :  { %v1350_v56 = vmul.f32 3.8918573e-05, %v2698_v36  ;;  %v1294_v27 = vmul.f32 %v1293_v12, %v3858_v39  ;;  %v1581_v5 = vmul.f32 %v1580_v22, %v3238_v44  ;;  %v682_v40 = vsub.f32 1.0, %v681_v38 }
 0x17e   :  { %3857 = vst [vmem:[#allocation22_spill] sm:$0xff] %v3272_v33  ;;  %v691_v62 = vand.u32 2147483648, %v3244_v16  ;;  %v1717_v15 = vadd.f32 1.0, %v2102_v1  ;;  %v942_v47 = vadd.f32 0.0036580483, %v941_v24  ;;  %2230 = vrcp.f32 %v3269_v8  ;;  %v3860_v24 = vld [vmem:[#allocation24_spill] sm:$0xff] }
 0x17f   :  { %v980_v23 = vadd.f32 0.00028619796, %v979_v21  ;;  %v2103_v52 = vclamps-f32 %v1294_v27, 1.0  ;;  %v683_v37 = vmul.f32 %v2229_v59, %v682_v40  ;;  %vm686_vm0 = vweird.f32 %v2229_v59 }
 0x180   :  { %v1314_v13 = vmul.f32 %v1313_v49, %v2652_v20  ;;  %v1543_v43 = vmul.f32 %v1542_v18, %v3190_v7  ;;  %v689_v46 = vand.u32 2147483647, %v3244_v16  ;;  %v3283_v42 = vmul.f32 0.70710677, %v3272_v33  ;;  %v3861_v18 = vld [vmem:[#allocation25_spill] sm:$0xff] }
 0x181   :  { %v1351_v22 = vadd.f32 0.001143296, %v1350_v56  ;;  %v1718_v38 = vadd.f32 1.0, %v2103_v52  ;;  %v1582_v12 = vadd.f32 0.0036580483, %v1581_v5  ;;  %v684_v1 = vadd.f32 %v2229_v59, %v683_v37 }
 0x182   :  { %3859 = vst [vmem:[#allocation30_spill] sm:$0xff] %v3283_v42  ;;  %vm685_vm1 = vweird.f32 %v3244_v16  ;;  %v1749_v21 = vmul.f32 %v1717_v15, %v3860_v24  ;;  %v943_v39 = vmul.f32 %v942_v47, %v3231_v0  ;;  %v981_v27 = vmul.f32 %v980_v23, %v3260_v63 }
 0x183   :  { %vm687_vm2 = vmor %vm685_vm1, %vm686_vm0  ;;  %v692_v49 = vor.u32 1.1754944e-38, %v691_v62  ;;  %v1750_v40 = vmul.f32 %v1718_v38, %v3861_v18  ;;  %v1617_v33 = vmul.f32 %v3283_v42, %v3283_v42  ;;  %v1315_v56 = vadd.f32 0.112945676, %v1314_v13 }
 0x184   :  { %v688_v25 = vsel %vm687_vm2, %v2229_v59, %v684_v1  ;;  %v2231_v52 = vpop.eup %2230  ;;  %v3293_v5 = vmul.f32 %v868_v28, %v3049_v4  ;;  %v3296_v16 = vmul.f32 %v1508_v19, %v3052_v32  ;;  %v908_v15 = vadd.f32 1.1283791, %v907_v6 }
 0x185   :  { %vm690_vm3 = vcmp.eq.f32.partialorder %v689_v46, 8.507059e+37  ;;  %v1544_v47 = vadd.f32 0.05243302, %v1543_v43  ;;  %v1771_v23 = vpack.c.bf16 %v1750_v40, %v1749_v21  ;;  %v721_v62 = vmul.f32 %v2231_v52, %v3269_v8 }
 0x186   :  { %v693_v37 = vsel %vm690_vm3, %v692_v49, %v688_v25  ;;  %v944_v38 = vadd.f32 0.05243302, %v943_v39  ;;  %v1583_v59 = vmul.f32 %v1582_v12, %v3238_v44  ;;  %v982_v1 = vadd.f32 0.0036580483, %v981_v27 }
 0x187   :  { %v729_v13 = vand.u32 2147483647, %v3269_v8  ;;  %1903 = vmatmul.bf16.gmra.mxu3 %v1771_v23  ;;  %v722_v24 = vsub.f32 1.0, %v721_v62  ;;  %v3301_v4 = vmin.f32 %v1617_v33, 16.0  ;;  %v1316_v32 = vmul.f32 %v1315_v56, %v2652_v20 }
 0x188   :  { %v1352_v28 = vmul.f32 %v1351_v22, %v2698_v36  ;;  %v694_v19 = vmul.f32 %v693_v37, %v2931_v48  ;;  %v731_v25 = vand.u32 2147483648, %v3269_v8  ;;  %v750_v6 = vmul.f32 3.8918573e-05, %v2726_v41 }
 0x189   :  { %v790_v43 = vmul.f32 3.8918573e-05, %v2904_v61  ;;  %v723_v46 = vmul.f32 %v2231_v52, %v722_v24  ;;  %vm726_vm4 = vweird.f32 %v2231_v52  ;;  %v1317_v12 = vadd.f32 0.4994258, %v1316_v32 }
 0x18a   :  { %v1353_v21 = vadd.f32 0.014752088, %v1352_v28  ;;  %vm725_vm5 = vweird.f32 %v3269_v8  ;;  %vm3310_vm6 = vcmp.eq.f32.partialorder %v729_v13, 8.507059e+37  ;;  %v751_v39 = vadd.f32 0.001143296, %v750_v6 }
 0x18b   :  { %v791_v22 = vadd.f32 0.001143296, %v790_v43  ;;  %v724_v27 = vadd.f32 %v2231_v52, %v723_v46  ;;  %v1619_v48 = vmul.f32 2.1237322e-06, %v3301_v4  ;;  %v1318_v49 = vmul.f32 %v1317_v12, %v2652_v20  ;;  %vm727_vm7 = vmor %vm725_vm5, %vm726_vm4  ;;  %v3864_v43 = vld [vmem:[#allocation18_spill] sm:$0xff] }
 0x18c   :  { %v1354_v18 = vmul.f32 %v1353_v21, %v2698_v36  ;;  %v2088_v40 = vclamps-f32 %v694_v19, 1.0  ;;  %v732_v56 = vor.u32 1.1754944e-38, %v731_v25  ;;  %v752_v23 = vmul.f32 %v751_v39, %v2726_v41 }
 0x18d   :  { %v792_v8 = vmul.f32 %v791_v22, %v2904_v61  ;;  %v728_v37 = vsel %vm727_vm7, %v2231_v52, %v724_v27  ;;  %v3319_v62 = vadd.f32 1.0, %v1318_v49  ;;  %v1390_v24 = vmul.f32 3.8918573e-05, %v2831_v35  ;;  %v3865_v49 = vld [vmem:[#allocation17_spill] sm:$0xff] }
 0x18e   :  { %v1355_v13 = vadd.f32 0.112945676, %v1354_v18  ;;  %v1584_v32 = vadd.f32 0.05243302, %v1583_v59  ;;  %v733_v28 = vsel %vm3310_vm6, %v732_v56, %v728_v37  ;;  %v753_v20 = vadd.f32 0.014752088, %v752_v23 }
 0x18f   :  { %v793_v6 = vadd.f32 0.014752088, %v792_v8  ;;  %v983_v19 = vmul.f32 %v982_v1, %v3260_v63  ;;  %v734_v25 = vmul.f32 %v733_v28, %v3864_v43  ;;  %v1620_v46 = vadd.f32 0.00028619796, %v1619_v48  ;;  %v310_v8 = vpop.f32.mrf.mxu0  ;;  %v3867_v43 = vld [vmem:[#allocation28_spill] sm:$0xff] }
 0x190   :  { %2232 = vrcp.f32 %v3319_v62  ;;  %v1545_v52 = vmul.f32 %v1544_v47, %v3190_v7  ;;  %v945_v12 = vmul.f32 %v944_v38, %v3231_v0  ;;  %v1356_v21 = vmul.f32 %v1355_v13, %v2698_v36 }
 0x191   :  { %v754_v59 = vmul.f32 %v753_v20, %v2726_v41  ;;  %v2089_v39 = vclamps-f32 %v734_v25, 1.0  ;;  %v1703_v33 = vadd.f32 1.0, %v2088_v40  ;;  %v794_v22 = vmul.f32 %v793_v6, %v2904_v61 }
 0x192   :  { %v1391_v27 = vadd.f32 0.001143296, %v1390_v24  ;;  %v3333_v1 = vmul.f32 %v908_v15, %v3865_v49  ;;  %v1585_v48 = vmul.f32 %v1584_v32, %v3238_v44  ;;  %v1357_v18 = vadd.f32 0.4994258, %v1356_v21  ;;  %v3866_v15 = vld [vmem:[#allocation26_spill] sm:$0xff] }
 0x193   :  { %v755_v56 = vadd.f32 0.112945676, %v754_v59  ;;  %v984_v23 = vadd.f32 0.05243302, %v983_v19  ;;  %v1704_v47 = vadd.f32 1.0, %v2089_v39  ;;  %v1621_v38 = vmul.f32 %v1620_v46, %v3301_v4 }
 0x194   :  { %v795_v37 = vadd.f32 0.112945676, %v794_v22  ;;  %v1546_v13 = vadd.f32 0.18741608, %v1545_v52  ;;  %v3338_v28 = vmul.f32 0.5, %v3195_v51  ;;  %v1358_v24 = vmul.f32 %v1357_v18, %v2698_v36 }
 0x195   :  { %v946_v40 = vadd.f32 0.18741608, %v945_v12  ;;  %v1735_v6 = vmul.f32 %v1703_v33, %v3866_v15  ;;  %v1736_v32 = vmul.f32 %v1704_v47, %v3867_v43  ;;  %v3344_v25 = vadd.f32 %v3033_v17, %v310_v8 }
 0x196   :  { %v2233_v20 = vpop.eup %2232  ;;  %v1392_v19 = vmul.f32 %v1391_v27, %v2831_v35  ;;  %v3348_v21 = vadd.f32 1.0, %v1358_v24  ;;  %v756_v51 = vmul.f32 %v755_v56, %v2726_v41  ;;  %v796_v52 = vmul.f32 %v795_v37, %v2904_v61  ;;  %v350_v27 = vpop.f32.mrf.mxu2 }
 0x197   :  { %3868 = vst [vmem:[#allocation32_spill] sm:$0xff] %v3344_v25  ;;  %v1321_v46 = vmul.f32 %v2233_v20, %v3319_v62  ;;  %v1586_v12 = vadd.f32 0.18741608, %v1585_v48  ;;  %v985_v36 = vmul.f32 %v984_v23, %v3260_v63  ;;  %v1764_v59 = vpack.c.bf16 %v1736_v32, %v1735_v6 }
 0x198   :  { %v1622_v39 = vadd.f32 0.0036580483, %v1621_v38  ;;  %v1547_v33 = vmul.f32 %v1546_v13, %v3190_v7  ;;  %v947_v22 = vmul.f32 %v946_v40, %v3231_v0  ;;  %2234 = vrcp.f32 %v3348_v21 }
 0x199   :  { %v1322_v49 = vsub.f32 1.0, %v1321_v46  ;;  %1868 = vmatmul.bf16.gmra.mxu1 %v1764_v59  ;;  %vm1326_vm8 = vweird.f32 %v2233_v20  ;;  %v1329_v18 = vand.u32 2147483647, %v3319_v62  ;;  %v1331_v56 = vand.u32 2147483648, %v3319_v62  ;;  %v3870_v46 = vld [vmem:[#allocation33_spill] sm:$0xff] }
 0x19a   :  { %v1393_v47 = vadd.f32 0.014752088, %v1392_v19  ;;  %v3359_v23 = vmul.f32 0.70710677, %v3344_v25  ;;  %v757_v38 = vadd.f32 0.4994258, %v756_v51  ;;  %v1587_v37 = vmul.f32 %v1586_v12, %v3238_v44 }
 0x19b   :  { %v1323_v48 = vmul.f32 %v2233_v20, %v1322_v49  ;;  %v797_v8 = vadd.f32 0.4994258, %v796_v52  ;;  %v986_v13 = vadd.f32 0.18741608, %v985_v36  ;;  %v1623_v40 = vmul.f32 %v1622_v39, %v3301_v4 }
 0x19c   :  { %v3364_v24 = vadd.f32 %v3033_v17, %v350_v27  ;;  %vm1325_vm9 = vweird.f32 %v3319_v62  ;;  %v758_v6 = vmul.f32 %v757_v38, %v2726_v41  ;;  %vm1330_vm11 = vcmp.eq.f32.partialorder %v1329_v18, 8.507059e+37 }
 0x19d   :  { %v1324_v15 = vadd.f32 %v2233_v20, %v1323_v48  ;;  %v798_v43 = vmul.f32 %v797_v8, %v2904_v61  ;;  %vm1327_vm10 = vmor %vm1325_vm9, %vm1326_vm8  ;;  %v1332_v32 = vor.u32 1.1754944e-38, %v1331_v56  ;;  %v1394_v19 = vmul.f32 %v1393_v47, %v2831_v35 }
 0x19e   :  { %3869 = vst [vmem:[#allocation24_spill] sm:$0xff] %v3364_v24  ;;  %v1430_v51 = vmul.f32 3.8918573e-05, %v3870_v46  ;;  %v2235_v52 = vpop.eup %2234  ;;  %v1017_v17 = vmul.f32 %v3359_v23, %v3359_v23  ;;  %v3374_v36 = vadd.f32 1.0, %v758_v6  ;;  %v948_v41 = vadd.f32 1.1283791, %v947_v22 }
 0x19f   :  { %v1328_v12 = vsel %vm1327_vm10, %v2233_v20, %v1324_v15  ;;  %v3376_v62 = vadd.f32 1.0, %v798_v43  ;;  %v1361_v61 = vmul.f32 %v2235_v52, %v3348_v21  ;;  %v3380_v39 = vmul.f32 0.70710677, %v3364_v24  ;;  %v3873_v22 = vld [vmem:[#allocation13_spill] sm:$0xff] }
 0x1a0   :  { %v1333_v59 = vsel %vm1330_vm11, %v1332_v32, %v1328_v12  ;;  %v987_v49 = vmul.f32 %v986_v13, %v3260_v63  ;;  %v1624_v27 = vadd.f32 0.05243302, %v1623_v40  ;;  %v1369_v18 = vand.u32 2147483647, %v3348_v21 }
 0x1a1   :  { %3871 = vst [vmem:[#allocation25_spill] sm:$0xff] %v3380_v39  ;;  %2236 = vrcp.f32 %v3374_v36  ;;  %v3386_v20 = vmul.f32 0.5, %v3198_v11  ;;  %v1362_v56 = vsub.f32 1.0, %v1361_v61  ;;  %v1395_v47 = vadd.f32 0.112945676, %v1394_v19 }
 0x1a2   :  { %v1431_v48 = vadd.f32 0.001143296, %v1430_v51  ;;  %v1334_v38 = vmul.f32 %v1333_v59, %v3873_v22  ;;  %v1371_v8 = vand.u32 2147483648, %v3348_v21  ;;  %v3390_v15 = vmin.f32 %v1017_v17, 16.0  ;;  %v3874_v22 = vld [vmem:[#allocation19_spill] sm:$0xff] }
 0x1a3   :  { %3872 = vst [vmem:[#allocation18_spill] sm:$0xff] %v3386_v20  ;;  %2238 = vrcp.f32 %v3376_v62  ;;  %v3393_v13 = vadd.f32 1.1283791, %v1547_v33  ;;  %v1363_v40 = vmul.f32 %v2235_v52, %v1362_v56  ;;  %vm1366_vm12 = vweird.f32 %v2235_v52 }
 0x1a4   :  { %v1657_v6 = vmul.f32 %v3380_v39, %v3380_v39  ;;  %v3398_v11 = vmul.f32 %v948_v41, %v3215_v14  ;;  %v3400_v43 = vadd.f32 1.1283791, %v1587_v37  ;;  %v3402_v32 = vadd.f32 1.1283791, %v987_v49 }
 0x1a5   :  { %v3405_v19 = vmul.f32 %v1624_v27, %v3301_v4  ;;  %v1364_v51 = vadd.f32 %v2235_v52, %v1363_v40  ;;  %vm1365_vm13 = vweird.f32 %v3348_v21  ;;  %v1396_v33 = vmul.f32 %v1395_v47, %v2831_v35 }
 0x1a6   :  { %v1432_v12 = vmul.f32 %v1431_v48, %v3870_v46  ;;  %v2104_v59 = vclamps-f32 %v1334_v38, 1.0  ;;  %vm1367_vm14 = vmor %vm1365_vm13, %vm1366_vm12  ;;  %vm1370_vm15 = vcmp.eq.f32.partialorder %v1369_v18, 8.507059e+37  ;;  %v1372_v14 = vor.u32 1.1754944e-38, %v1371_v8 }
 0x1a7   :  { %v2237_v17 = vpop.eup %2236  ;;  %v1019_v37 = vmul.f32 2.1237322e-06, %v3390_v15  ;;  %v1368_v41 = vsel %vm1367_vm14, %v2235_v52, %v1364_v51  ;;  %v3411_v61 = vmin.f32 %v1657_v6, 16.0  ;;  %vm765_vm0 = vweird.f32 %v3374_v36 }
 0x1a8   :  { %v761_v49 = vmul.f32 %v2237_v17, %v3374_v36  ;;  %v1373_v21 = vsel %vm1370_vm15, %v1372_v14, %v1368_v41  ;;  %v769_v56 = vand.u32 2147483647, %v3374_v36  ;;  %v1397_v47 = vadd.f32 0.4994258, %v1396_v33 }
 0x1a9   :  { %v2239_v27 = vpop.eup %2238  ;;  %v1433_v48 = vadd.f32 0.014752088, %v1432_v12  ;;  %v1374_v38 = vmul.f32 %v1373_v21, %v3874_v22  ;;  %v771_v18 = vand.u32 2147483648, %v3374_v36  ;;  %v1719_v52 = vadd.f32 1.0, %v2104_v59 }
 0x1aa   :  { %v762_v40 = vsub.f32 1.0, %v761_v49  ;;  %v801_v8 = vmul.f32 %v2239_v27, %v3376_v62  ;;  %vm805_vm1 = vweird.f32 %v3376_v62  ;;  %v1398_v6 = vmul.f32 %v1397_v47, %v2831_v35  ;;  %v3877_v35 = vld [vmem:[#allocation27_spill] sm:$0xff] }
 0x1ab   :  { %v1434_v51 = vmul.f32 %v1433_v48, %v3870_v46  ;;  %v2105_v24 = vclamps-f32 %v1374_v38, 1.0  ;;  %vm766_vm2 = vweird.f32 %v2237_v17  ;;  %vm3422_vm3 = vcmp.eq.f32.partialorder %v769_v56, 8.507059e+37  ;;  %v3878_v38 = vld [vmem:[#allocation29_spill] sm:$0xff] }
 0x1ac   :  { %v763_v14 = vmul.f32 %v2237_v17, %v762_v40  ;;  %v802_v41 = vsub.f32 1.0, %v801_v8  ;;  %v809_v12 = vand.u32 2147483647, %v3376_v62  ;;  %v811_v49 = vand.u32 2147483648, %v3376_v62  ;;  %vm767_vm5 = vmor %vm765_vm0, %vm766_vm2 }
 0x1ad   :  { %v3428_v21 = vadd.f32 1.0, %v1398_v6  ;;  %v1720_v59 = vadd.f32 1.0, %v2105_v24  ;;  %vm806_vm4 = vweird.f32 %v2239_v27  ;;  %v1751_v47 = vmul.f32 %v1719_v52, %v3877_v35  ;;  %v3879_v52 = vld [vmem:[#allocation12_spill] sm:$0xff] }
 0x1ae   :  { %v764_v22 = vadd.f32 %v2237_v17, %v763_v14  ;;  %v803_v39 = vmul.f32 %v2239_v27, %v802_v41  ;;  %v772_v48 = vor.u32 1.1754944e-38, %v771_v18  ;;  %v1435_v56 = vadd.f32 0.112945676, %v1434_v51  ;;  %vm807_vm6 = vmor %vm805_vm1, %vm806_vm4 }
 0x1af   :  { %2240 = vrcp.f32 %v3428_v21  ;;  %v1752_v40 = vmul.f32 %v1720_v59, %v3878_v38  ;;  %v830_v6 = vmul.f32 3.8918573e-05, %v2938_v60  ;;  %v1020_v25 = vadd.f32 0.00028619796, %v1019_v37 }
 0x1b0   :  { %v768_v8 = vsel %vm767_vm5, %v2237_v17, %v764_v22  ;;  %v804_v42 = vadd.f32 %v2239_v27, %v803_v39  ;;  %v1659_v24 = vmul.f32 2.1237322e-06, %v3411_v61  ;;  %v812_v36 = vor.u32 1.1754944e-38, %v811_v49 }
 0x1b1   :  { %v773_v14 = vsel %vm3422_vm3, %v772_v48, %v768_v8  ;;  %v1772_v18 = vpack.c.bf16 %v1752_v40, %v1751_v47  ;;  %vm810_vm7 = vcmp.eq.f32.partialorder %v809_v12, 8.507059e+37  ;;  %v1409_v39 = vand.u32 2147483647, %v3428_v21 }
 0x1b2   :  { %v774_v41 = vmul.f32 %v773_v14, %v3879_v52  ;;  %v808_v51 = vsel %vm807_vm6, %v2239_v27, %v804_v42  ;;  %v1411_v17 = vand.u32 2147483648, %v3428_v21  ;;  %v1436_v37 = vmul.f32 %v1435_v56, %v3870_v46 }
 0x1b3   :  { %v813_v59 = vsel %vm810_vm7, %v812_v36, %v808_v51  ;;  %1908 = vmatmul.bf16.gmra.mxu3 %v1772_v18  ;;  %v831_v35 = vadd.f32 0.001143296, %v830_v6  ;;  %v870_v62 = vmul.f32 3.8918573e-05, %v3084_v34  ;;  %v1021_v47 = vmul.f32 %v1020_v25, %v3390_v15  ;;  %v3880_v36 = vld [vmem:[#allocation31_spill] sm:$0xff] }
 0x1b4   :  { %v2090_v22 = vclamps-f32 %v774_v41, 1.0  ;;  %v814_v33 = vmul.f32 %v813_v59, %v3176_v57  ;;  %v1437_v48 = vadd.f32 0.4994258, %v1436_v37  ;;  %v1470_v42 = vmul.f32 3.8918573e-05, %v2997_v58 }
 0x1b5   :  { %v2241_v49 = vpop.eup %2240  ;;  %v1510_v27 = vmul.f32 3.8918573e-05, %v3086_v9  ;;  %v832_v57 = vmul.f32 %v831_v35, %v2938_v60  ;;  %v871_v8 = vadd.f32 0.001143296, %v870_v62  ;;  %v910_v35 = vmul.f32 3.8918573e-05, %v3122_v54 }
 0x1b6   :  { %v2091_v12 = vclamps-f32 %v814_v33, 1.0  ;;  %v1705_v38 = vadd.f32 1.0, %v2090_v22  ;;  %v1401_v40 = vmul.f32 %v2241_v49, %v3428_v21  ;;  %vm1406_vm8 = vweird.f32 %v2241_v49  ;;  %v3881_v22 = vld [vmem:[#allocation21_spill] sm:$0xff] }
 0x1b7   :  { %v1438_v56 = vmul.f32 %v1437_v48, %v3870_v46  ;;  %v1471_v6 = vadd.f32 0.001143296, %v1470_v42  ;;  %v1511_v52 = vadd.f32 0.001143296, %v1510_v27  ;;  %v833_v51 = vadd.f32 0.014752088, %v832_v57 }
 0x1b8   :  { %v1706_v14 = vadd.f32 1.0, %v2091_v12  ;;  %v1737_v18 = vmul.f32 %v1705_v38, %v3880_v36  ;;  %v1402_v25 = vsub.f32 1.0, %v1401_v40  ;;  %v872_v59 = vmul.f32 %v871_v8, %v3084_v34 }
 0x1b9   :  { %v3454_v41 = vadd.f32 1.0, %v1438_v56  ;;  %v1472_v37 = vmul.f32 %v1471_v6, %v2997_v58  ;;  %v1512_v46 = vmul.f32 %v1511_v52, %v3086_v9  ;;  %v1022_v62 = vadd.f32 0.0036580483, %v1021_v47 }
 0x1ba   :  { %v1738_v33 = vmul.f32 %v1706_v14, %v3881_v22  ;;  %v1403_v20 = vmul.f32 %v2241_v49, %v1402_v25  ;;  %v3461_v48 = vadd.f32 0.00028619796, %v1659_v24  ;;  %vm1405_vm9 = vweird.f32 %v3428_v21 }
 0x1bb   :  { %2242 = vrcp.f32 %v3454_v41  ;;  %v834_v12 = vmul.f32 %v833_v51, %v2938_v60  ;;  %v873_v38 = vadd.f32 0.014752088, %v872_v59  ;;  %vm1407_vm10 = vmor %vm1405_vm9, %vm1406_vm8  ;;  %vm1410_vm11 = vcmp.eq.f32.partialorder %v1409_v39, 8.507059e+37 }
 0x1bc   :  { %v1765_v42 = vpack.c.bf16 %v1738_v33, %v1737_v18  ;;  %v1404_v27 = vadd.f32 %v2241_v49, %v1403_v20  ;;  %v1412_v40 = vor.u32 1.1754944e-38, %v1411_v17  ;;  %v1473_v56 = vadd.f32 0.014752088, %v1472_v37  ;;  %v3882_v18 = vld [vmem:[#allocation34_spill] sm:$0xff] }
 0x1bd   :  { %v1513_v57 = vadd.f32 0.014752088, %v1512_v46  ;;  %v835_v47 = vadd.f32 0.112945676, %v834_v12  ;;  %v874_v24 = vmul.f32 %v873_v38, %v3084_v34  ;;  %v911_v6 = vadd.f32 0.001143296, %v910_v35 }
 0x1be   :  { %1873 = vmatmul.bf16.gmra.mxu1 %v1765_v42  ;;  %v1408_v8 = vsel %vm1407_vm10, %v2241_v49, %v1404_v27  ;;  %v1474_v14 = vmul.f32 %v1473_v56, %v2997_v58  ;;  %v950_v36 = vmul.f32 3.8918573e-05, %v3231_v0  ;;  %v1023_v49 = vmul.f32 %v1022_v62, %v3390_v15 }
 0x1bf   :  { %v1413_v21 = vsel %vm1410_vm11, %v1412_v40, %v1408_v8  ;;  %v1514_v20 = vmul.f32 %v1513_v57, %v3086_v9  ;;  %v836_v39 = vmul.f32 %v835_v47, %v2938_v60  ;;  %v875_v17 = vadd.f32 0.112945676, %v874_v24 }
 0x1c0   :  { %v1414_v25 = vmul.f32 %v1413_v21, %v3882_v18  ;;  %v912_v52 = vmul.f32 %v911_v6, %v3122_v54  ;;  %v1475_v59 = vadd.f32 0.112945676, %v1474_v14  ;;  %v951_v22 = vadd.f32 0.001143296, %v950_v36 }
 0x1c1   :  { %v2243_v51 = vpop.eup %2242  ;;  %v1515_v37 = vadd.f32 0.112945676, %v1514_v20  ;;  %vm1445_vm12 = vweird.f32 %v3454_v41  ;;  %v1451_v46 = vand.u32 2147483648, %v3454_v41  ;;  %v837_v35 = vadd.f32 0.4994258, %v836_v39 }
 0x1c2   :  { %v1441_v33 = vmul.f32 %v2243_v51, %v3454_v41  ;;  %v876_v42 = vmul.f32 %v875_v17, %v3084_v34  ;;  %v1476_v27 = vmul.f32 %v1475_v59, %v2997_v58  ;;  %v913_v38 = vadd.f32 0.014752088, %v912_v52 }
 0x1c3   :  { %v1516_v12 = vmul.f32 %v1515_v37, %v3086_v9  ;;  %v2106_v40 = vclamps-f32 %v1414_v25, 1.0  ;;  %v838_v62 = vmul.f32 %v837_v35, %v2938_v60  ;;  %v952_v57 = vmul.f32 %v951_v22, %v3231_v0 }
 0x1c4   :  { %v1442_v56 = vsub.f32 1.0, %v1441_v33  ;;  %v877_v8 = vadd.f32 0.4994258, %v876_v42  ;;  %v1477_v47 = vadd.f32 0.4994258, %v1476_v27  ;;  %v914_v6 = vmul.f32 %v913_v38, %v3122_v54 }
 0x1c5   :  { %v1517_v24 = vadd.f32 0.4994258, %v1516_v12  ;;  %vm1446_vm13 = vweird.f32 %v2243_v51  ;;  %v1449_v14 = vand.u32 2147483647, %v3454_v41  ;;  %v3485_v20 = vadd.f32 1.0, %v838_v62  ;;  %v3883_v12 = vld [vmem:[#allocation14_spill] sm:$0xff] }
 0x1c6   :  { %v1443_v21 = vmul.f32 %v2243_v51, %v1442_v56  ;;  %v1452_v36 = vor.u32 1.1754944e-38, %v1451_v46  ;;  %v878_v18 = vmul.f32 %v877_v8, %v3084_v34  ;;  %v1478_v25 = vmul.f32 %v1477_v47, %v2997_v58  ;;  %vm1447_vm14 = vmor %vm1445_vm12, %vm1446_vm13 }
 0x1c7   :  { %v1518_v60 = vmul.f32 %v1517_v24, %v3086_v9  ;;  %v1721_v17 = vadd.f32 1.0, %v2106_v40  ;;  %2244 = vrcp.f32 %v3485_v20  ;;  %v953_v52 = vadd.f32 0.014752088, %v952_v57 }
 0x1c8   :  { %v1444_v39 = vadd.f32 %v2243_v51, %v1443_v21  ;;  %v3493_v59 = vadd.f32 1.0, %v878_v18  ;;  %v3495_v37 = vadd.f32 1.0, %v1478_v25  ;;  %v915_v33 = vadd.f32 0.112945676, %v914_v6 }
 0x1c9   :  { %v3497_v22 = vadd.f32 1.0, %v1518_v60  ;;  %v3500_v34 = vadd.f32 0.18741608, %v3405_v19  ;;  %v3504_v58 = vmul.f32 %v3461_v48, %v3411_v61  ;;  %vm1450_vm15 = vcmp.eq.f32.partialorder %v1449_v14, 8.507059e+37 }
 0x1ca   :  { %v1448_v9 = vsel %vm1447_vm14, %v2243_v51, %v1444_v39  ;;  %v849_v41 = vand.u32 2147483647, %v3485_v20  ;;  %v851_v35 = vand.u32 2147483648, %v3485_v20  ;;  %2246 = vrcp.f32 %v3493_v59  ;;  %v3886_v39 = vld [vmem:[#allocation23_spill] sm:$0xff] }
 0x1cb   :  { %v1453_v46 = vsel %vm1450_vm15, %v1452_v36, %v1448_v9  ;;  %v3509_v42 = vadd.f32 0.05243302, %v1023_v49  ;;  %v891_v19 = vand.u32 2147483648, %v3493_v59  ;;  %2248 = vrcp.f32 %v3495_v37 }
 0x1cc   :  { %v1454_v27 = vmul.f32 %v1453_v46, %v3181_v29  ;;  %v1753_v48 = vmul.f32 %v1721_v17, %v3883_v12  ;;  %2250 = vrcp.f32 %v3497_v22  ;;  %v916_v51 = vmul.f32 %v915_v33, %v3122_v54 }
 0x1cd   :  { %v954_v38 = vmul.f32 %v953_v52, %v3231_v0  ;;  %v2245_v40 = vpop.eup %2244  ;;  %vm845_vm0 = vweird.f32 %v3485_v20  ;;  %v889_v49 = vand.u32 2147483647, %v3493_v59  ;;  %v1491_v29 = vand.u32 2147483648, %v3495_v37 }
 0x1ce   :  { %v2107_v56 = vclamps-f32 %v1454_v27, 1.0  ;;  %v841_v62 = vmul.f32 %v2245_v40, %v3485_v20  ;;  %vm3522_vm1 = vcmp.eq.f32.partialorder %v849_v41, 8.507059e+37  ;;  %v852_v8 = vor.u32 1.1754944e-38, %v851_v35 }
 0x1cf   :  { %v1489_v47 = vand.u32 2147483647, %v3495_v37  ;;  %vm885_vm2 = vweird.f32 %v3493_v59  ;;  %v892_v6 = vor.u32 1.1754944e-38, %v891_v19  ;;  %v1529_v21 = vand.u32 2147483647, %v3497_v22 }
 0x1d0   :  { %v1722_v24 = vadd.f32 1.0, %v2107_v56  ;;  %v2247_v14 = vpop.eup %2246  ;;  %v842_v36 = vsub.f32 1.0, %v841_v62  ;;  %vm846_vm3 = vweird.f32 %v2245_v40  ;;  %vm1485_vm4 = vweird.f32 %v3495_v37 }
 0x1d1   :  { %v917_v18 = vadd.f32 0.4994258, %v916_v51  ;;  %v955_v25 = vadd.f32 0.112945676, %v954_v38  ;;  %v2249_v60 = vpop.eup %2248  ;;  %v881_v52 = vmul.f32 %v2247_v14, %v3493_v59  ;;  %vm3532_vm5 = vcmp.eq.f32.partialorder %v889_v49, 8.507059e+37  ;;  %vm847_vm10 = vmor %vm845_vm0, %vm846_vm3 }
 0x1d2   :  { %v1754_v17 = vmul.f32 %v1722_v24, %v3886_v39  ;;  %v1492_v9 = vor.u32 1.1754944e-38, %v1491_v29  ;;  %vm1525_vm6 = vweird.f32 %v3497_v22  ;;  %v1550_v46 = vmul.f32 3.8918573e-05, %v3190_v7  ;;  %v2251_v41 = vpop.eup %2250 }
 0x1d3   :  { %v843_v35 = vmul.f32 %v2245_v40, %v842_v36  ;;  %vm886_vm7 = vweird.f32 %v2247_v14  ;;  %v1481_v27 = vmul.f32 %v2249_v60, %v3495_v37  ;;  %vm3539_vm8 = vcmp.eq.f32.partialorder %v1489_v47, 8.507059e+37 }
 0x1d4   :  { %v1531_v12 = vand.u32 2147483648, %v3497_v22  ;;  %v1773_v51 = vpack.c.bf16 %v1754_v17, %v1753_v48  ;;  %v882_v38 = vsub.f32 1.0, %v881_v52  ;;  %v1521_v56 = vmul.f32 %v2251_v41, %v3497_v22  ;;  %vm887_vm13 = vmor %vm885_vm2, %vm886_vm7 }
 0x1d5   :  { %vm3545_vm9 = vcmp.eq.f32.partialorder %v1529_v21, 8.507059e+37  ;;  %v844_v29 = vadd.f32 %v2245_v40, %v843_v35  ;;  %v1482_v62 = vsub.f32 1.0, %v1481_v27  ;;  %v918_v24 = vmul.f32 %v917_v18, %v3122_v54 }
 0x1d6   :  { %v956_v36 = vmul.f32 %v955_v25, %v3231_v0  ;;  %1913 = vmatmul.bf16.gmra.mxu3 %v1773_v51  ;;  %v883_v47 = vmul.f32 %v2247_v14, %v882_v38  ;;  %vm1486_vm11 = vweird.f32 %v2249_v60  ;;  %v1522_v48 = vsub.f32 1.0, %v1521_v56 }
 0x1d7   :  { %v1551_v39 = vadd.f32 0.001143296, %v1550_v46  ;;  %v848_v17 = vsel %vm847_vm10, %v2245_v40, %v844_v29  ;;  %v1483_v21 = vmul.f32 %v2249_v60, %v1482_v62  ;;  %v3554_v52 = vadd.f32 1.0, %v918_v24  ;;  %vm1487_vm14 = vmor %vm1485_vm4, %vm1486_vm11 }
 0x1d8   :  { %v957_v50 = vadd.f32 0.4994258, %v956_v36  ;;  %v853_v35 = vsel %vm3522_vm1, %v852_v8, %v848_v17  ;;  %v884_v54 = vadd.f32 %v2247_v14, %v883_v47  ;;  %v1523_v18 = vmul.f32 %v2251_v41, %v1522_v48 }
 0x1d9   :  { %vm1526_vm12 = vweird.f32 %v2251_v41  ;;  %v854_v25 = vmul.f32 %v853_v35, %v3185_v10  ;;  %v1484_v20 = vadd.f32 %v2249_v60, %v1483_v21  ;;  %v1532_v27 = vor.u32 1.1754944e-38, %v1531_v12 }
 0x1da   :  { %2252 = vrcp.f32 %v3554_v52  ;;  %v888_v40 = vsel %vm887_vm13, %v2247_v14, %v884_v54  ;;  %v1524_v57 = vadd.f32 %v2251_v41, %v1523_v18  ;;  %v1552_v8 = vmul.f32 %v1551_v39, %v3190_v7  ;;  %vm1527_vm15 = vmor %vm1525_vm6, %vm1526_vm12  ;;  %v3895_v39 = vld [vmem:[#allocation15_spill] sm:$0xff] }
 0x1db   :  { %v1590_v46 = vmul.f32 3.8918573e-05, %v3238_v44  ;;  %v2092_v51 = vclamps-f32 %v854_v25, 1.0  ;;  %v893_v10 = vsel %vm3532_vm5, %v892_v6, %v888_v40  ;;  %v1488_v59 = vsel %vm1487_vm14, %v2249_v60, %v1484_v20 }
 0x1dc   :  { %v958_v12 = vmul.f32 %v957_v50, %v3231_v0  ;;  %v894_v14 = vmul.f32 %v893_v10, %v3293_v5  ;;  %v1493_v37 = vsel %vm3539_vm8, %v1492_v9, %v1488_v59  ;;  %v1528_v38 = vsel %vm1527_vm15, %v2251_v41, %v1524_v57 }
 0x1dd   :  { %v929_v56 = vand.u32 2147483647, %v3554_v52  ;;  %v3578_v29 = vadd.f32 0.0036580483, %v3504_v58  ;;  %v1494_v33 = vmul.f32 %v1493_v37, %v3201_v2  ;;  %v1533_v6 = vsel %vm3545_vm9, %v1532_v27, %v1528_v38 }
 0x1de   :  { %v931_v22 = vand.u32 2147483648, %v3554_v52  ;;  %v2093_v60 = vclamps-f32 %v894_v14, 1.0  ;;  %v1707_v0 = vadd.f32 1.0, %v2092_v51  ;;  %v1534_v50 = vmul.f32 %v1533_v6, %v3296_v16 }
 0x1df   :  { %v3585_v5 = vadd.f32 1.0, %v958_v12  ;;  %v3589_v41 = vmul.f32 %v3509_v42, %v3390_v15  ;;  %v2108_v58 = vclamps-f32 %v1494_v33, 1.0  ;;  %v1553_v19 = vadd.f32 0.014752088, %v1552_v8 }
 0x1e0   :  { %v2253_v9 = vpop.eup %2252  ;;  %v1591_v62 = vadd.f32 0.001143296, %v1590_v46  ;;  %v1708_v2 = vadd.f32 1.0, %v2093_v60  ;;  %v2109_v24 = vclamps-f32 %v1534_v50, 1.0  ;;  %vm3592_vm0 = vcmp.eq.f32.partialorder %v929_v56, 8.507059e+37 }
 0x1e1   :  { %v921_v49 = vmul.f32 %v2253_v9, %v3554_v52  ;;  %v1723_v47 = vadd.f32 1.0, %v2108_v58  ;;  %v932_v16 = vor.u32 1.1754944e-38, %v931_v22  ;;  %2254 = vrcp.f32 %v3585_v5 }
 0x1e2   :  { %v990_v48 = vmul.f32 3.8918573e-05, %v3260_v63  ;;  %v1739_v42 = vmul.f32 %v1707_v0, %v3895_v39  ;;  %v1740_v17 = vmul.f32 %v1708_v2, %v3188_v31  ;;  %v1724_v21 = vadd.f32 1.0, %v2109_v24 }
 0x1e3   :  { %v922_v35 = vsub.f32 1.0, %v921_v49  ;;  %vm926_vm1 = vweird.f32 %v2253_v9  ;;  %v969_v54 = vand.u32 2147483647, %v3585_v5  ;;  %v1554_v18 = vmul.f32 %v1553_v19, %v3190_v7 }
 0x1e4   :  { %v1592_v25 = vmul.f32 %v1591_v62, %v3238_v44  ;;  %v1766_v20 = vpack.c.bf16 %v1740_v17, %v1739_v42  ;;  %v1755_v27 = vmul.f32 %v1723_v47, %v3167_v45  ;;  %v1756_v40 = vmul.f32 %v1724_v21, %v3204_v26 }
 0x1e5   :  { %v923_v57 = vmul.f32 %v2253_v9, %v922_v35  ;;  %vm925_vm2 = vweird.f32 %v3554_v52  ;;  %v1555_v8 = vadd.f32 0.112945676, %v1554_v18  ;;  %v991_v31 = vadd.f32 0.001143296, %v990_v48 }
 0x1e6   :  { %v1593_v46 = vadd.f32 0.014752088, %v1592_v25  ;;  %1878 = vmatmul.bf16.gmra.mxu1 %v1766_v20  ;;  %v1774_v51 = vpack.c.bf16 %v1756_v40, %v1755_v27  ;;  %v1030_v59 = vmul.f32 3.8918573e-05, %v3390_v15  ;;  %v1630_v12 = vmul.f32 3.8918573e-05, %v3301_v4  ;;  %vm927_vm3 = vmor %vm925_vm2, %vm926_vm1 }
 0x1e7   :  { %v924_v10 = vadd.f32 %v2253_v9, %v923_v57  ;;  %v2255_v14 = vpop.eup %2254  ;;  %v971_v45 = vand.u32 2147483648, %v3585_v5  ;;  %v1556_v26 = vmul.f32 %v1555_v8, %v3190_v7  ;;  %v992_v52 = vmul.f32 %v991_v31, %v3260_v63 }
 0x1e8   :  { %v1594_v37 = vmul.f32 %v1593_v46, %v3238_v44  ;;  %1918 = vmatmul.bf16.gmra.mxu3 %v1774_v51  ;;  %v961_v56 = vmul.f32 %v2255_v14, %v3585_v5  ;;  %v1031_v33 = vadd.f32 0.001143296, %v1030_v59  ;;  %v1670_v6 = vmul.f32 3.8918573e-05, %v3411_v61 }
 0x1e9   :  { %v928_v38 = vsel %vm927_vm3, %v2253_v9, %v924_v10  ;;  %v1557_v60 = vadd.f32 0.4994258, %v1556_v26  ;;  %v993_v50 = vadd.f32 0.014752088, %v992_v52  ;;  %vm966_vm4 = vweird.f32 %v2255_v14 }
 0x1ea   :  { %v933_v22 = vsel %vm3592_vm0, %v932_v16, %v928_v38  ;;  %v1595_v0 = vadd.f32 0.112945676, %v1594_v37  ;;  %v962_v58 = vsub.f32 1.0, %v961_v56  ;;  %v1032_v19 = vmul.f32 %v1031_v33, %v3390_v15 }
 0x1eb   :  { %v1631_v62 = vadd.f32 0.001143296, %v1630_v12  ;;  %v934_v2 = vmul.f32 %v933_v22, %v3333_v1  ;;  %v1558_v9 = vmul.f32 %v1557_v60, %v3190_v7  ;;  %v994_v49 = vmul.f32 %v993_v50, %v3260_v63 }
 0x1ec   :  { %v1596_v24 = vmul.f32 %v1595_v0, %v3238_v44  ;;  %v963_v47 = vmul.f32 %v2255_v14, %v962_v58  ;;  %v1033_v48 = vadd.f32 0.014752088, %v1032_v19  ;;  %v1671_v16 = vadd.f32 0.001143296, %v1670_v6 }
 0x1ed   :  { %v1632_v36 = vmul.f32 %v1631_v62, %v3301_v4  ;;  %v1663_v39 = vmul.f32 %v3578_v29, %v3411_v61  ;;  %v3625_v42 = vadd.f32 1.0, %v1558_v9  ;;  %v995_v21 = vadd.f32 0.112945676, %v994_v49 }
 0x1ee   :  { %v1597_v17 = vadd.f32 0.4994258, %v1596_v24  ;;  %v964_v35 = vadd.f32 %v2255_v14, %v963_v47  ;;  %vm965_vm5 = vweird.f32 %v3585_v5  ;;  %v1034_v7 = vmul.f32 %v1033_v48, %v3390_v15 }
 0x1ef   :  { %v1633_v1 = vadd.f32 0.014752088, %v1632_v36  ;;  %v1026_v18 = vadd.f32 0.18741608, %v3589_v41  ;;  %vm967_vm6 = vmor %vm965_vm5, %vm966_vm4  ;;  %vm970_vm7 = vcmp.eq.f32.partialorder %v969_v54, 8.507059e+37  ;;  %v972_v25 = vor.u32 1.1754944e-38, %v971_v45 }
 0x1f0   :  { %2256 = vrcp.f32 %v3625_v42  ;;  %v2094_v20 = vclamps-f32 %v934_v2, 1.0  ;;  %v968_v29 = vsel %vm967_vm6, %v2255_v14, %v964_v35  ;;  %v1598_v27 = vmul.f32 %v1597_v17, %v3238_v44 }
 0x1f1   :  { %v996_v40 = vmul.f32 %v995_v21, %v3260_v63  ;;  %v1664_v57 = vadd.f32 0.05243302, %v1663_v39  ;;  %v973_v8 = vsel %vm970_vm7, %v972_v25, %v968_v29  ;;  %v1035_v5 = vadd.f32 0.112945676, %v1034_v7 }
 0x1f2   :  { %v1672_v46 = vmul.f32 %v1671_v16, %v3411_v61  ;;  %v974_v31 = vmul.f32 %v973_v8, %v3398_v11  ;;  %v3636_v41 = vadd.f32 1.0, %v1598_v27  ;;  %v1634_v54 = vmul.f32 %v1633_v1, %v3301_v4 }
 0x1f3   :  { %v997_v51 = vadd.f32 0.4994258, %v996_v40  ;;  %v1549_v10 = vmul.f32 %v3393_v13, %v3154_v30  ;;  %v3643_v44 = vmul.f32 %v3400_v43, %v3218_v53  ;;  %v1027_v59 = vmul.f32 %v1026_v18, %v3390_v15 }
 0x1f4   :  { %v1036_v12 = vmul.f32 %v1035_v5, %v3390_v15  ;;  %v3649_v14 = vmul.f32 %v3402_v32, %v3242_v55  ;;  %v2095_v11 = vclamps-f32 %v974_v31, 1.0  ;;  %v1709_v45 = vadd.f32 1.0, %v2094_v20 }
 0x1f5   :  { %2258 = vrcp.f32 %v3636_v41  ;;  %v998_v37 = vmul.f32 %v997_v51, %v3260_v63  ;;  %v1635_v13 = vadd.f32 0.112945676, %v1634_v54  ;;  %v1673_v52 = vadd.f32 0.014752088, %v1672_v46 }
 0x1f6   :  { %v2257_v26 = vpop.eup %2256  ;;  %v1037_v30 = vadd.f32 0.4994258, %v1036_v12  ;;  %v3655_v53 = vmul.f32 %v3500_v34, %v3301_v4  ;;  %v1665_v43 = vmul.f32 %v1664_v57, %v3411_v61  ;;  %v1710_v38 = vadd.f32 1.0, %v2095_v11  ;;  %v1854_v12 = vpop.f32.mrf.mxu1 }
 0x1f7   :  { %v1561_v55 = vmul.f32 %v2257_v26, %v3625_v42  ;;  %v1028_v32 = vadd.f32 1.1283791, %v1027_v59  ;;  %v3659_v56 = vadd.f32 1.0, %v998_v37  ;;  %v1636_v6 = vmul.f32 %v1635_v13, %v3301_v4  ;;  %v3701_v59 = vld [vmem:[%s3783_s4] ss:$0 sm:$0xff]  ;;  %v1894_v11 = vpop.f32.mrf.mxu3  ;;  %s2376_s4 = smov [#allocation8]  }
 0x1f8   :  { %v1038_v33 = vmul.f32 %v1037_v30, %v3390_v15  ;;  %v1741_v63 = vmul.f32 %v1709_v45, %v3207_v3  ;;  %v1742_v22 = vmul.f32 %v1710_v38, %v3338_v28  ;;  %v1571_v34 = vand.u32 2147483648, %v3625_v42  ;;  %s1970_s12 = sshll.u32 %s2376_s4, 4  ;;  %s1971_s12 = int_to_ptr.vmem [resolvable:$true] %s1970_s12 }
 0x1f9   :  { %v1562_v60 = vsub.f32 1.0, %v1561_v55  ;;  %vm1566_vm8 = vweird.f32 %v2257_v26  ;;  %v1569_v0 = vand.u32 2147483647, %v3625_v42  ;;  %2260 = vrcp.f32 %v3659_v56 }
 0x1fa   :  { %v1674_v50 = vmul.f32 %v1673_v52, %v3411_v61  ;;  %v1767_v19 = vpack.c.bf16 %v1742_v22, %v1741_v63  ;;  %v3669_v15 = vadd.f32 1.0, %v1038_v33  ;;  %v1637_v2 = vadd.f32 0.4994258, %v1636_v6 }
 0x1fb   :  { %v2259_v58 = vpop.eup %2258  ;;  %v1563_v62 = vmul.f32 %v2257_v26, %v1562_v60  ;;  %v3672_v3 = vmul.f32 %v1028_v32, %v3359_v23  ;;  %v3674_v28 = vadd.f32 0.18741608, %v1665_v43  ;;  %vm1565_vm9 = vweird.f32 %v3625_v42 }
 0x1fc   :  { %v1601_v9 = vmul.f32 %v2259_v58, %v3636_v41  ;;  %1883 = vmatmul.bf16.gmra.mxu1 %v1767_v19  ;;  %v1572_v49 = vor.u32 1.1754944e-38, %v1571_v34  ;;  %v1609_v47 = vand.u32 2147483647, %v3636_v41  ;;  %2262 = vrcp.f32 %v3669_v15  ;;  %vm1567_vm10 = vmor %vm1565_vm9, %vm1566_vm8 }
 0x1fd   :  { %v1564_v24 = vadd.f32 %v2257_v26, %v1563_v62  ;;  %v1611_v36 = vand.u32 2147483648, %v3636_v41  ;;  %v1638_v23 = vmul.f32 %v1637_v2, %v3301_v4  ;;  %v1675_v16 = vadd.f32 0.112945676, %v1674_v50  ;;  %v3900_v62 = vld [vmem:[#allocation20_spill] sm:$0xff]  ;;  %v3901_v2 = vld [vmem:[#allocation18_spill] sm:$0xff] }
 0x1fe   :  { %v1602_v48 = vsub.f32 1.0, %v1601_v9  ;;  %vm1570_vm11 = vcmp.eq.f32.partialorder %v1569_v0, 8.507059e+37  ;;  %v1009_v42 = vand.u32 2147483647, %v3659_v56  ;;  %v1011_v17 = vand.u32 2147483648, %v3659_v56 }
 0x1ff   :  { %v1568_v39 = vsel %vm1567_vm10, %v2257_v26, %v1564_v24  ;;  %v2261_v21 = vpop.eup %2260  ;;  %vm1606_vm12 = vweird.f32 %v2259_v58  ;;  %v3685_v1 = vadd.f32 1.0, %v1638_v23  ;;  %vm1605_vm13 = vweird.f32 %v3636_v41  ;;  %v1896_v23 = vpop.f32.mrf.mxu3 }
 0x200   :  { %v1573_v35 = vsel %vm1570_vm11, %v1572_v49, %v1568_v39  ;;  %v1603_v7 = vmul.f32 %v2259_v58, %v1602_v48  ;;  %v1001_v25 = vmul.f32 %v2261_v21, %v3659_v56  ;;  %v1676_v4 = vmul.f32 %v1675_v16, %v3411_v61  ;;  %vm1607_vm15 = vmor %vm1605_vm13, %vm1606_vm12 }
 0x201   :  { %v1574_v18 = vmul.f32 %v1573_v35, %v1549_v10  ;;  %vm1610_vm14 = vcmp.eq.f32.partialorder %v1609_v47, 8.507059e+37  ;;  %v1612_v29 = vor.u32 1.1754944e-38, %v1611_v36  ;;  %2264 = vrcp.f32 %v3685_v1 }
 0x202   :  { %v1604_v20 = vadd.f32 %v2259_v58, %v1603_v7  ;;  %v2263_v27 = vpop.eup %2262  ;;  %v1002_v40 = vsub.f32 1.0, %v1001_v25  ;;  %vm1005_vm0 = vweird.f32 %v3659_v56  ;;  %vm3692_vm1 = vcmp.eq.f32.partialorder %v1009_v42, 8.507059e+37 }
 0x203   :  { %v1677_v8 = vadd.f32 0.4994258, %v1676_v4  ;;  %v2110_v5 = vclamps-f32 %v1574_v18, 1.0  ;;  %v1012_v31 = vor.u32 1.1754944e-38, %v1011_v17  ;;  %v1041_v41 = vmul.f32 %v2263_v27, %v3669_v15 }
 0x204   :  { %v1608_v46 = vsel %vm1607_vm15, %v2259_v58, %v1604_v20  ;;  %v1003_v54 = vmul.f32 %v2261_v21, %v1002_v40  ;;  %vm1006_vm2 = vweird.f32 %v2261_v21  ;;  %v1049_v10 = vand.u32 2147483647, %v3669_v15 }
 0x205   :  { %v1613_v51 = vsel %vm1610_vm14, %v1612_v29, %v1608_v46  ;;  %v1042_v26 = vsub.f32 1.0, %v1041_v41  ;;  %v1051_v37 = vand.u32 2147483648, %v3669_v15  ;;  %v1678_v30 = vmul.f32 %v1677_v8, %v3411_v61  ;;  %vm1007_vm4 = vmor %vm1005_vm0, %vm1006_vm2  ;;  %v3902_v29 = vld [vmem:[#allocation16_spill] sm:$0xff] }
 0x206   :  { %v1614_v45 = vmul.f32 %v1613_v51, %v3643_v44  ;;  %v1004_v13 = vadd.f32 %v2261_v21, %v1003_v54  ;;  %vm1046_vm3 = vweird.f32 %v2263_v27  ;;  %v1855_v52 = vadd.f32 %v3701_v59, %v1854_v12 }
 0x207   :  { %v1895_v43 = vadd.f32 %v3701_v59, %v1894_v11  ;;  %v2265_v38 = vpop.eup %2264  ;;  %v1725_v32 = vadd.f32 1.0, %v2110_v5  ;;  %v1043_v33 = vmul.f32 %v2263_v27, %v1042_v26  ;;  %v3711_v44 = vadd.f32 1.0, %v1678_v30  ;;  %v3904_v5 = vld [vmem:[#allocation30_spill] sm:$0xff] }
 0x208   :  { %v2111_v55 = vclamps-f32 %v1614_v45, 1.0  ;;  %v1008_v6 = vsel %vm1007_vm4, %v2261_v21, %v1004_v13  ;;  %vm1045_vm5 = vweird.f32 %v3669_v15  ;;  %vm3714_vm6 = vcmp.eq.f32.partialorder %v1049_v10, 8.507059e+37  ;;  %1934 = vst [vmem:[#allocation8] sm:$0xff] %v1855_v52  ;;  %v1899_v45 = vpop.f32.mrf.mxu3 }
 0x209   :  { %v1641_v22 = vmul.f32 %v2265_v38, %v3685_v1  ;;  %v1013_v34 = vsel %vm3692_vm1, %v1012_v31, %v1008_v6  ;;  %v1044_v0 = vadd.f32 %v2263_v27, %v1043_v33  ;;  %2266 = vrcp.f32 %v3711_v44  ;;  %1950 = vst [vmem:[#allocation8 + $0x80] sm:$0xff] %v1895_v43  ;;  %vm1047_vm7 = vmor %vm1045_vm5, %vm1046_vm3  ;;  %v3905_v43 = vld [vmem:[#allocation25_spill] sm:$0xff] }
 0x20a   :  { %v1726_v60 = vadd.f32 1.0, %v2111_v55  ;;  %v1014_v56 = vmul.f32 %v1013_v34, %v3649_v14  ;;  %v1052_v50 = vor.u32 1.1754944e-38, %v1051_v37  ;;  %v1649_v19 = vand.u32 2147483647, %v3685_v1  ;;  %v1856_v14 = vpop.f32.mrf.mxu1 }
 0x20b   :  { %v1642_v58 = vsub.f32 1.0, %v1641_v22  ;;  %v1757_v15 = vmul.f32 %v1725_v32, %v3900_v62  ;;  %v1048_v24 = vsel %vm1047_vm7, %v2263_v27, %v1044_v0  ;;  %v1651_v49 = vand.u32 2147483648, %v3685_v1  ;;  %v3903_v27 = vld [vmem:[#allocation32_spill] sm:$0xff] }
 0x20c   :  { %v1758_v9 = vmul.f32 %v1726_v60, %v3901_v2  ;;  %v2096_v47 = vclamps-f32 %v1014_v56, 1.0  ;;  %v1053_v48 = vsel %vm3714_vm6, %v1052_v50, %v1048_v24  ;;  %vm1646_vm8 = vweird.f32 %v2265_v38  ;;  %v3906_v56 = vld [vmem:[#allocation22_spill] sm:$0xff] }
 0x20d   :  { %v1643_v36 = vmul.f32 %v2265_v38, %v1642_v58  ;;  %v1054_v39 = vmul.f32 %v1053_v48, %v3672_v3  ;;  %v1857_v42 = vadd.f32 %v3701_v59, %v1856_v14  ;;  %v1628_v17 = vadd.f32 1.1283791, %v3655_v53  ;;  %v3907_v58 = vld [vmem:[#allocation24_spill] sm:$0xff] }
 0x20e   :  { %v1775_v16 = vpack.c.bf16 %v1758_v9, %v1757_v15  ;;  %vm1645_vm9 = vweird.f32 %v3685_v1  ;;  %v1897_v35 = vadd.f32 %v3701_v59, %v1896_v23  ;;  %v1667_v18 = vmul.f32 %v3674_v28, %v3411_v61 }
 0x20f   :  { %v1644_v21 = vadd.f32 %v2265_v38, %v1643_v36  ;;  %v2267_v7 = vpop.eup %2266  ;;  %v2097_v25 = vclamps-f32 %v1054_v39, 1.0  ;;  %v1711_v4 = vadd.f32 1.0, %v2096_v47  ;;  %vm1647_vm10 = vmor %vm1645_vm9, %vm1646_vm8  ;;  %v1652_v20 = vor.u32 1.1754944e-38, %v1651_v49  ;;  %1935 = vst [vmem:[#allocation8 + $0x8] sm:$0xff] %v1857_v42 }
 0x210   :  { %1923 = vmatmul.bf16.gmra.mxu3 %v1775_v16  ;;  %vm1650_vm11 = vcmp.eq.f32.partialorder %v1649_v19, 8.507059e+37  ;;  %v1681_v53 = vmul.f32 %v2267_v7, %v3711_v44  ;;  %1951 = vst [vmem:[#allocation8 + $0x88] sm:$0xff] %v1897_v35  ;;  %v367_v1 = vmul.f32 0.5, %v3902_v29  ;;  %v368_v40 = vmul.f32 0.5, %v3903_v27  ;;  %v1901_v34 = vpop.f32.mrf.mxu3 }
 0x211   :  { %v1648_v3 = vsel %vm1647_vm10, %v2265_v38, %v1644_v21  ;;  %v1712_v57 = vadd.f32 1.0, %v2097_v25  ;;  %v1629_v61 = vmul.f32 %v1628_v17, %v3904_v5  ;;  %v1668_v46 = vadd.f32 1.1283791, %v1667_v18 }
 0x212   :  { %v1653_v8 = vsel %vm1650_vm11, %v1652_v20, %v1648_v3  ;;  %v1682_v28 = vsub.f32 1.0, %v1681_v53  ;;  %v1743_v31 = vmul.f32 %v1711_v4, %v367_v1  ;;  %v1691_v51 = vand.u32 2147483648, %v3711_v44  ;;  %v1859_v11 = vpop.f32.mrf.mxu1 }
 0x213   :  { %v1744_v41 = vmul.f32 %v1712_v57, %v368_v40  ;;  %v1654_v54 = vmul.f32 %v1653_v8, %v1629_v61  ;;  %vm1686_vm12 = vweird.f32 %v2267_v7  ;;  %v1689_v12 = vand.u32 2147483647, %v3711_v44 }
 0x214   :  { %v1683_v10 = vmul.f32 %v2267_v7, %v1682_v28  ;;  %v1860_v37 = vadd.f32 %v3701_v59, %v1859_v11  ;;  %v1900_v30 = vadd.f32 %v3701_v59, %v1899_v45  ;;  %vm1685_vm13 = vweird.f32 %v3711_v44 }
 0x215   :  { %v1768_v26 = vpack.c.bf16 %v1744_v41, %v1743_v31  ;;  %vm1687_vm14 = vmor %vm1685_vm13, %vm1686_vm12  ;;  %v1692_v52 = vor.u32 1.1754944e-38, %v1691_v51  ;;  %v1669_v38 = vmul.f32 %v1668_v46, %v3905_v43  ;;  %v2112_v55 = vclamps-f32 %v1654_v54, 1.0 }
 0x216   :  { %v1684_v13 = vadd.f32 %v2267_v7, %v1683_v10  ;;  %1936 = vst [vmem:[#allocation8 + $0x10] sm:$0xff] %v1860_v37  ;;  %vm1690_vm15 = vcmp.eq.f32.partialorder %v1689_v12, 8.507059e+37  ;;  %v1902_v44 = vadd.f32 %v3701_v59, %v1901_v34  ;;  %v383_v50 = vmul.f32 0.5, %v3906_v56 }
 0x217   :  { %1888 = vmatmul.bf16.gmra.mxu1 %v1768_v26  ;;  %1952 = vst [vmem:[#allocation8 + $0x90] sm:$0xff] %v1900_v30  ;;  %v1727_v22 = vadd.f32 1.0, %v2112_v55  ;;  %v384_v19 = vmul.f32 0.5, %v3907_v58 }
 0x218   :  { %v1688_v32 = vsel %vm1687_vm14, %v2267_v7, %v1684_v13  ;;  %1953 = vst [vmem:[#allocation8 + $0x98] sm:$0xff] %v1902_v44  ;;  %v1904_v49 = vpop.f32.mrf.mxu3 }
 0x219   :  { %v1693_v33 = vsel %vm1690_vm15, %v1692_v52, %v1688_v32  ;;  %v1759_v15 = vmul.f32 %v1727_v22, %v383_v50  ;;  %v1905_v48 = vadd.f32 %v3701_v59, %v1904_v49 }
 0x21a   :  { %v1694_v6 = vmul.f32 %v1693_v33, %v1669_v38  ;;  %v1861_v60 = vpop.f32.mrf.mxu1 }
 0x21b   :  { %v1862_v0 = vadd.f32 %v3701_v59, %v1861_v60  ;;  %1954 = vst [vmem:[#allocation8 + $0xa0] sm:$0xff] %v1905_v48 }
 0x21c   :  { %v2113_v63 = vclamps-f32 %v1694_v6, 1.0 }
 0x21d   :  { %1937 = vst [vmem:[#allocation8 + $0x18] sm:$0xff] %v1862_v0 }
 0x21e   :  { %v1728_v62 = vadd.f32 1.0, %v2113_v63 }
 0x220   :  { %v1760_v2 = vmul.f32 %v1728_v62, %v384_v19  ;;  %v1906_v14 = vpop.f32.mrf.mxu3 }
 0x221   :  { %v1907_v16 = vadd.f32 %v3701_v59, %v1906_v14 }
 0x222   :  { %v1776_v9 = vpack.c.bf16 %v1760_v2, %v1759_v15  ;;  %v1864_v24 = vpop.f32.mrf.mxu1 }
 0x223   :  { %v1865_v47 = vadd.f32 %v3701_v59, %v1864_v24  ;;  %1955 = vst [vmem:[#allocation8 + $0xa8] sm:$0xff] %v1907_v16 }
 0x224   :  { %1928 = vmatmul.bf16.gmra.mxu3 %v1776_v9 }
 0x225   :  { %1938 = vst [vmem:[#allocation8 + $0x20] sm:$0xff] %v1865_v47 }
 0x22a   :  { %v1866_v36 = vpop.f32.mrf.mxu1 }
 0x22b   :  { %v1867_v23 = vadd.f32 %v3701_v59, %v1866_v36 }
 0x22d   :  { %1939 = vst [vmem:[#allocation8 + $0x28] sm:$0xff] %v1867_v23 }
 0x232   :  { %v1869_v39 = vpop.f32.mrf.mxu1 }
 0x233   :  { %v1870_v42 = vadd.f32 %v3701_v59, %v1869_v39 }
 0x235   :  { %1940 = vst [vmem:[#allocation8 + $0x30] sm:$0xff] %v1870_v42 }
 0x236   :  { %v1909_v17 = vpop.f32.mrf.mxu3 }
 0x237   :  { %v1910_v21 = vadd.f32 %v3701_v59, %v1909_v17 }
 0x239   :  { %1956 = vst [vmem:[#allocation8 + $0xb0] sm:$0xff] %v1910_v21 }
 0x23a   :  { %v1871_v35 = vpop.f32.mrf.mxu1 }
 0x23b   :  { %v1872_v7 = vadd.f32 %v3701_v59, %v1871_v35 }
 0x23d   :  { %1941 = vst [vmem:[#allocation8 + $0x38] sm:$0xff] %v1872_v7 }
 0x23e   :  { %v1911_v18 = vpop.f32.mrf.mxu3 }
 0x23f   :  { %v1912_v25 = vadd.f32 %v3701_v59, %v1911_v18 }
 0x241   :  { %1957 = vst [vmem:[#allocation8 + $0xb8] sm:$0xff] %v1912_v25 }
 0x242   :  { %v1874_v4 = vpop.f32.mrf.mxu1 }
 0x243   :  { %v1875_v20 = vadd.f32 %v3701_v59, %v1874_v4 }
 0x245   :  { %1942 = vst [vmem:[#allocation8 + $0x40] sm:$0xff] %v1875_v20 }
 0x24a   :  { %v1876_v3 = vpop.f32.mrf.mxu1 }
 0x24b   :  { %v1877_v53 = vadd.f32 %v3701_v59, %v1876_v3 }
 0x24d   :  { %1943 = vst [vmem:[#allocation8 + $0x48] sm:$0xff] %v1877_v53 }
 0x259   :  { %v1914_v29 = vpop.f32.mrf.mxu3 }
 0x25a   :  { %v1915_v1 = vadd.f32 %v3701_v59, %v1914_v29 }
 0x25c   :  { %1958 = vst [vmem:[#allocation8 + $0xc0] sm:$0xff] %v1915_v1 }
 0x261   :  { %v1916_v27 = vpop.f32.mrf.mxu3 }
 0x262   :  { %v1917_v40 = vadd.f32 %v3701_v59, %v1916_v27 }
 0x263   :  { %v1879_v57 = vpop.f32.mrf.mxu1 }
 0x264   :  { %v1880_v8 = vadd.f32 %v3701_v59, %v1879_v57  ;;  %1959 = vst [vmem:[#allocation8 + $0xc8] sm:$0xff] %v1917_v40 }
 0x266   :  { %1944 = vst [vmem:[#allocation8 + $0x50] sm:$0xff] %v1880_v8 }
 0x26b   :  { %v1881_v5 = vpop.f32.mrf.mxu1  ;;  %v1919_v61 = vpop.f32.mrf.mxu3 }
 0x26c   :  { %v1882_v28 = vadd.f32 %v3701_v59, %v1881_v5  ;;  %v1920_v46 = vadd.f32 %v3701_v59, %v1919_v61 }
 0x26e   :  { %1945 = vst [vmem:[#allocation8 + $0x58] sm:$0xff] %v1882_v28 }
 0x26f   :  { %1960 = vst [vmem:[#allocation8 + $0xd0] sm:$0xff] %v1920_v46 }
 0x273   :  { %v1921_v31 = vpop.f32.mrf.mxu3 }
 0x274   :  { %v1922_v41 = vadd.f32 %v3701_v59, %v1921_v31 }
 0x276   :  { %1961 = vst [vmem:[#allocation8 + $0xd8] sm:$0xff] %v1922_v41 }
 0x279   :  { %v1884_v51 = vpop.f32.mrf.mxu1 }
 0x27a   :  { %v1885_v54 = vadd.f32 %v3701_v59, %v1884_v51 }
 0x27c   :  { %1946 = vst [vmem:[#allocation8 + $0x60] sm:$0xff] %v1885_v54 }
 0x281   :  { %v1886_v10 = vpop.f32.mrf.mxu1 }
 0x282   :  { %v1887_v12 = vadd.f32 %v3701_v59, %v1886_v10 }
 0x284   :  { %1947 = vst [vmem:[#allocation8 + $0x68] sm:$0xff] %v1887_v12 }
 0x293   :  { %v1924_v11 = vpop.f32.mrf.mxu3 }
 0x294   :  { %v1925_v45 = vadd.f32 %v3701_v59, %v1924_v11  ;;  %v1889_v26 = vpop.f32.mrf.mxu1 }
 0x295   :  { %v1890_v37 = vadd.f32 %v3701_v59, %v1889_v26 }
 0x296   :  { %1962 = vst [vmem:[#allocation8 + $0xe0] sm:$0xff] %v1925_v45 }
 0x297   :  { %1948 = vst [vmem:[#allocation8 + $0x70] sm:$0xff] %v1890_v37 }
 0x29b   :  { %v1926_v30 = vpop.f32.mrf.mxu3 }
 0x29c   :  { %v1927_v13 = vadd.f32 %v3701_v59, %v1926_v30  ;;  %v1891_v52 = vpop.f32.mrf.mxu1 }
 0x29d   :  { %v1892_v43 = vadd.f32 %v3701_v59, %v1891_v52 }
 0x29e   :  { %1963 = vst [vmem:[#allocation8 + $0xe8] sm:$0xff] %v1927_v13 }
 0x29f   :  { %1949 = vst [vmem:[#allocation8 + $0x78] sm:$0xff] %v1892_v43 }
 0x2a7   :  { %v1929_v38 = vpop.f32.mrf.mxu3 }
 0x2a8   :  { %v1930_v55 = vadd.f32 %v3701_v59, %v1929_v38 }
 0x2aa   :  { %1964 = vst [vmem:[#allocation8 + $0xf0] sm:$0xff] %v1930_v55 }
 0x2af   :  { %v1931_v32 = vpop.f32.mrf.mxu3 }
 0x2b0   :  { %v1932_v33 = vadd.f32 %v3701_v59, %v1931_v32 }
 0x2b2   :  { %1965 = vst [vmem:[#allocation8 + $0xf8] sm:$0xff] %v1932_v33 }
 0x2b3   :  { %1978 = dma.vmem_to_hbm [thread:$0]  %s1971_s12, 4096, %s1973_s15, [#allocation4], %s2377_s16, %s2377_s16, %s2378_s17  }
 0x2b4   :  { %2369 = dma.done.wait [#allocation4], 4096  }
 0x2b5   :  { %2370 = vsyncadd [#allocation4], 4294963200 }
 0x2b6   :  { %1983 = vsyncpa [#allocation3], 1 }
 0x2b7   :  { %1984 = vsyncpa [#allocation6], 1 }
 0x2b8   :  { %1985 = vsyncpa [#allocation4], 1 }

// kernel: tpu_custom_call.1
= control target key start
LH: loop header
LB: loop body
LE: loop exit
PB: predicated region body
PF: predicated region fallthrough
CT: control target
= control target key end

     0   :  { %10 = vsyncpa [#allocation3], 0  ;;  %s3779_s0 = inlined_call_operand.hbm [shape: bf16[256,128], index: 0, kind: input, shape index: {}]   ;;  %s3780_s1 = inlined_call_operand.hbm [shape: bf16[128,128], index: 1, kind: input, shape index: {}]   ;;  %s3781_s2 = inlined_call_operand.vmem [shape: f32[1,128], index: 2, kind: input, shape index: {}]   ;;  %s3782_s3 = inlined_call_operand.hbm [shape: bf16[128,128], index: 3, kind: input, shape index: {}]   ;;  %s3783_s4 = inlined_call_operand.vmem [shape: f32[1,128], index: 4, kind: input, shape index: {}]   ;;  %s3784_s5 = inlined_call_operand.hbm [shape: f32[256,128], index: 5, kind: output, shape index: {}]  }
   0x1   :  { %11 = vsyncpa [#allocation6], 0 }
   0x2   :  { %12 = vsyncpa [#allocation4], 0  ;;  %s30_s20 = sshll.u32 %s3780_s1, 4  ;;  %s2371_s21 = smov [#allocation5]   ;;  %s31_s20 = int_to_ptr.hbm [resolvable:$true] %s30_s20 }
   0x3   :  { %s32_s22 = sshll.u32 %s2371_s21, 4  ;;  %s17_s25 = sshll.u32 %s3779_s0, 4  ;;  %s33_s22 = int_to_ptr.vmem [resolvable:$true] %s32_s22  ;;  %s18_s25 = int_to_ptr.hbm [resolvable:$true] %s17_s25 }
   0x4   :  { %s2372_s26 = smov 64   ;;  %s2373_s27 = smov 4  }
   0x5   :  { %38 = dma.hbm_to_vmem [thread:$0]  %s31_s20, 1024, %s33_s22, [#allocation6], %s2372_s26, %s2372_s26, %s2373_s27  }
   0x6   :  { %s2374_s28 = smov [#allocation2]   ;;  %s45_s7 = sshll.u32 %s3782_s3, 4  ;;  %s46_s7 = int_to_ptr.hbm [resolvable:$true] %s45_s7 }
   0x7   :  { %s19_s29 = sshll.u32 %s2374_s28, 4  ;;  %s2375_s1 = smov [#allocation7]   ;;  %s20_s29 = int_to_ptr.vmem [resolvable:$true] %s19_s29 }
   0x8   :  { %25 = dma.hbm_to_vmem [thread:$0]  %s18_s25, 2048, %s20_s29, [#allocation3], %s2372_s26, %s2372_s26, %s2373_s27  }
   0x9   :  { %s47_s8 = sshll.u32 %s2375_s1, 4  ;;  %s48_s8 = int_to_ptr.vmem [resolvable:$true] %s47_s8 }
   0xa   :  { %53 = dma.hbm_to_vmem [thread:$0]  %s46_s7, 1024, %s48_s8, [#allocation6], %s2372_s26, %s2372_s26, %s2373_s27  }
   0xb   :  { %2365 = dma.done.wait [#allocation3], 2048  }
   0xc   :  { %2366 = vsyncadd [#allocation3], 4294965248 }
   0xd   :  { %2367 = dma.done.wait [#allocation6], 2048  }
   0xe   :  { %2368 = vsyncadd [#allocation6], 4294965248  ;;  %v2169_v0 = vld [vmem:[#allocation5 + $0x38] sm:$0xff]  ;;  %v2168_v1 = vld [vmem:[#allocation5 + $0x30] sm:$0xff]  ;;  %s1972_s15 = sshll.u32 %s3784_s5, 4  ;;  %s2377_s16 = smov 128   ;;  %s1973_s15 = int_to_ptr.hbm [resolvable:$true] %s1972_s15 }
   0xf   :  { %264 = vmatpush.bf16.msra.mxu0 %v2169_v0  ;;  %2178 = vmatpush.bf16.msra.mxu2 %v2169_v0  ;;  %v2167_v2 = vld [vmem:[#allocation5 + $0x28] sm:$0xff]  ;;  %v2166_v3 = vld [vmem:[#allocation5 + $0x20] sm:$0xff]  ;;  %v2165_v4 = vld [vmem:[#allocation5 + $0x18] sm:$0xff]  ;;  %s2378_s17 = smov 8  }
  0x10   :  { %v2164_v5 = vld [vmem:[#allocation5 + $0x10] sm:$0xff]  ;;  %v2163_v6 = vld [vmem:[#allocation5 + $0x8] sm:$0xff]  ;;  %v2162_v7 = vld [vmem:[#allocation5] sm:$0xff] }
  0x11   :  { %v2146_v8 = vld [vmem:[#allocation2] sm:$0xff]  ;;  %v2147_v10 = vld [vmem:[#allocation2 + $0x8] sm:$0xff]  ;;  %v2148_v12 = vld [vmem:[#allocation2 + $0x10] sm:$0xff] }
  0x12   :  { %v2154_v9 = vld [vmem:[#allocation2 + $0x40] sm:$0xff]  ;;  %v2155_v11 = vld [vmem:[#allocation2 + $0x48] sm:$0xff]  ;;  %v2156_v13 = vld [vmem:[#allocation2 + $0x50] sm:$0xff] }
  0x13   :  { %265 = vmatpush.bf16.msra.mxu0 %v2168_v1  ;;  %2179 = vmatpush.bf16.msra.mxu2 %v2168_v1  ;;  %v2149_v14 = vld [vmem:[#allocation2 + $0x18] sm:$0xff]  ;;  %v2150_v16 = vld [vmem:[#allocation2 + $0x20] sm:$0xff]  ;;  %v2151_v18 = vld [vmem:[#allocation2 + $0x28] sm:$0xff] }
  0x14   :  { %v2157_v15 = vld [vmem:[#allocation2 + $0x58] sm:$0xff]  ;;  %v2158_v17 = vld [vmem:[#allocation2 + $0x60] sm:$0xff]  ;;  %v2159_v19 = vld [vmem:[#allocation2 + $0x68] sm:$0xff] }
  0x15   :  { %v2152_v20 = vld [vmem:[#allocation2 + $0x30] sm:$0xff]  ;;  %v2153_v22 = vld [vmem:[#allocation2 + $0x38] sm:$0xff]  ;;  %v2421_v24 = vld [vmem:[%s3781_s2] ss:$0 sm:$0xff] }
  0x16   :  { %v2160_v21 = vld [vmem:[#allocation2 + $0x70] sm:$0xff]  ;;  %v2161_v23 = vld [vmem:[#allocation2 + $0x78] sm:$0xff]  ;;  %v2175_v37 = vld [vmem:[#allocation7 + $0x28] sm:$0xff] }
  0x17   :  { %266 = vmatpush.bf16.msra.mxu0 %v2167_v2  ;;  %2180 = vmatpush.bf16.msra.mxu2 %v2167_v2  ;;  %v2177_v27 = vld [vmem:[#allocation7 + $0x38] sm:$0xff]  ;;  %v2176_v30 = vld [vmem:[#allocation7 + $0x30] sm:$0xff]  ;;  %v2174_v43 = vld [vmem:[#allocation7 + $0x20] sm:$0xff] }
  0x18   :  { %1845 = vmatpush.bf16.msra.mxu1 %v2177_v27  ;;  %2186 = vmatpush.bf16.msra.mxu3 %v2177_v27  ;;  %v2173_v51 = vld [vmem:[#allocation7 + $0x18] sm:$0xff]  ;;  %v2172_v59 = vld [vmem:[#allocation7 + $0x10] sm:$0xff] }
  0x1b   :  { %267 = vmatpush.bf16.msra.mxu0 %v2166_v3  ;;  %2181 = vmatpush.bf16.msra.mxu2 %v2166_v3 }
  0x1c   :  { %1846 = vmatpush.bf16.msra.mxu1 %v2176_v30  ;;  %2187 = vmatpush.bf16.msra.mxu3 %v2176_v30 }
  0x1f   :  { %268 = vmatpush.bf16.msra.mxu0 %v2165_v4  ;;  %2182 = vmatpush.bf16.msra.mxu2 %v2165_v4 }
  0x20   :  { %1847 = vmatpush.bf16.msra.mxu1 %v2175_v37  ;;  %2188 = vmatpush.bf16.msra.mxu3 %v2175_v37 }
  0x23   :  { %269 = vmatpush.bf16.msra.mxu0 %v2164_v5  ;;  %2183 = vmatpush.bf16.msra.mxu2 %v2164_v5 }
  0x24   :  { %1848 = vmatpush.bf16.msra.mxu1 %v2174_v43  ;;  %2189 = vmatpush.bf16.msra.mxu3 %v2174_v43 }
  0x27   :  { %270 = vmatpush.bf16.msra.mxu0 %v2163_v6  ;;  %2184 = vmatpush.bf16.msra.mxu2 %v2163_v6 }
  0x28   :  { %1849 = vmatpush.bf16.msra.mxu1 %v2173_v51  ;;  %2190 = vmatpush.bf16.msra.mxu3 %v2173_v51 }
  0x2b   :  { %271 = vmatpush.bf16.msra.mxu0 %v2162_v7  ;;  %2185 = vmatpush.bf16.msra.mxu2 %v2162_v7  ;;  %v2171_v7 = vld [vmem:[#allocation7 + $0x8] sm:$0xff] }
  0x2c   :  { %1850 = vmatpush.bf16.msra.mxu1 %v2172_v59  ;;  %2191 = vmatpush.bf16.msra.mxu3 %v2172_v59 }
  0x2e   :  { %272 = vmatmul.bf16.vlgmr.msra.gmra.mxu0 %v2146_v8  ;;  %312 = vmatmul.bf16.vlgmr.msra.gmra.mxu2 %v2154_v9 }
  0x30   :  { %1851 = vmatpush.bf16.msra.mxu1 %v2171_v7  ;;  %2192 = vmatpush.bf16.msra.mxu3 %v2171_v7 }
  0x3e   :  { %277 = vmatmul.bf16.gmra.mxu0 %v2147_v10  ;;  %317 = vmatmul.bf16.gmra.mxu2 %v2155_v11 }
  0x4e   :  { %282 = vmatmul.bf16.gmra.mxu0 %v2148_v12  ;;  %322 = vmatmul.bf16.gmra.mxu2 %v2156_v13 }
  0x5e   :  { %287 = vmatmul.bf16.gmra.mxu0 %v2149_v14  ;;  %327 = vmatmul.bf16.gmra.mxu2 %v2157_v15 }
  0x6e   :  { %292 = vmatmul.bf16.gmra.mxu0 %v2150_v16  ;;  %332 = vmatmul.bf16.gmra.mxu2 %v2158_v17  ;;  %v2170_v16 = vld [vmem:[#allocation7] sm:$0xff] }
  0x6f   :  { %1852 = vmatpush.bf16.msra.mxu1 %v2170_v16  ;;  %2193 = vmatpush.bf16.msra.mxu3 %v2170_v16 }
  0x7e   :  { %297 = vmatmul.bf16.gmra.mxu0 %v2151_v18  ;;  %337 = vmatmul.bf16.gmra.mxu2 %v2159_v19 }
  0x8e   :  { %302 = vmatmul.bf16.gmra.mxu0 %v2152_v20  ;;  %342 = vmatmul.bf16.gmra.mxu2 %v2160_v21 }
  0x9e   :  { %307 = vmatmul.bf16.gmra.mxu0 %v2153_v22  ;;  %347 = vmatmul.bf16.gmra.mxu2 %v2161_v23 }
  0xab   :  { %v273_v25 = vpop.f32.mrf.mxu0 }
  0xac   :  { %v2424_v26 = vadd.f32 %v2421_v24, %v273_v25 }
  0xae   :  { %v2427_v28 = vmul.f32 0.70710677, %v2424_v26 }
  0xb0   :  { %v417_v29 = vmul.f32 %v2427_v28, %v2427_v28 }
  0xb1   :  { %v313_v31 = vpop.f32.mrf.mxu2 }
  0xb2   :  { %v2432_v32 = vadd.f32 %v2421_v24, %v313_v31  ;;  %v2434_v33 = vmin.f32 %v417_v29, 16.0 }
  0xb3   :  { %v275_v34 = vpop.f32.mrf.mxu0 }
  0xb4   :  { %v2437_v35 = vmul.f32 0.70710677, %v2432_v32  ;;  %v2440_v36 = vadd.f32 %v2421_v24, %v275_v34  ;;  %v419_v38 = vmul.f32 2.1237322e-06, %v2434_v33  ;;  %v430_v41 = vmul.f32 3.8918573e-05, %v2434_v33 }
  0xb5   :  { %v2543_v7 = vmul.f32 0.5, %v2432_v32 }
  0xb6   :  { %v1057_v39 = vmul.f32 %v2437_v35, %v2437_v35  ;;  %v2446_v40 = vmul.f32 0.70710677, %v2440_v36  ;;  %v420_v45 = vadd.f32 0.00028619796, %v419_v38  ;;  %v431_v49 = vadd.f32 0.001143296, %v430_v41 }
  0xb7   :  { %3798 = vst [vmem:[#allocation12_spill] sm:$0xff] %v2543_v7  ;;  %v2555_v32 = vmul.f32 0.5, %v2440_v36 }
  0xb8   :  { %v2452_v46 = vmin.f32 %v1057_v39, 16.0  ;;  %v457_v48 = vmul.f32 %v2446_v40, %v2446_v40  ;;  %v421_v53 = vmul.f32 %v420_v45, %v2434_v33  ;;  %v432_v56 = vmul.f32 %v431_v49, %v2434_v33 }
  0xb9   :  { %v315_v42 = vpop.f32.mrf.mxu2  ;;  %3799 = vst [vmem:[#allocation13_spill] sm:$0xff] %v2555_v32 }
  0xba   :  { %v2450_v44 = vadd.f32 %v2421_v24, %v315_v42  ;;  %v1059_v54 = vmul.f32 2.1237322e-06, %v2452_v46  ;;  %v2464_v55 = vmin.f32 %v457_v48, 16.0  ;;  %v422_v62 = vadd.f32 0.0036580483, %v421_v53 }
  0xbb   :  { %v278_v47 = vpop.f32.mrf.mxu0  ;;  %v433_v2 = vadd.f32 0.014752088, %v432_v56 }
  0xbc   :  { %v2457_v50 = vadd.f32 %v2421_v24, %v278_v47  ;;  %v2460_v52 = vmul.f32 0.70710677, %v2450_v44  ;;  %v1060_v63 = vadd.f32 0.00028619796, %v1059_v54  ;;  %v459_v1 = vmul.f32 2.1237322e-06, %v2464_v55 }
  0xbd   :  { %v423_v8 = vmul.f32 %v422_v62, %v2434_v33  ;;  %v434_v13 = vmul.f32 %v433_v2, %v2434_v33  ;;  %v2527_v54 = vmul.f32 0.5, %v2424_v26 }
  0xbe   :  { %v2468_v57 = vmul.f32 0.70710677, %v2457_v50  ;;  %v1097_v60 = vmul.f32 %v2460_v52, %v2460_v52  ;;  %v1061_v9 = vmul.f32 %v1060_v63, %v2452_v46  ;;  %v460_v11 = vadd.f32 0.00028619796, %v459_v1 }
  0xbf   :  { %v424_v20 = vadd.f32 0.05243302, %v423_v8  ;;  %v435_v27 = vadd.f32 0.112945676, %v434_v13 }
  0xc0   :  { %v497_v3 = vmul.f32 %v2468_v57, %v2468_v57  ;;  %v2484_v6 = vmin.f32 %v1097_v60, 16.0  ;;  %v1062_v21 = vadd.f32 0.0036580483, %v1061_v9  ;;  %v461_v25 = vmul.f32 %v460_v11, %v2464_v55 }
  0xc1   :  { %v318_v58 = vpop.f32.mrf.mxu2  ;;  %v425_v38 = vmul.f32 %v424_v20, %v2434_v33  ;;  %v436_v53 = vmul.f32 %v435_v27, %v2434_v33  ;;  %v2558_v20 = vmul.f32 0.5, %v2450_v44 }
  0xc2   :  { %v2473_v61 = vadd.f32 %v2421_v24, %v318_v58  ;;  %v2494_v14 = vmin.f32 %v497_v3, 16.0  ;;  %v1099_v17 = vmul.f32 2.1237322e-06, %v2484_v6  ;;  %v1063_v39 = vmul.f32 %v1062_v21, %v2452_v46 }
  0xc3   :  { %v280_v0 = vpop.f32.mrf.mxu0  ;;  %v462_v43 = vadd.f32 0.0036580483, %v461_v25  ;;  %v426_v60 = vadd.f32 0.18741608, %v425_v38  ;;  %3800 = vst [vmem:[#allocation14_spill] sm:$0xff] %v2558_v20 }
  0xc4   :  { %v2479_v4 = vmul.f32 0.70710677, %v2473_v61  ;;  %v2482_v5 = vadd.f32 %v2421_v24, %v280_v0  ;;  %v499_v29 = vmul.f32 2.1237322e-06, %v2494_v14  ;;  %v1100_v34 = vadd.f32 0.00028619796, %v1099_v17 }
  0xc5   :  { %v1064_v62 = vadd.f32 0.05243302, %v1063_v39  ;;  %v463_v1 = vmul.f32 %v462_v43, %v2464_v55  ;;  %v427_v17 = vmul.f32 %v426_v60, %v2434_v33 }
  0xc6   :  { %v1137_v10 = vmul.f32 %v2479_v4, %v2479_v4  ;;  %v2491_v12 = vmul.f32 0.70710677, %v2482_v5  ;;  %v500_v47 = vadd.f32 0.00028619796, %v499_v29  ;;  %v1101_v56 = vmul.f32 %v1100_v34, %v2484_v6 }
  0xc7   :  { %v464_v21 = vadd.f32 0.05243302, %v463_v1  ;;  %v2564_v29 = vmul.f32 0.5, %v2457_v50 }
  0xc8   :  { %v537_v18 = vmul.f32 %v2491_v12, %v2491_v12  ;;  %v2502_v22 = vmin.f32 %v1137_v10, 16.0  ;;  %v501_v8 = vmul.f32 %v500_v47, %v2494_v14  ;;  %v437_v10 = vadd.f32 0.4994258, %v436_v53 }
  0xc9   :  { %v320_v15 = vpop.f32.mrf.mxu2  ;;  %v1102_v11 = vadd.f32 0.0036580483, %v1101_v56  ;;  %3801 = vst [vmem:[#allocation15_spill] sm:$0xff] %v2564_v29  ;;  %v428_v56 = vadd.f32 1.1283791, %v427_v17 }
  0xca   :  { %v2500_v19 = vadd.f32 %v2421_v24, %v320_v15  ;;  %v2506_v30 = vmin.f32 %v537_v18, 16.0  ;;  %v1139_v41 = vmul.f32 2.1237322e-06, %v2502_v22  ;;  %v1065_v18 = vmul.f32 %v1064_v62, %v2452_v46 }
  0xcb   :  { %v283_v23 = vpop.f32.mrf.mxu0  ;;  %v502_v34 = vadd.f32 0.0036580483, %v501_v8  ;;  %v438_v43 = vmul.f32 %v437_v10, %v2434_v33 }
  0xcc   :  { %v2509_v31 = vmul.f32 0.70710677, %v2500_v19  ;;  %v2512_v37 = vadd.f32 %v2421_v24, %v283_v23  ;;  %v539_v48 = vmul.f32 2.1237322e-06, %v2506_v30  ;;  %v1140_v63 = vadd.f32 0.00028619796, %v1139_v41 }
  0xcd   :  { %v1103_v41 = vmul.f32 %v1102_v11, %v2484_v6  ;;  %v1066_v47 = vadd.f32 0.18741608, %v1065_v18  ;;  %v2597_v11 = vmul.f32 0.5, %v2482_v5 }
  0xce   :  { %v1177_v42 = vmul.f32 %v2509_v31, %v2509_v31  ;;  %v2520_v45 = vmul.f32 0.70710677, %v2512_v37  ;;  %v540_v9 = vadd.f32 0.00028619796, %v539_v48  ;;  %v1141_v23 = vmul.f32 %v1140_v63, %v2502_v22 }
  0xcf   :  { %v2576_v48 = vmul.f32 0.5, %v2473_v61  ;;  %v503_v63 = vmul.f32 %v502_v34, %v2494_v14  ;;  %v1104_v1 = vadd.f32 0.05243302, %v1103_v41  ;;  %v1067_v10 = vmul.f32 %v1066_v47, %v2452_v46  ;;  %3803 = vst [vmem:[#allocation17_spill] sm:$0xff] %v2597_v11 }
  0xd0   :  { %v2523_v49 = vmin.f32 %v1177_v42, 16.0  ;;  %v577_v58 = vmul.f32 %v2520_v45, %v2520_v45  ;;  %v541_v38 = vmul.f32 %v540_v9, %v2506_v30  ;;  %v1142_v60 = vadd.f32 0.0036580483, %v1141_v23 }
  0xd1   :  { %v323_v51 = vpop.f32.mrf.mxu2  ;;  %3802 = vst [vmem:[#allocation16_spill] sm:$0xff] %v2576_v48  ;;  %v2593_v9 = vadd.f32 1.0, %v438_v43  ;;  %v504_v34 = vadd.f32 0.05243302, %v503_v63  ;;  %v1105_v41 = vmul.f32 %v1104_v1, %v2484_v6 }
  0xd2   :  { %v2533_v59 = vadd.f32 %v2421_v24, %v323_v51  ;;  %v1179_v2 = vmul.f32 2.1237322e-06, %v2523_v49  ;;  %v2537_v3 = vmin.f32 %v577_v58, 16.0  ;;  %v465_v58 = vmul.f32 %v464_v21, %v2464_v55 }
  0xd3   :  { %v285_v0 = vpop.f32.mrf.mxu0  ;;  %v1143_v18 = vmul.f32 %v1142_v60, %v2502_v22  ;;  %2204 = vrcp.f32 %v2593_v9  ;;  %v505_v63 = vmul.f32 %v504_v34, %v2494_v14  ;;  %vm445_vm0 = vweird.f32 %v2593_v9 }
  0xd4   :  { %v2540_v26 = vmul.f32 0.70710677, %v2533_v59  ;;  %v579_v13 = vmul.f32 2.1237322e-06, %v2537_v3  ;;  %v2550_v16 = vadd.f32 %v2421_v24, %v285_v0  ;;  %v1180_v25 = vadd.f32 0.00028619796, %v1179_v2 }
  0xd5   :  { %v542_v0 = vadd.f32 0.0036580483, %v541_v38  ;;  %v466_v17 = vadd.f32 0.18741608, %v465_v58  ;;  %v1144_v60 = vadd.f32 0.05243302, %v1143_v18 }
  0xd6   :  { %v1217_v15 = vmul.f32 %v2540_v26, %v2540_v26  ;;  %v2568_v39 = vmul.f32 0.70710677, %v2550_v16  ;;  %v580_v44 = vadd.f32 0.00028619796, %v579_v13  ;;  %v1181_v62 = vmul.f32 %v1180_v25, %v2523_v49 }
  0xd7   :  { %v2604_v25 = vmul.f32 %v428_v56, %v2427_v28  ;;  %v543_v38 = vmul.f32 %v542_v0, %v2506_v30  ;;  %v1068_v56 = vadd.f32 1.1283791, %v1067_v10  ;;  %v467_v58 = vmul.f32 %v466_v17, %v2464_v55 }
  0xd8   :  { %v2561_v27 = vmin.f32 %v1217_v15, 16.0  ;;  %v617_v51 = vmul.f32 %v2568_v39, %v2568_v39  ;;  %v581_v2 = vmul.f32 %v580_v44, %v2537_v3  ;;  %v1182_v21 = vadd.f32 0.0036580483, %v1181_v62 }
  0xd9   :  { %v325_v36 = vpop.f32.mrf.mxu2  ;;  %v544_v0 = vadd.f32 0.05243302, %v543_v38  ;;  %v2634_v17 = vmul.f32 0.5, %v2500_v19  ;;  %v2638_v38 = vpop.eup %2204  ;;  %v506_v48 = vadd.f32 0.18741608, %v505_v63 }
  0xda   :  { %v2572_v42 = vadd.f32 %v2421_v24, %v325_v36  ;;  %v1219_v50 = vmul.f32 2.1237322e-06, %v2561_v27  ;;  %v2584_v33 = vmin.f32 %v617_v51, 16.0  ;;  %v582_v44 = vadd.f32 0.0036580483, %v581_v2 }
  0xdb   :  { %v288_v53 = vpop.f32.mrf.mxu0  ;;  %v1183_v62 = vmul.f32 %v1182_v21, %v2523_v49  ;;  %3806 = vst [vmem:[#allocation20_spill] sm:$0xff] %v2634_v17  ;;  %v545_v19 = vmul.f32 %v544_v0, %v2506_v30  ;;  %vm446_vm1 = vweird.f32 %v2638_v38 }
  0xdc   :  { %v2587_v61 = vadd.f32 %v2421_v24, %v288_v53  ;;  %v2591_v8 = vmul.f32 0.70710677, %v2572_v42  ;;  %v1220_v13 = vadd.f32 0.00028619796, %v1219_v50  ;;  %v619_v15 = vmul.f32 2.1237322e-06, %v2584_v33  ;;  %vm2768_vm2 = vmor %vm445_vm0, %vm446_vm1 }
  0xde   :  { %v1257_v23 = vmul.f32 %v2591_v8, %v2591_v8  ;;  %v2608_v36 = vmul.f32 0.70710677, %v2587_v61  ;;  %v1221_v47 = vmul.f32 %v1220_v13, %v2561_v27  ;;  %v620_v50 = vadd.f32 0.00028619796, %v619_v15 }
  0xdf   :  { %v1106_v13 = vadd.f32 0.18741608, %v1105_v41  ;;  %v583_v15 = vmul.f32 %v582_v44, %v2537_v3  ;;  %v1145_v41 = vmul.f32 %v1144_v60, %v2502_v22 }
  0xe0   :  { %3804 = vst [vmem:[#allocation18_spill] sm:$0xff] %v2608_v36  ;;  %v2611_v43 = vmin.f32 %v1257_v23, 16.0  ;;  %v657_v28 = vmul.f32 %v2608_v36, %v2608_v36  ;;  %v1222_v18 = vadd.f32 0.0036580483, %v1221_v47  ;;  %v621_v21 = vmul.f32 %v620_v50, %v2584_v33 }
  0xe1   :  { %v328_v5 = vpop.f32.mrf.mxu2  ;;  %v1107_v17 = vmul.f32 %v1106_v13, %v2484_v6  ;;  %v584_v11 = vadd.f32 0.05243302, %v583_v15  ;;  %v1146_v0 = vadd.f32 0.18741608, %v1145_v41  ;;  %v507_v15 = vmul.f32 %v506_v48, %v2494_v14 }
  0xe2   :  { %v2618_v51 = vadd.f32 %v2421_v24, %v328_v5  ;;  %v2623_v1 = vmin.f32 %v657_v28, 16.0  ;;  %v1259_v23 = vmul.f32 2.1237322e-06, %v2611_v43  ;;  %v468_v5 = vadd.f32 1.1283791, %v467_v58 }
  0xe3   :  { %v290_v53 = vpop.f32.mrf.mxu0  ;;  %v1184_v28 = vadd.f32 0.05243302, %v1183_v62  ;;  %v1223_v60 = vmul.f32 %v1222_v18, %v2561_v27  ;;  %v622_v62 = vadd.f32 0.0036580483, %v621_v21  ;;  %v2665_v18 = vmul.f32 0.5, %v2512_v37 }
  0xe4   :  { %v2626_v2 = vadd.f32 %v2421_v24, %v290_v53  ;;  %v2631_v10 = vmul.f32 0.70710677, %v2618_v51  ;;  %v659_v34 = vmul.f32 2.1237322e-06, %v2623_v1  ;;  %v2644_v53 = vmul.f32 %v1068_v56, %v2437_v35 }
  0xe5   :  { %v1260_v58 = vadd.f32 0.00028619796, %v1259_v23  ;;  %v2658_v63 = vmul.f32 %v468_v5, %v2446_v40  ;;  %v1185_v7 = vmul.f32 %v1184_v28, %v2523_v49  ;;  %v546_v23 = vadd.f32 0.18741608, %v545_v19  ;;  %3808 = vst [vmem:[#allocation22_spill] sm:$0xff] %v2665_v18 }
  0xe6   :  { %3805 = vst [vmem:[#allocation19_spill] sm:$0xff] %v2631_v10  ;;  %v1297_v44 = vmul.f32 %v2631_v10, %v2631_v10  ;;  %v2648_v47 = vmul.f32 0.70710677, %v2626_v2  ;;  %v660_v29 = vadd.f32 0.00028619796, %v659_v34  ;;  %v585_v34 = vmul.f32 %v584_v11, %v2537_v3 }
  0xe7   :  { %v1261_v40 = vmul.f32 %v1260_v58, %v2611_v43  ;;  %v1108_v28 = vadd.f32 1.1283791, %v1107_v17  ;;  %v623_v48 = vmul.f32 %v622_v62, %v2584_v33  ;;  %v1147_v37 = vmul.f32 %v1146_v0, %v2502_v22 }
  0xe8   :  { %3807 = vst [vmem:[#allocation21_spill] sm:$0xff] %v2648_v47  ;;  %v2652_v20 = vmin.f32 %v1297_v44, 16.0  ;;  %v697_v13 = vmul.f32 %v2648_v47, %v2648_v47  ;;  %v661_v5 = vmul.f32 %v660_v29, %v2623_v1  ;;  %v1224_v44 = vadd.f32 0.05243302, %v1223_v60 }
  0xe9   :  { %v330_v50 = vpop.f32.mrf.mxu2  ;;  %v508_v58 = vadd.f32 1.1283791, %v507_v15  ;;  %v2684_v29 = vmul.f32 0.5, %v2533_v59  ;;  %v441_v17 = vmul.f32 %v2638_v38, %v2593_v9  ;;  %v547_v60 = vmul.f32 %v546_v23, %v2506_v30 }
  0xea   :  { %v2655_v35 = vadd.f32 %v2421_v24, %v330_v50  ;;  %v1299_v19 = vmul.f32 2.1237322e-06, %v2652_v20  ;;  %v1186_v50 = vadd.f32 0.18741608, %v1185_v7  ;;  %v586_v62 = vadd.f32 0.18741608, %v585_v34 }
  0xeb   :  { %v293_v56 = vpop.f32.mrf.mxu0  ;;  %3810 = vst [vmem:[#allocation24_spill] sm:$0xff] %v2684_v29  ;;  %v1262_v0 = vadd.f32 0.0036580483, %v1261_v40  ;;  %v662_v7 = vadd.f32 0.0036580483, %v661_v5  ;;  %v2701_v32 = vmul.f32 %v508_v58, %v2468_v57  ;;  %v2704_v23 = vmul.f32 0.5, %v2550_v16 }
  0xec   :  { %v2668_v21 = vadd.f32 %v2421_v24, %v293_v56  ;;  %v2674_v41 = vmul.f32 0.70710677, %v2655_v35  ;;  %v2679_v56 = vmin.f32 %v697_v13, 16.0  ;;  %v2693_v13 = vmul.f32 %v1108_v28, %v2460_v52 }
  0xed   :  { %v624_v15 = vadd.f32 0.05243302, %v623_v48  ;;  %v1300_v47 = vadd.f32 0.00028619796, %v1299_v19  ;;  %v1148_v59 = vadd.f32 1.1283791, %v1147_v37  ;;  %v1187_v29 = vmul.f32 %v1186_v50, %v2523_v49 }
  0xee   :  { %3809 = vst [vmem:[#allocation23_spill] sm:$0xff] %v2674_v41  ;;  %v1337_v11 = vmul.f32 %v2674_v41, %v2674_v41  ;;  %v2687_v18 = vmul.f32 0.70710677, %v2668_v21  ;;  %v1225_v41 = vmul.f32 %v1224_v44, %v2561_v27  ;;  %v699_v10 = vmul.f32 2.1237322e-06, %v2679_v56 }
  0xef   :  { %v442_v34 = vsub.f32 1.0, %v441_v17  ;;  %v548_v40 = vadd.f32 1.1283791, %v547_v60  ;;  %v587_v5 = vmul.f32 %v586_v62, %v2537_v3  ;;  %v1263_v28 = vmul.f32 %v1262_v0, %v2611_v43 }
  0xf0   :  { %v2698_v36 = vmin.f32 %v1337_v11, 16.0  ;;  %v737_v52 = vmul.f32 %v2687_v18, %v2687_v18  ;;  %v663_v44 = vmul.f32 %v662_v7, %v2623_v1  ;;  %v1226_v48 = vadd.f32 0.18741608, %v1225_v41 }
  0xf1   :  { %v625_v19 = vmul.f32 %v624_v15, %v2584_v33  ;;  %v2713_v57 = vmul.f32 0.5, %v2572_v42  ;;  %v1301_v16 = vmul.f32 %v1300_v47, %v2652_v20  ;;  %v2717_v37 = vmul.f32 %v1148_v59, %v2479_v4 }
  0xf2   :  { %v1188_v50 = vadd.f32 1.1283791, %v1187_v29  ;;  %v700_v11 = vadd.f32 0.00028619796, %v699_v10  ;;  %v1339_v58 = vmul.f32 2.1237322e-06, %v2698_v36  ;;  %v443_v42 = vmul.f32 %v2638_v38, %v442_v34 }
  0xf3   :  { %3811 = vst [vmem:[#allocation25_spill] sm:$0xff] %v2713_v57  ;;  %v2721_v17 = vmul.f32 0.5, %v2587_v61  ;;  %v2724_v60 = vmul.f32 0.5, %v2618_v51  ;;  %v2726_v41 = vmin.f32 %v737_v52, 16.0  ;;  %v2730_v62 = vmul.f32 %v548_v40, %v2491_v12 }
  0xf4   :  { %v588_v47 = vadd.f32 1.1283791, %v587_v5  ;;  %v1264_v4 = vadd.f32 0.05243302, %v1263_v28  ;;  %v664_v0 = vadd.f32 0.05243302, %v663_v44  ;;  %v1227_v10 = vmul.f32 %v1226_v48, %v2561_v27 }
  0xf5   :  { %3812 = vst [vmem:[#allocation26_spill] sm:$0xff] %v2721_v17  ;;  %v626_v29 = vadd.f32 0.18741608, %v625_v19  ;;  %v1302_v7 = vadd.f32 0.0036580483, %v1301_v16  ;;  %v2735_v15 = vmul.f32 %v1188_v50, %v2509_v31  ;;  %v701_v51 = vmul.f32 %v700_v11, %v2679_v56 }
  0xf6   :  { %3813 = vst [vmem:[#allocation27_spill] sm:$0xff] %v2724_v60  ;;  %v470_v61 = vmul.f32 3.8918573e-05, %v2464_v55  ;;  %v1340_v59 = vadd.f32 0.00028619796, %v1339_v58  ;;  %v2740_v12 = vmul.f32 0.5, %v2626_v2  ;;  %v444_v40 = vadd.f32 %v2638_v38, %v443_v42 }
  0xf7   :  { %v1070_v52 = vmul.f32 3.8918573e-05, %v2452_v46  ;;  %v739_v34 = vmul.f32 2.1237322e-06, %v2726_v41  ;;  %v2745_v28 = vmul.f32 %v588_v47, %v2520_v45  ;;  %v1265_v44 = vmul.f32 %v1264_v4, %v2611_v43 }
  0xf8   :  { %3814 = vst [vmem:[#allocation28_spill] sm:$0xff] %v2740_v12  ;;  %v471_v5 = vadd.f32 0.001143296, %v470_v61  ;;  %v665_v31 = vmul.f32 %v664_v0, %v2623_v1  ;;  %v2749_v19 = vadd.f32 1.1283791, %v1227_v10  ;;  %v627_v16 = vmul.f32 %v626_v29, %v2584_v33 }
  0xf9   :  { %v1071_v48 = vadd.f32 0.001143296, %v1070_v52  ;;  %v1303_v2 = vmul.f32 %v1302_v7, %v2652_v20  ;;  %v702_v11 = vadd.f32 0.0036580483, %v701_v51  ;;  %v1341_v58 = vmul.f32 %v1340_v59, %v2698_v36 }
  0xfa   :  { %v472_v50 = vmul.f32 %v471_v5, %v2464_v55  ;;  %v1110_v45 = vmul.f32 3.8918573e-05, %v2484_v6  ;;  %v740_v47 = vadd.f32 0.00028619796, %v739_v34  ;;  %v449_v4 = vand.u32 2147483647, %v2593_v9 }
  0xfb   :  { %v1072_v42 = vmul.f32 %v1071_v48, %v2452_v46  ;;  %v1266_v10 = vadd.f32 0.18741608, %v1265_v44  ;;  %v666_v61 = vadd.f32 0.18741608, %v665_v31  ;;  %v1304_v7 = vadd.f32 0.05243302, %v1303_v2 }
  0xfc   :  { %v473_v0 = vadd.f32 0.014752088, %v472_v50  ;;  %v451_v51 = vand.u32 2147483648, %v2593_v9  ;;  %v1111_v52 = vadd.f32 0.001143296, %v1110_v45  ;;  %v703_v5 = vmul.f32 %v702_v11, %v2679_v56 }
  0xfd   :  { %v1073_v29 = vadd.f32 0.014752088, %v1072_v42  ;;  %v1342_v48 = vadd.f32 0.0036580483, %v1341_v58  ;;  %v510_v60 = vmul.f32 3.8918573e-05, %v2494_v14  ;;  %v741_v50 = vmul.f32 %v740_v47, %v2726_v41 }
  0xfe   :  { %v474_v59 = vmul.f32 %v473_v0, %v2464_v55  ;;  %vm2772_vm3 = vcmp.eq.f32.partialorder %v449_v4, 8.507059e+37  ;;  %v1112_v11 = vmul.f32 %v1111_v52, %v2484_v6  ;;  %v448_v58 = vsel %vm2768_vm2, %v2638_v38, %v444_v40 }
  0xff   :  { %v1074_v34 = vmul.f32 %v1073_v29, %v2452_v46  ;;  %v511_v45 = vadd.f32 0.001143296, %v510_v60  ;;  %v550_v47 = vmul.f32 3.8918573e-05, %v2506_v30  ;;  %v1305_v9 = vmul.f32 %v1304_v7, %v2652_v20 }
 0x100   :  { %v475_v2 = vadd.f32 0.112945676, %v474_v59  ;;  %v452_v0 = vor.u32 1.1754944e-38, %v451_v51  ;;  %v1113_v4 = vadd.f32 0.014752088, %v1112_v11  ;;  %v1343_v17 = vmul.f32 %v1342_v48, %v2698_v36  ;;  %v333_v51 = vpop.f32.mrf.mxu2 }
 0x101   :  { %v1075_v42 = vadd.f32 0.112945676, %v1074_v34  ;;  %v704_v12 = vadd.f32 0.05243302, %v703_v5  ;;  %v512_v52 = vmul.f32 %v511_v45, %v2494_v14  ;;  %v742_v57 = vadd.f32 0.0036580483, %v741_v50 }
 0x102   :  { %v476_v29 = vmul.f32 %v475_v2, %v2464_v55  ;;  %v453_v38 = vsel %vm2772_vm3, %v452_v0, %v448_v58  ;;  %v1114_v40 = vmul.f32 %v1113_v4, %v2484_v6  ;;  %v1267_v7 = vmul.f32 %v1266_v10, %v2611_v43 }
 0x103   :  { %v1076_v59 = vmul.f32 %v1075_v42, %v2452_v46  ;;  %v513_v44 = vadd.f32 0.014752088, %v512_v52  ;;  %v551_v2 = vadd.f32 0.001143296, %v550_v47  ;;  %v1306_v5 = vadd.f32 0.18741608, %v1305_v9 }
 0x104   :  { %v477_v60 = vadd.f32 0.4994258, %v476_v29  ;;  %v2792_v11 = vadd.f32 %v2421_v24, %v333_v51  ;;  %v1115_v42 = vadd.f32 0.112945676, %v1114_v40  ;;  %v1344_v50 = vadd.f32 0.05243302, %v1343_v17  ;;  %v295_v51 = vpop.f32.mrf.mxu0 }
 0x105   :  { %v1077_v34 = vadd.f32 0.4994258, %v1076_v59  ;;  %v454_v31 = vmul.f32 %v453_v38, %v2604_v25  ;;  %v514_v45 = vmul.f32 %v513_v44, %v2494_v14  ;;  %v743_v10 = vmul.f32 %v742_v57, %v2726_v41 }
 0x106   :  { %v478_v48 = vmul.f32 %v477_v60, %v2464_v55  ;;  %v2801_v47 = vmul.f32 0.70710677, %v2792_v11  ;;  %v1116_v55 = vmul.f32 %v1115_v42, %v2484_v6  ;;  %v628_v9 = vadd.f32 1.1283791, %v627_v16 }
 0x107   :  { %v1078_v58 = vmul.f32 %v1077_v34, %v2452_v46  ;;  %v515_v4 = vadd.f32 0.112945676, %v514_v45  ;;  %v552_v17 = vmul.f32 %v551_v2, %v2506_v30  ;;  %v1268_v25 = vadd.f32 1.1283791, %v1267_v7 }
 0x108   :  { %v2798_v0 = vadd.f32 1.0, %v478_v48  ;;  %v667_v46 = vmul.f32 %v666_v61, %v2623_v1  ;;  %v705_v59 = vmul.f32 %v704_v12, %v2679_v56  ;;  %v1307_v57 = vmul.f32 %v1306_v5, %v2652_v20 }
 0x109   :  { %v2804_v29 = vadd.f32 1.0, %v1078_v58  ;;  %v1345_v52 = vmul.f32 %v1344_v50, %v2698_v36  ;;  %v1377_v38 = vmul.f32 %v2801_v47, %v2801_v47  ;;  %v2816_v16 = vmul.f32 0.5, %v2655_v35 }
 0x10a   :  { %2206 = vrcp.f32 %v2798_v0  ;;  %v744_v60 = vadd.f32 0.05243302, %v743_v10  ;;  %v2082_v40 = vclamps-f32 %v454_v31, 1.0  ;;  %v1117_v7 = vadd.f32 0.4994258, %v1116_v55 }
 0x10b   :  { %2208 = vrcp.f32 %v2804_v29  ;;  %3819 = vst [vmem:[#allocation29_spill] sm:$0xff] %v2816_v16  ;;  %v2820_v12 = vmul.f32 %v2749_v19, %v2540_v26  ;;  %v2823_v61 = vmul.f32 0.5, %v2668_v21  ;;  %v516_v34 = vmul.f32 %v515_v4, %v2494_v14 }
 0x10c   :  { %v553_v44 = vadd.f32 0.014752088, %v552_v17  ;;  %v2827_v2 = vmul.f32 %v628_v9, %v2568_v39  ;;  %v2829_v5 = vadd.f32 1.1283791, %v667_v46  ;;  %v2831_v35 = vmin.f32 %v1377_v38, 16.0 }
 0x10d   :  { %3820 = vst [vmem:[#allocation30_spill] sm:$0xff] %v2820_v12  ;;  %v1118_v48 = vmul.f32 %v1117_v7, %v2484_v6  ;;  %v2835_v42 = vmul.f32 %v1268_v25, %v2591_v8  ;;  %v2837_v26 = vadd.f32 1.1283791, %v1307_v57  ;;  %v2839_v21 = vadd.f32 0.18741608, %v705_v59  ;;  %v335_v6 = vpop.f32.mrf.mxu2 }
 0x10e   :  { %3821 = vst [vmem:[#allocation31_spill] sm:$0xff] %v2823_v61  ;;  %v2841_v19 = vadd.f32 0.18741608, %v1345_v52  ;;  %v2844_v31 = vmul.f32 %v744_v60, %v2726_v41  ;;  %v1697_v39 = vadd.f32 1.0, %v2082_v40  ;;  %v2849_v45 = vadd.f32 %v2421_v24, %v295_v51 }
 0x10f   :  { %3822 = vst [vmem:[#allocation32_spill] sm:$0xff] %v2835_v42  ;;  %v2846_v58 = vadd.f32 1.0, %v1118_v48  ;;  %v517_v55 = vadd.f32 0.4994258, %v516_v34  ;;  %v554_v9 = vmul.f32 %v553_v44, %v2506_v30  ;;  %v1150_v4 = vmul.f32 3.8918573e-05, %v2502_v22 }
 0x110   :  { %v2207_v50 = vpop.eup %2206  ;;  %v489_v17 = vand.u32 2147483647, %v2798_v0  ;;  %v1379_v25 = vmul.f32 2.1237322e-06, %v2831_v35  ;;  %v491_v57 = vand.u32 2147483648, %v2798_v0  ;;  %v2861_v38 = vadd.f32 %v2421_v24, %v335_v6 }
 0x111   :  { %v2209_v10 = vpop.eup %2208  ;;  %v481_v8 = vmul.f32 %v2207_v50, %v2798_v0  ;;  %2210 = vrcp.f32 %v2846_v58  ;;  %v1089_v52 = vand.u32 2147483647, %v2804_v29  ;;  %vm485_vm4 = vweird.f32 %v2798_v0 }
 0x112   :  { %v1081_v46 = vmul.f32 %v2209_v10, %v2804_v29  ;;  %v1091_v40 = vand.u32 2147483648, %v2804_v29  ;;  %v2866_v7 = vmul.f32 0.70710677, %v2849_v45  ;;  %vm486_vm5 = vweird.f32 %v2207_v50 }
 0x113   :  { %v482_v59 = vsub.f32 1.0, %v481_v8  ;;  %vm1085_vm6 = vweird.f32 %v2804_v29  ;;  %v518_v34 = vmul.f32 %v517_v55, %v2494_v14  ;;  %vm2870_vm7 = vcmp.eq.f32.partialorder %v489_v17, 8.507059e+37  ;;  %v298_v8 = vpop.f32.mrf.mxu0  ;;  %vm487_vm10 = vmor %vm485_vm4, %vm486_vm5 }
 0x114   :  { %v1082_v60 = vsub.f32 1.0, %v1081_v46  ;;  %v1380_v48 = vadd.f32 0.00028619796, %v1379_v25  ;;  %vm1086_vm8 = vweird.f32 %v2209_v10  ;;  %v492_v61 = vor.u32 1.1754944e-38, %v491_v57 }
 0x115   :  { %v483_v51 = vmul.f32 %v2207_v50, %v482_v59  ;;  %vm2874_vm9 = vcmp.eq.f32.partialorder %v1089_v52, 8.507059e+37  ;;  %v2879_v59 = vmul.f32 0.70710677, %v2861_v38  ;;  %v1092_v55 = vor.u32 1.1754944e-38, %v1091_v40  ;;  %vm1087_vm11 = vmor %vm1085_vm6, %vm1086_vm8 }
 0x116   :  { %v1083_v6 = vmul.f32 %v2209_v10, %v1082_v60  ;;  %v777_v17 = vmul.f32 %v2866_v7, %v2866_v7  ;;  %v555_v25 = vadd.f32 0.112945676, %v554_v9  ;;  %v2889_v52 = vadd.f32 %v2421_v24, %v298_v8 }
 0x117   :  { %v484_v46 = vadd.f32 %v2207_v50, %v483_v51  ;;  %v2211_v42 = vpop.eup %2210  ;;  %v2891_v51 = vadd.f32 1.0, %v518_v34  ;;  %v1381_v40 = vmul.f32 %v1380_v48, %v2831_v35  ;;  %v1129_v12 = vand.u32 2147483647, %v2846_v58 }
 0x118   :  { %v1084_v14 = vadd.f32 %v2209_v10, %v1083_v6  ;;  %v1121_v57 = vmul.f32 %v2211_v42, %v2846_v58  ;;  %v1417_v8 = vmul.f32 %v2879_v59, %v2879_v59  ;;  %vm1126_vm12 = vweird.f32 %v2211_v42 }
 0x119   :  { %v488_v60 = vsel %vm487_vm10, %v2207_v50, %v484_v46  ;;  %v1131_v44 = vand.u32 2147483648, %v2846_v58  ;;  %v2907_v46 = vmul.f32 0.70710677, %v2889_v52  ;;  %2212 = vrcp.f32 %v2891_v51 }
 0x11a   :  { %v493_v0 = vsel %vm2870_vm7, %v492_v61, %v488_v60  ;;  %v1088_v6 = vsel %vm1087_vm11, %v2209_v10, %v1084_v14  ;;  %v1122_v9 = vsub.f32 1.0, %v1121_v57  ;;  %v2904_v61 = vmin.f32 %v777_v17, 16.0 }
 0x11b   :  { %v494_v50 = vmul.f32 %v493_v0, %v2658_v63  ;;  %v1093_v29 = vsel %vm2874_vm9, %v1092_v55, %v1088_v6  ;;  %v1729_v63 = vmul.f32 %v1697_v39, %v2527_v54  ;;  %v1382_v16 = vadd.f32 0.0036580483, %v1381_v40 }
 0x11c   :  { %v1094_v34 = vmul.f32 %v1093_v29, %v2644_v53  ;;  %v1123_v10 = vmul.f32 %v2211_v42, %v1122_v9  ;;  %v556_v14 = vmul.f32 %v555_v25, %v2506_v30  ;;  %v1151_v55 = vadd.f32 0.001143296, %v1150_v4 }
 0x11d   :  { %v2083_v48 = vclamps-f32 %v494_v50, 1.0  ;;  %vm1125_vm13 = vweird.f32 %v2846_v58  ;;  %v2913_v57 = vmin.f32 %v1417_v8, 16.0  ;;  %v746_v17 = vadd.f32 0.18741608, %v2844_v31  ;;  %v3828_v50 = vld [vmem:[#allocation13_spill] sm:$0xff] }
 0x11e   :  { %v1124_v53 = vadd.f32 %v2211_v42, %v1123_v10  ;;  %vm1127_vm14 = vmor %vm1125_vm13, %vm1126_vm12  ;;  %vm1130_vm15 = vcmp.eq.f32.partialorder %v1129_v12, 8.507059e+37  ;;  %v1132_v0 = vor.u32 1.1754944e-38, %v1131_v44  ;;  %v779_v6 = vmul.f32 2.1237322e-06, %v2904_v61 }
 0x11f   :  { %v1698_v60 = vadd.f32 1.0, %v2083_v48  ;;  %3827 = vst [vmem:[#allocation33_spill] sm:$0xff] %v2913_v57  ;;  %v2098_v39 = vclamps-f32 %v1094_v34, 1.0  ;;  %v817_v4 = vmul.f32 %v2907_v46, %v2907_v46  ;;  %v1383_v25 = vmul.f32 %v1382_v16, %v2831_v35  ;;  %v2923_v31 = vpop.eup %2212 }
 0x120   :  { %v1128_v40 = vsel %vm1127_vm14, %v2211_v42, %v1124_v53  ;;  %v557_v29 = vadd.f32 0.4994258, %v556_v14  ;;  %v1152_v9 = vmul.f32 %v1151_v55, %v2502_v22  ;;  %v707_v12 = vmul.f32 %v2839_v21, %v2679_v56  ;;  %v3829_v42 = vld [vmem:[#allocation18_spill] sm:$0xff] }
 0x121   :  { %v1730_v54 = vmul.f32 %v1698_v60, %v3828_v50  ;;  %v1133_v58 = vsel %vm1130_vm15, %v1132_v0, %v1128_v40  ;;  %v1419_v34 = vmul.f32 2.1237322e-06, %v2913_v57  ;;  %v2931_v48 = vmul.f32 %v2829_v5, %v3829_v42 }
 0x122   :  { %v1134_v44 = vmul.f32 %v1133_v58, %v2693_v13  ;;  %v1347_v10 = vmul.f32 %v2841_v19, %v2698_v36  ;;  %v747_v16 = vmul.f32 %v746_v17, %v2726_v41  ;;  %v521_v14 = vmul.f32 %v2923_v31, %v2891_v51  ;;  %v338_v13 = vpop.f32.mrf.mxu2 }
 0x123   :  { %v1761_v8 = vpack.c.bf16 %v1730_v54, %v1729_v63  ;;  %v1713_v21 = vadd.f32 1.0, %v2098_v39  ;;  %v780_v63 = vadd.f32 0.00028619796, %v779_v6  ;;  %v2938_v60 = vmin.f32 %v817_v4, 16.0  ;;  %v3830_v54 = vld [vmem:[#allocation19_spill] sm:$0xff]  ;;  %v3832_v4 = vld [vmem:[#allocation12_spill] sm:$0xff] }
 0x124   :  { %v2099_v55 = vclamps-f32 %v1134_v44, 1.0  ;;  %v1384_v53 = vadd.f32 0.05243302, %v1383_v25  ;;  %v522_v0 = vsub.f32 1.0, %v521_v14  ;;  %v558_v5 = vmul.f32 %v557_v29, %v2506_v30  ;;  %v3833_v44 = vld [vmem:[#allocation14_spill] sm:$0xff] }
 0x125   :  { %1853 = vmatmul.bf16.vlgmr.msra.gmra.mxu1 %v1761_v8  ;;  %v1153_v50 = vadd.f32 0.014752088, %v1152_v9  ;;  %v2943_v19 = vmul.f32 %v2837_v26, %v3830_v54  ;;  %v708_v17 = vadd.f32 1.1283791, %v707_v12  ;;  %v1420_v58 = vadd.f32 0.00028619796, %v1419_v34 }
 0x126   :  { %v1714_v40 = vadd.f32 1.0, %v2099_v55  ;;  %v1348_v42 = vadd.f32 1.1283791, %v1347_v10  ;;  %v523_v8 = vmul.f32 %v2923_v31, %v522_v0  ;;  %v2946_v39 = vadd.f32 1.0, %v558_v5  ;;  %v3834_v55 = vld [vmem:[#allocation21_spill] sm:$0xff] }
 0x127   :  { %3831 = vst [vmem:[#allocation13_spill] sm:$0xff] %v2943_v19  ;;  %v2949_v6 = vadd.f32 %v2421_v24, %v338_v13  ;;  %v1745_v25 = vmul.f32 %v1713_v21, %v3832_v4  ;;  %v781_v29 = vmul.f32 %v780_v63, %v2904_v61  ;;  %v819_v26 = vmul.f32 2.1237322e-06, %v2938_v60  ;;  %v3836_v63 = vld [vmem:[#allocation23_spill] sm:$0xff] }
 0x128   :  { %v1746_v30 = vmul.f32 %v1714_v40, %v3833_v44  ;;  %v748_v9 = vadd.f32 1.1283791, %v747_v16  ;;  %v1385_v12 = vmul.f32 %v1384_v53, %v2831_v35  ;;  %2214 = vrcp.f32 %v2946_v39 }
 0x129   :  { %v1154_v34 = vmul.f32 %v1153_v50, %v2502_v22  ;;  %v1421_v14 = vmul.f32 %v1420_v58, %v2913_v57  ;;  %v524_v24 = vadd.f32 %v2923_v31, %v523_v8  ;;  %vm526_vm0 = vweird.f32 %v2923_v31 }
 0x12a   :  { %v1769_v10 = vpack.c.bf16 %v1746_v30, %v1745_v25  ;;  %v2962_v21 = vmul.f32 %v708_v17, %v3834_v55  ;;  %v2965_v13 = vmul.f32 %v1348_v42, %v3836_v63  ;;  %v531_v16 = vand.u32 2147483648, %v2891_v51 }
 0x12b   :  { %v2969_v53 = vmul.f32 0.70710677, %v2949_v6  ;;  %v782_v0 = vadd.f32 0.0036580483, %v781_v29  ;;  %v820_v5 = vadd.f32 0.00028619796, %v819_v26  ;;  %vm525_vm1 = vweird.f32 %v2891_v51 }
 0x12c   :  { %3835 = vst [vmem:[#allocation18_spill] sm:$0xff] %v2962_v21  ;;  %1893 = vmatmul.bf16.vlgmr.msra.gmra.mxu3 %v1769_v10  ;;  %v529_v50 = vand.u32 2147483647, %v2891_v51  ;;  %v2974_v54 = vmul.f32 %v748_v9, %v2687_v18  ;;  %v2976_v17 = vadd.f32 0.18741608, %v1385_v12  ;;  %vm2978_vm2 = vmor %vm525_vm1, %vm526_vm0  ;;  %v532_v44 = vor.u32 1.1754944e-38, %v531_v16 }
 0x12d   :  { %3837 = vst [vmem:[#allocation19_spill] sm:$0xff] %v2965_v13  ;;  %v1155_v58 = vadd.f32 0.112945676, %v1154_v34  ;;  %v1190_v42 = vmul.f32 3.8918573e-05, %v2523_v49  ;;  %v528_v4 = vsel %vm2978_vm2, %v2923_v31, %v524_v24  ;;  %v1457_v30 = vmul.f32 %v2969_v53, %v2969_v53 }
 0x12e   :  { %3838 = vst [vmem:[#allocation12_spill] sm:$0xff] %v2974_v54  ;;  %v1422_v8 = vadd.f32 0.0036580483, %v1421_v14  ;;  %v590_v25 = vmul.f32 3.8918573e-05, %v2537_v3  ;;  %v2215_v18 = vpop.eup %2214  ;;  %v783_v9 = vmul.f32 %v782_v0, %v2904_v61  ;;  %v821_v12 = vmul.f32 %v820_v5, %v2938_v60 }
 0x12f   :  { %v630_v51 = vmul.f32 3.8918573e-05, %v2584_v33  ;;  %v1156_v29 = vmul.f32 %v1155_v58, %v2502_v22  ;;  %v1191_v26 = vadd.f32 0.001143296, %v1190_v42  ;;  %vm530_vm3 = vcmp.eq.f32.partialorder %v529_v50, 8.507059e+37 }
 0x130   :  { %v561_v34 = vmul.f32 %v2215_v18, %v2946_v39  ;;  %v533_v31 = vsel %vm530_vm3, %v532_v44, %v528_v4  ;;  %v591_v24 = vadd.f32 0.001143296, %v590_v25  ;;  %v569_v63 = vand.u32 2147483647, %v2946_v39 }
 0x131   :  { %v1157_v10 = vadd.f32 0.4994258, %v1156_v29  ;;  %v1192_v14 = vmul.f32 %v1191_v26, %v2523_v49  ;;  %v571_v16 = vand.u32 2147483648, %v2946_v39  ;;  %v631_v40 = vadd.f32 0.001143296, %v630_v51 }
 0x132   :  { %v562_v55 = vsub.f32 1.0, %v561_v34  ;;  %v2997_v58 = vmin.f32 %v1457_v30, 16.0  ;;  %v592_v5 = vmul.f32 %v591_v24, %v2537_v3  ;;  %v534_v50 = vmul.f32 %v533_v31, %v2701_v32 }
 0x133   :  { %v1158_v0 = vmul.f32 %v1157_v10, %v2502_v22  ;;  %v1193_v42 = vadd.f32 0.014752088, %v1192_v14  ;;  %vm566_vm4 = vweird.f32 %v2215_v18  ;;  %v632_v44 = vmul.f32 %v631_v40, %v2584_v33 }
 0x134   :  { %v563_v4 = vmul.f32 %v2215_v18, %v562_v55  ;;  %v784_v25 = vadd.f32 0.05243302, %v783_v9  ;;  %v593_v34 = vadd.f32 0.014752088, %v592_v5  ;;  %v822_v51 = vadd.f32 0.0036580483, %v821_v12 }
 0x135   :  { %v3003_v29 = vadd.f32 1.0, %v1158_v0  ;;  %v1194_v26 = vmul.f32 %v1193_v42, %v2523_v49  ;;  %vm565_vm5 = vweird.f32 %v2946_v39  ;;  %v633_v22 = vadd.f32 0.014752088, %v632_v44 }
 0x136   :  { %v564_v30 = vadd.f32 %v2215_v18, %v563_v4  ;;  %vm567_vm6 = vmor %vm565_vm5, %vm566_vm4  ;;  %vm570_vm7 = vcmp.eq.f32.partialorder %v569_v63, 8.507059e+37  ;;  %v572_v10 = vor.u32 1.1754944e-38, %v571_v16  ;;  %v1459_v32 = vmul.f32 2.1237322e-06, %v2997_v58 }
 0x137   :  { %2216 = vrcp.f32 %v3003_v29  ;;  %v2084_v31 = vclamps-f32 %v534_v50, 1.0  ;;  %v1195_v9 = vadd.f32 0.112945676, %v1194_v26  ;;  %v594_v24 = vmul.f32 %v593_v34, %v2537_v3 }
 0x138   :  { %v568_v14 = vsel %vm567_vm6, %v2215_v18, %v564_v30  ;;  %v785_v55 = vmul.f32 %v784_v25, %v2904_v61  ;;  %v1423_v12 = vmul.f32 %v1422_v8, %v2913_v57  ;;  %v634_v39 = vmul.f32 %v633_v22, %v2584_v33 }
 0x139   :  { %v573_v40 = vsel %vm570_vm7, %v572_v10, %v568_v14  ;;  %v823_v0 = vmul.f32 %v822_v51, %v2938_v60  ;;  %v1196_v16 = vmul.f32 %v1195_v9, %v2523_v49  ;;  %v595_v42 = vadd.f32 0.112945676, %v594_v24  ;;  %v300_v14 = vpop.f32.mrf.mxu0 }
 0x13a   :  { %v574_v63 = vmul.f32 %v573_v40, %v2730_v62  ;;  %v3017_v5 = vmul.f32 0.5, %v2792_v11  ;;  %v3020_v18 = vmul.f32 0.5, %v2849_v45  ;;  %v1460_v50 = vadd.f32 0.00028619796, %v1459_v32  ;;  %v340_v32 = vpop.f32.mrf.mxu2  ;;  %v3843_v40 = vld [vmem:[#allocation15_spill] sm:$0xff] }
 0x13b   :  { %v635_v4 = vadd.f32 0.112945676, %v634_v39  ;;  %v1699_v8 = vadd.f32 1.0, %v2084_v31  ;;  %v1197_v25 = vadd.f32 0.4994258, %v1196_v16  ;;  %v596_v26 = vmul.f32 %v595_v42, %v2537_v3 }
 0x13c   :  { %3841 = vst [vmem:[#allocation14_spill] sm:$0xff] %v3017_v5  ;;  %v2085_v44 = vclamps-f32 %v574_v63, 1.0  ;;  %v1387_v62 = vmul.f32 %v2976_v17, %v2831_v35  ;;  %v786_v51 = vadd.f32 0.18741608, %v785_v55  ;;  %v1424_v30 = vadd.f32 0.05243302, %v1423_v12 }
 0x13d   :  { %3842 = vst [vmem:[#allocation21_spill] sm:$0xff] %v3020_v18  ;;  %v2217_v34 = vpop.eup %2216  ;;  %v636_v22 = vmul.f32 %v635_v4, %v2584_v33  ;;  %v824_v11 = vadd.f32 0.05243302, %v823_v0  ;;  %v1230_v9 = vmul.f32 3.8918573e-05, %v2561_v27  ;;  %v1461_v31 = vmul.f32 %v1460_v50, %v2997_v58  ;;  %v3844_v0 = vld [vmem:[#allocation17_spill] sm:$0xff] }
 0x13e   :  { %v1700_v10 = vadd.f32 1.0, %v2085_v44  ;;  %v1161_v45 = vmul.f32 %v2217_v34, %v3003_v29  ;;  %v1198_v24 = vmul.f32 %v1197_v25, %v2523_v49  ;;  %v3033_v17 = vld [vmem:[%s3781_s2] ss:$0 sm:$0xff]  ;;  %v1731_v39 = vmul.f32 %v1699_v8, %v3843_v40 }
 0x13f   :  { %v3036_v55 = vadd.f32 %v3033_v17, %v300_v14  ;;  %v3039_v12 = vadd.f32 %v3033_v17, %v340_v32  ;;  %v597_v42 = vadd.f32 0.4994258, %v596_v26  ;;  %v3044_v50 = vmul.f32 0.5, %v2861_v38 }
 0x140   :  { %v1732_v63 = vmul.f32 %v1700_v10, %v3844_v0  ;;  %v1162_v16 = vsub.f32 1.0, %v1161_v45  ;;  %v3046_v49 = vadd.f32 1.0, %v1198_v24  ;;  %v637_v44 = vadd.f32 0.4994258, %v636_v22 }
 0x141   :  { %3845 = vst [vmem:[#allocation23_spill] sm:$0xff] %v3044_v50  ;;  %v3049_v4 = vmul.f32 0.70710677, %v3036_v55  ;;  %vm1166_vm8 = vweird.f32 %v2217_v34  ;;  %v3052_v32 = vmul.f32 0.70710677, %v3039_v12  ;;  %v1171_v10 = vand.u32 2147483648, %v3003_v29 }
 0x142   :  { %v1762_v25 = vpack.c.bf16 %v1732_v63, %v1731_v39  ;;  %v1163_v14 = vmul.f32 %v2217_v34, %v1162_v16  ;;  %v1388_v8 = vadd.f32 1.1283791, %v1387_v62  ;;  %v1462_v40 = vadd.f32 0.0036580483, %v1461_v31  ;;  %v303_v63 = vpop.f32.mrf.mxu0 }
 0x143   :  { %2218 = vrcp.f32 %v3046_v49  ;;  %v1425_v38 = vmul.f32 %v1424_v30, %v2913_v57  ;;  %vm1165_vm9 = vweird.f32 %v3003_v29  ;;  %v1169_v22 = vand.u32 2147483647, %v3003_v29 }
 0x144   :  { %1858 = vmatmul.bf16.gmra.mxu1 %v1762_v25  ;;  %v1164_v26 = vadd.f32 %v2217_v34, %v1163_v14  ;;  %vm3059_vm10 = vmor %vm1165_vm9, %vm1166_vm8  ;;  %v857_v62 = vmul.f32 %v3049_v4, %v3049_v4  ;;  %v1497_v31 = vmul.f32 %v3052_v32, %v3052_v32  ;;  %v598_v24 = vmul.f32 %v597_v42, %v2537_v3 }
 0x145   :  { %v638_v30 = vmul.f32 %v637_v44, %v2584_v33  ;;  %v787_v39 = vmul.f32 %v786_v51, %v2904_v61  ;;  %v825_v0 = vmul.f32 %v824_v11, %v2938_v60  ;;  %v1231_v16 = vadd.f32 0.001143296, %v1230_v9 }
 0x146   :  { %v1168_v29 = vsel %vm3059_vm10, %v2217_v34, %v1164_v26  ;;  %v1463_v25 = vmul.f32 %v1462_v40, %v2997_v58  ;;  %v1172_v14 = vor.u32 1.1754944e-38, %v1171_v10  ;;  %v3075_v50 = vadd.f32 %v3033_v17, %v303_v63 }
 0x147   :  { %v3077_v5 = vadd.f32 1.0, %v598_v24  ;;  %v1426_v3 = vadd.f32 0.18741608, %v1425_v38  ;;  %v3080_v33 = vmul.f32 0.5, %v2889_v52  ;;  %vm1170_vm11 = vcmp.eq.f32.partialorder %v1169_v22, 8.507059e+37 }
 0x148   :  { %v3082_v51 = vadd.f32 1.0, %v638_v30  ;;  %v1173_v42 = vsel %vm1170_vm11, %v1172_v14, %v1168_v29  ;;  %v3084_v34 = vmin.f32 %v857_v62, 16.0  ;;  %v3086_v9 = vmin.f32 %v1497_v31, 16.0 }
 0x149   :  { %3848 = vst [vmem:[#allocation15_spill] sm:$0xff] %v3080_v33  ;;  %v2219_v11 = vpop.eup %2218  ;;  %2220 = vrcp.f32 %v3077_v5  ;;  %v3089_v44 = vadd.f32 1.1283791, %v787_v39  ;;  %v3093_v10 = vmul.f32 0.70710677, %v3075_v50  ;;  %v1232_v52 = vmul.f32 %v1231_v16, %v2561_v27 }
 0x14a   :  { %v1201_v40 = vmul.f32 %v2219_v11, %v3046_v49  ;;  %v3097_v38 = vmul.f32 %v1388_v8, %v2801_v47  ;;  %v3099_v26 = vadd.f32 0.18741608, %v825_v0  ;;  %v1464_v22 = vadd.f32 0.05243302, %v1463_v25 }
 0x14b   :  { %3849 = vst [vmem:[#allocation17_spill] sm:$0xff] %v3093_v10  ;;  %v1270_v45 = vmul.f32 3.8918573e-05, %v2611_v43  ;;  %v1174_v62 = vmul.f32 %v1173_v42, %v2717_v37  ;;  %v1209_v24 = vand.u32 2147483647, %v3046_v49  ;;  %2222 = vrcp.f32 %v3082_v51 }
 0x14c   :  { %3850 = vst [vmem:[#allocation34_spill] sm:$0xff] %v3097_v38  ;;  %v1202_v31 = vsub.f32 1.0, %v1201_v40  ;;  %v3106_v30 = vmul.f32 %v1426_v3, %v2913_v57  ;;  %v1211_v39 = vand.u32 2147483648, %v3046_v49  ;;  %v859_v47 = vmul.f32 2.1237322e-06, %v3084_v34  ;;  %v3852_v57 = vld [vmem:[#allocation20_spill] sm:$0xff] }
 0x14d   :  { %v1499_v8 = vmul.f32 2.1237322e-06, %v3086_v9  ;;  %vm1206_vm12 = vweird.f32 %v2219_v11  ;;  %v897_v29 = vmul.f32 %v3093_v10, %v3093_v10  ;;  %v1233_v37 = vadd.f32 0.014752088, %v1232_v52 }
 0x14e   :  { %v1203_v0 = vmul.f32 %v2219_v11, %v1202_v31  ;;  %v3114_v16 = vmul.f32 %v1464_v22, %v2997_v58  ;;  %vm1205_vm13 = vweird.f32 %v3046_v49  ;;  %v1271_v25 = vadd.f32 0.001143296, %v1270_v45 }
 0x14f   :  { %v2221_v63 = vpop.eup %2220  ;;  %v3118_v14 = vmul.f32 3.8918573e-05, %v2623_v1  ;;  %v2100_v3 = vclamps-f32 %v1174_v62, 1.0  ;;  %vm1210_vm14 = vcmp.eq.f32.partialorder %v1209_v24, 8.507059e+37  ;;  %vm1207_vm15 = vmor %vm1205_vm13, %vm1206_vm12  ;;  %v1212_v31 = vor.u32 1.1754944e-38, %v1211_v39 }
 0x150   :  { %v1204_v42 = vadd.f32 %v2219_v11, %v1203_v0  ;;  %v601_v40 = vmul.f32 %v2221_v63, %v3077_v5  ;;  %v860_v33 = vadd.f32 0.00028619796, %v859_v47  ;;  %v1500_v38 = vadd.f32 0.00028619796, %v1499_v8 }
 0x151   :  { %v611_v52 = vand.u32 2147483648, %v3077_v5  ;;  %v2223_v18 = vpop.eup %2222  ;;  %v3122_v54 = vmin.f32 %v897_v29, 16.0  ;;  %v1234_v45 = vmul.f32 %v1233_v37, %v2561_v27  ;;  %vm605_vm0 = vweird.f32 %v3077_v5 }
 0x152   :  { %v1208_v22 = vsel %vm1207_vm15, %v2219_v11, %v1204_v42  ;;  %v602_v49 = vsub.f32 1.0, %v601_v40  ;;  %v609_v62 = vand.u32 2147483647, %v3077_v5  ;;  %v641_v24 = vmul.f32 %v2223_v18, %v3082_v51 }
 0x153   :  { %v1213_v13 = vsel %vm1210_vm14, %v1212_v31, %v1208_v22  ;;  %v1715_v47 = vadd.f32 1.0, %v2100_v3  ;;  %vm606_vm1 = vweird.f32 %v2221_v63  ;;  %v861_v0 = vmul.f32 %v860_v33, %v3084_v34  ;;  %v3851_v33 = vld [vmem:[#allocation16_spill] sm:$0xff] }
 0x154   :  { %v1214_v39 = vmul.f32 %v1213_v13, %v2735_v15  ;;  %v603_v8 = vmul.f32 %v2221_v63, %v602_v49  ;;  %v1501_v11 = vmul.f32 %v1500_v38, %v3086_v9  ;;  %v612_v29 = vor.u32 1.1754944e-38, %v611_v52  ;;  %vm607_vm2 = vmor %vm605_vm0, %vm606_vm1 }
 0x155   :  { %v642_v42 = vsub.f32 1.0, %v641_v24  ;;  %v899_v37 = vmul.f32 2.1237322e-06, %v3122_v54  ;;  %v651_v22 = vand.u32 2147483648, %v3082_v51  ;;  %vm646_vm3 = vweird.f32 %v2223_v18 }
 0x156   :  { %v2101_v40 = vclamps-f32 %v1214_v39, 1.0  ;;  %v604_v31 = vadd.f32 %v2221_v63, %v603_v8  ;;  %v649_v15 = vand.u32 2147483647, %v3082_v51  ;;  %v1235_v13 = vadd.f32 0.112945676, %v1234_v45  ;;  %v343_v8 = vpop.f32.mrf.mxu2 }
 0x157   :  { %v643_v19 = vmul.f32 %v2223_v18, %v642_v42  ;;  %v1747_v49 = vmul.f32 %v1715_v47, %v3851_v33  ;;  %vm610_vm4 = vcmp.eq.f32.partialorder %v609_v62, 8.507059e+37  ;;  %v862_v52 = vadd.f32 0.0036580483, %v861_v0 }
 0x158   :  { %v1716_v3 = vadd.f32 1.0, %v2101_v40  ;;  %v608_v38 = vsel %vm607_vm2, %v2221_v63, %v604_v31  ;;  %vm645_vm5 = vweird.f32 %v3082_v51  ;;  %v652_v42 = vor.u32 1.1754944e-38, %v651_v22 }
 0x159   :  { %v613_v24 = vsel %vm610_vm4, %v612_v29, %v608_v38  ;;  %v644_v39 = vadd.f32 %v2223_v18, %v643_v19  ;;  %vm647_vm6 = vmor %vm645_vm5, %vm646_vm3  ;;  %v1272_v21 = vmul.f32 %v1271_v25, %v2611_v43  ;;  %v900_v45 = vadd.f32 0.00028619796, %v899_v37 }
 0x15a   :  { %v1748_v10 = vmul.f32 %v1716_v3, %v3852_v57  ;;  %v614_v5 = vmul.f32 %v613_v24, %v2745_v28  ;;  %vm650_vm7 = vcmp.eq.f32.partialorder %v649_v15, 8.507059e+37  ;;  %v1236_v63 = vmul.f32 %v1235_v13, %v2561_v27 }
 0x15b   :  { %v648_v40 = vsel %vm647_vm6, %v2223_v18, %v644_v39  ;;  %v3143_v19 = vadd.f32 %v3033_v17, %v343_v8  ;;  %v1428_v51 = vadd.f32 1.1283791, %v3106_v30  ;;  %v863_v57 = vmul.f32 %v862_v52, %v3084_v34  ;;  %v3853_v39 = vld [vmem:[#allocation22_spill] sm:$0xff] }
 0x15c   :  { %v1770_v62 = vpack.c.bf16 %v1748_v10, %v1747_v49  ;;  %v2086_v47 = vclamps-f32 %v614_v5, 1.0  ;;  %v653_v0 = vsel %vm650_vm7, %v652_v42, %v648_v40  ;;  %v1502_v28 = vadd.f32 0.0036580483, %v1501_v11 }
 0x15d   :  { %v654_v29 = vmul.f32 %v653_v0, %v2827_v2  ;;  %v827_v25 = vmul.f32 %v3099_v26, %v2938_v60  ;;  %v1466_v18 = vadd.f32 0.18741608, %v3114_v16  ;;  %v1237_v37 = vadd.f32 0.4994258, %v1236_v63 }
 0x15e   :  { %1898 = vmatmul.bf16.gmra.mxu3 %v1770_v62  ;;  %v1273_v10 = vadd.f32 0.014752088, %v1272_v21  ;;  %v901_v31 = vmul.f32 %v900_v45, %v3122_v54  ;;  %v1701_v15 = vadd.f32 1.0, %v2086_v47  ;;  %v671_v13 = vadd.f32 0.001143296, %v3118_v14 }
 0x15f   :  { %v2087_v22 = vclamps-f32 %v654_v29, 1.0  ;;  %v3154_v30 = vmul.f32 0.70710677, %v3143_v19  ;;  %v1238_v11 = vmul.f32 %v1237_v37, %v2561_v27  ;;  %v710_v26 = vmul.f32 3.8918573e-05, %v2679_v56 }
 0x160   :  { %v1274_v2 = vmul.f32 %v1273_v10, %v2611_v43  ;;  %v864_v3 = vadd.f32 0.05243302, %v863_v57  ;;  %v1503_v16 = vmul.f32 %v1502_v28, %v3086_v9  ;;  %v672_v21 = vmul.f32 %v671_v13, %v2623_v1 }
 0x161   :  { %v1702_v33 = vadd.f32 1.0, %v2087_v22  ;;  %v1467_v49 = vmul.f32 %v1466_v18, %v2997_v58  ;;  %v3162_v38 = vadd.f32 1.0, %v1238_v11  ;;  %v711_v52 = vadd.f32 0.001143296, %v710_v26  ;;  %v345_v22 = vpop.f32.mrf.mxu2 }
 0x162   :  { %v1275_v14 = vadd.f32 0.112945676, %v1274_v2  ;;  %v902_v24 = vadd.f32 0.0036580483, %v901_v31  ;;  %v1733_v8 = vmul.f32 %v1701_v15, %v3853_v39  ;;  %v673_v5 = vadd.f32 0.014752088, %v672_v21 }
 0x163   :  { %v1734_v27 = vmul.f32 %v1702_v33, %v2704_v23  ;;  %v828_v42 = vadd.f32 1.1283791, %v827_v25  ;;  %v3167_v45 = vmul.f32 0.5, %v2949_v6  ;;  %v1537_v40 = vmul.f32 %v3154_v30, %v3154_v30 }
 0x164   :  { %2224 = vrcp.f32 %v3162_v38  ;;  %v1504_v63 = vadd.f32 0.05243302, %v1503_v16  ;;  %v1276_v47 = vmul.f32 %v1275_v14, %v2611_v43  ;;  %v674_v0 = vmul.f32 %v673_v5, %v2623_v1 }
 0x165   :  { %v1763_v62 = vpack.c.bf16 %v1734_v27, %v1733_v8  ;;  %v3176_v57 = vmul.f32 %v3089_v44, %v2866_v7  ;;  %v1468_v23 = vadd.f32 1.1283791, %v1467_v49  ;;  %v865_v28 = vmul.f32 %v864_v3, %v3084_v34  ;;  %v305_v44 = vpop.f32.mrf.mxu0 }
 0x166   :  { %v712_v6 = vmul.f32 %v711_v52, %v2679_v56  ;;  %v3181_v29 = vmul.f32 %v1428_v51, %v2879_v59  ;;  %v903_v25 = vmul.f32 %v902_v24, %v3122_v54  ;;  %v1277_v18 = vadd.f32 0.4994258, %v1276_v47 }
 0x167   :  { %1863 = vmatmul.bf16.gmra.mxu1 %v1763_v62  ;;  %v675_v37 = vadd.f32 0.112945676, %v674_v0  ;;  %v3185_v10 = vmul.f32 %v828_v42, %v2907_v46  ;;  %v3188_v31 = vmul.f32 0.5, %v3036_v55  ;;  %v3190_v7 = vmin.f32 %v1537_v40, 16.0 }
 0x168   :  { %v713_v15 = vadd.f32 0.014752088, %v712_v6  ;;  %v1505_v13 = vmul.f32 %v1504_v63, %v3086_v9  ;;  %v1278_v59 = vmul.f32 %v1277_v18, %v2611_v43  ;;  %v3195_v51 = vadd.f32 %v3033_v17, %v305_v44 }
 0x169   :  { %v3198_v11 = vadd.f32 %v3033_v17, %v345_v22  ;;  %v3201_v2 = vmul.f32 %v1468_v23, %v2969_v53  ;;  %v866_v55 = vadd.f32 0.18741608, %v865_v28  ;;  %v3204_v26 = vmul.f32 0.5, %v3039_v12 }
 0x16a   :  { %v2225_v46 = vpop.eup %2224  ;;  %v3207_v3 = vmul.f32 0.5, %v3075_v50  ;;  %v904_v16 = vadd.f32 0.05243302, %v903_v25  ;;  %v3210_v33 = vadd.f32 1.0, %v1278_v59  ;;  %v676_v21 = vmul.f32 %v675_v37, %v2623_v1 }
 0x16b   :  { %v1241_v43 = vmul.f32 %v2225_v46, %v3162_v38  ;;  %v1539_v49 = vmul.f32 2.1237322e-06, %v3190_v7  ;;  %v3215_v14 = vmul.f32 0.70710677, %v3195_v51  ;;  %v3218_v53 = vmul.f32 0.70710677, %v3198_v11 }
 0x16c   :  { %v714_v12 = vmul.f32 %v713_v15, %v2679_v56  ;;  %v1506_v52 = vadd.f32 0.18741608, %v1505_v13  ;;  %v1249_v24 = vand.u32 2147483647, %v3162_v38  ;;  %2226 = vrcp.f32 %v3210_v33 }
 0x16d   :  { %v1242_v50 = vsub.f32 1.0, %v1241_v43  ;;  %v1251_v39 = vand.u32 2147483648, %v3162_v38  ;;  %v937_v8 = vmul.f32 %v3215_v14, %v3215_v14  ;;  %v1577_v27 = vmul.f32 %v3218_v53, %v3218_v53  ;;  %v308_v23 = vpop.f32.mrf.mxu0 }
 0x16e   :  { %v1310_v5 = vmul.f32 3.8918573e-05, %v2652_v20  ;;  %v867_v42 = vmul.f32 %v866_v55, %v3084_v34  ;;  %vm1246_vm8 = vweird.f32 %v2225_v46  ;;  %v677_v63 = vadd.f32 0.4994258, %v676_v21 }
 0x16f   :  { %v1243_v40 = vmul.f32 %v2225_v46, %v1242_v50  ;;  %v905_v62 = vmul.f32 %v904_v16, %v3122_v54  ;;  %v1540_v47 = vadd.f32 0.00028619796, %v1539_v49  ;;  %v3231_v0 = vmin.f32 %v937_v8, 16.0  ;;  %v3856_v8 = vld [vmem:[#allocation30_spill] sm:$0xff] }
 0x170   :  { %v715_v28 = vadd.f32 0.112945676, %v714_v12  ;;  %vm1245_vm9 = vweird.f32 %v3162_v38  ;;  %v3235_v25 = vadd.f32 %v3033_v17, %v308_v23  ;;  %v678_v18 = vmul.f32 %v677_v63, %v2623_v1 }
 0x171   :  { %v1244_v6 = vadd.f32 %v2225_v46, %v1243_v40  ;;  %vm1247_vm10 = vmor %vm1245_vm9, %vm1246_vm8  ;;  %vm1250_vm11 = vcmp.eq.f32.partialorder %v1249_v24, 8.507059e+37  ;;  %v1252_v37 = vor.u32 1.1754944e-38, %v1251_v39  ;;  %v3238_v44 = vmin.f32 %v1577_v27, 16.0 }
 0x172   :  { %3854 = vst [vmem:[#allocation16_spill] sm:$0xff] %v3235_v25  ;;  %v1311_v22 = vadd.f32 0.001143296, %v1310_v5  ;;  %v2227_v15 = vpop.eup %2226  ;;  %v939_v59 = vmul.f32 2.1237322e-06, %v3231_v0  ;;  %v3244_v16 = vadd.f32 1.0, %v678_v18  ;;  %v1507_v38 = vmul.f32 %v1506_v52, %v3086_v9 }
 0x173   :  { %v1248_v13 = vsel %vm1247_vm10, %v2225_v46, %v1244_v6  ;;  %v3242_v55 = vmul.f32 0.70710677, %v3235_v25  ;;  %v1281_v1 = vmul.f32 %v2227_v15, %v3210_v33  ;;  %v716_v21 = vmul.f32 %v715_v28, %v2679_v56 }
 0x174   :  { %v1253_v43 = vsel %vm1250_vm11, %v1252_v37, %v1248_v13  ;;  %v906_v49 = vadd.f32 0.18741608, %v905_v62  ;;  %v1541_v12 = vmul.f32 %v1540_v47, %v3190_v7  ;;  %2228 = vrcp.f32 %v3244_v16 }
 0x175   :  { %v977_v46 = vmul.f32 %v3242_v55, %v3242_v55  ;;  %v3254_v50 = vmul.f32 0.5, %v3143_v19  ;;  %v1282_v24 = vsub.f32 1.0, %v1281_v1  ;;  %v1579_v39 = vmul.f32 2.1237322e-06, %v3238_v44 }
 0x176   :  { %v1312_v52 = vmul.f32 %v1311_v22, %v2652_v20  ;;  %v1254_v27 = vmul.f32 %v1253_v43, %v3856_v8  ;;  %v1291_v5 = vand.u32 2147483648, %v3210_v33  ;;  %v940_v40 = vadd.f32 0.00028619796, %v939_v59  ;;  %v348_v43 = vpop.f32.mrf.mxu2 }
 0x177   :  { %3855 = vst [vmem:[#allocation20_spill] sm:$0xff] %v3254_v50  ;;  %v3260_v63 = vmin.f32 %v977_v46, 16.0  ;;  %v1283_v62 = vmul.f32 %v2227_v15, %v1282_v24  ;;  %vm1286_vm12 = vweird.f32 %v2227_v15  ;;  %v1289_v47 = vand.u32 2147483647, %v3210_v33 }
 0x178   :  { %v717_v23 = vadd.f32 0.4994258, %v716_v21  ;;  %v868_v28 = vadd.f32 1.1283791, %v867_v42  ;;  %v1508_v19 = vadd.f32 1.1283791, %v1507_v38  ;;  %v907_v6 = vmul.f32 %v906_v49, %v3122_v54 }
 0x179   :  { %v1542_v18 = vadd.f32 0.0036580483, %v1541_v12  ;;  %v1284_v37 = vadd.f32 %v2227_v15, %v1283_v62  ;;  %vm1285_vm13 = vweird.f32 %v3210_v33  ;;  %v1580_v22 = vadd.f32 0.00028619796, %v1579_v39  ;;  %v3858_v39 = vld [vmem:[#allocation32_spill] sm:$0xff] }
 0x17a   :  { %v718_v13 = vmul.f32 %v717_v23, %v2679_v56  ;;  %v2229_v59 = vpop.eup %2228  ;;  %v2102_v1 = vclamps-f32 %v1254_v27, 1.0  ;;  %vm1287_vm14 = vmor %vm1285_vm13, %vm1286_vm12  ;;  %v1292_v46 = vor.u32 1.1754944e-38, %v1291_v5  ;;  %v941_v24 = vmul.f32 %v940_v40, %v3231_v0 }
 0x17b   :  { %v979_v21 = vmul.f32 2.1237322e-06, %v3260_v63  ;;  %v1288_v42 = vsel %vm1287_vm14, %v2227_v15, %v1284_v37  ;;  %vm1290_vm15 = vcmp.eq.f32.partialorder %v1289_v47, 8.507059e+37  ;;  %v681_v38 = vmul.f32 %v2229_v59, %v3244_v16 }
 0x17c   :  { %v1313_v49 = vadd.f32 0.014752088, %v1312_v52  ;;  %v1293_v12 = vsel %vm1290_vm15, %v1292_v46, %v1288_v42  ;;  %v3269_v8 = vadd.f32 1.0, %v718_v13  ;;  %v3272_v33 = vadd.f32 %v3033_v17, %v348_v43 }
 0x17d   :  { %v1350_v56 = vmul.f32 3.8918573e-05, %v2698_v36  ;;  %v1294_v27 = vmul.f32 %v1293_v12, %v3858_v39  ;;  %v1581_v5 = vmul.f32 %v1580_v22, %v3238_v44  ;;  %v682_v40 = vsub.f32 1.0, %v681_v38 }
 0x17e   :  { %3857 = vst [vmem:[#allocation22_spill] sm:$0xff] %v3272_v33  ;;  %v691_v62 = vand.u32 2147483648, %v3244_v16  ;;  %v1717_v15 = vadd.f32 1.0, %v2102_v1  ;;  %v942_v47 = vadd.f32 0.0036580483, %v941_v24  ;;  %2230 = vrcp.f32 %v3269_v8  ;;  %v3860_v24 = vld [vmem:[#allocation24_spill] sm:$0xff] }
 0x17f   :  { %v980_v23 = vadd.f32 0.00028619796, %v979_v21  ;;  %v2103_v52 = vclamps-f32 %v1294_v27, 1.0  ;;  %v683_v37 = vmul.f32 %v2229_v59, %v682_v40  ;;  %vm686_vm0 = vweird.f32 %v2229_v59 }
 0x180   :  { %v1314_v13 = vmul.f32 %v1313_v49, %v2652_v20  ;;  %v1543_v43 = vmul.f32 %v1542_v18, %v3190_v7  ;;  %v689_v46 = vand.u32 2147483647, %v3244_v16  ;;  %v3283_v42 = vmul.f32 0.70710677, %v3272_v33  ;;  %v3861_v18 = vld [vmem:[#allocation25_spill] sm:$0xff] }
 0x181   :  { %v1351_v22 = vadd.f32 0.001143296, %v1350_v56  ;;  %v1718_v38 = vadd.f32 1.0, %v2103_v52  ;;  %v1582_v12 = vadd.f32 0.0036580483, %v1581_v5  ;;  %v684_v1 = vadd.f32 %v2229_v59, %v683_v37 }
 0x182   :  { %3859 = vst [vmem:[#allocation30_spill] sm:$0xff] %v3283_v42  ;;  %vm685_vm1 = vweird.f32 %v3244_v16  ;;  %v1749_v21 = vmul.f32 %v1717_v15, %v3860_v24  ;;  %v943_v39 = vmul.f32 %v942_v47, %v3231_v0  ;;  %v981_v27 = vmul.f32 %v980_v23, %v3260_v63 }
 0x183   :  { %vm687_vm2 = vmor %vm685_vm1, %vm686_vm0  ;;  %v692_v49 = vor.u32 1.1754944e-38, %v691_v62  ;;  %v1750_v40 = vmul.f32 %v1718_v38, %v3861_v18  ;;  %v1617_v33 = vmul.f32 %v3283_v42, %v3283_v42  ;;  %v1315_v56 = vadd.f32 0.112945676, %v1314_v13 }
 0x184   :  { %v688_v25 = vsel %vm687_vm2, %v2229_v59, %v684_v1  ;;  %v2231_v52 = vpop.eup %2230  ;;  %v3293_v5 = vmul.f32 %v868_v28, %v3049_v4  ;;  %v3296_v16 = vmul.f32 %v1508_v19, %v3052_v32  ;;  %v908_v15 = vadd.f32 1.1283791, %v907_v6 }
 0x185   :  { %vm690_vm3 = vcmp.eq.f32.partialorder %v689_v46, 8.507059e+37  ;;  %v1544_v47 = vadd.f32 0.05243302, %v1543_v43  ;;  %v1771_v23 = vpack.c.bf16 %v1750_v40, %v1749_v21  ;;  %v721_v62 = vmul.f32 %v2231_v52, %v3269_v8 }
 0x186   :  { %v693_v37 = vsel %vm690_vm3, %v692_v49, %v688_v25  ;;  %v944_v38 = vadd.f32 0.05243302, %v943_v39  ;;  %v1583_v59 = vmul.f32 %v1582_v12, %v3238_v44  ;;  %v982_v1 = vadd.f32 0.0036580483, %v981_v27 }
 0x187   :  { %v729_v13 = vand.u32 2147483647, %v3269_v8  ;;  %1903 = vmatmul.bf16.gmra.mxu3 %v1771_v23  ;;  %v722_v24 = vsub.f32 1.0, %v721_v62  ;;  %v3301_v4 = vmin.f32 %v1617_v33, 16.0  ;;  %v1316_v32 = vmul.f32 %v1315_v56, %v2652_v20 }
 0x188   :  { %v1352_v28 = vmul.f32 %v1351_v22, %v2698_v36  ;;  %v694_v19 = vmul.f32 %v693_v37, %v2931_v48  ;;  %v731_v25 = vand.u32 2147483648, %v3269_v8  ;;  %v750_v6 = vmul.f32 3.8918573e-05, %v2726_v41 }
 0x189   :  { %v790_v43 = vmul.f32 3.8918573e-05, %v2904_v61  ;;  %v723_v46 = vmul.f32 %v2231_v52, %v722_v24  ;;  %vm726_vm4 = vweird.f32 %v2231_v52  ;;  %v1317_v12 = vadd.f32 0.4994258, %v1316_v32 }
 0x18a   :  { %v1353_v21 = vadd.f32 0.014752088, %v1352_v28  ;;  %vm725_vm5 = vweird.f32 %v3269_v8  ;;  %vm3310_vm6 = vcmp.eq.f32.partialorder %v729_v13, 8.507059e+37  ;;  %v751_v39 = vadd.f32 0.001143296, %v750_v6 }
 0x18b   :  { %v791_v22 = vadd.f32 0.001143296, %v790_v43  ;;  %v724_v27 = vadd.f32 %v2231_v52, %v723_v46  ;;  %v1619_v48 = vmul.f32 2.1237322e-06, %v3301_v4  ;;  %v1318_v49 = vmul.f32 %v1317_v12, %v2652_v20  ;;  %vm727_vm7 = vmor %vm725_vm5, %vm726_vm4  ;;  %v3864_v43 = vld [vmem:[#allocation18_spill] sm:$0xff] }
 0x18c   :  { %v1354_v18 = vmul.f32 %v1353_v21, %v2698_v36  ;;  %v2088_v40 = vclamps-f32 %v694_v19, 1.0  ;;  %v732_v56 = vor.u32 1.1754944e-38, %v731_v25  ;;  %v752_v23 = vmul.f32 %v751_v39, %v2726_v41 }
 0x18d   :  { %v792_v8 = vmul.f32 %v791_v22, %v2904_v61  ;;  %v728_v37 = vsel %vm727_vm7, %v2231_v52, %v724_v27  ;;  %v3319_v62 = vadd.f32 1.0, %v1318_v49  ;;  %v1390_v24 = vmul.f32 3.8918573e-05, %v2831_v35  ;;  %v3865_v49 = vld [vmem:[#allocation17_spill] sm:$0xff] }
 0x18e   :  { %v1355_v13 = vadd.f32 0.112945676, %v1354_v18  ;;  %v1584_v32 = vadd.f32 0.05243302, %v1583_v59  ;;  %v733_v28 = vsel %vm3310_vm6, %v732_v56, %v728_v37  ;;  %v753_v20 = vadd.f32 0.014752088, %v752_v23 }
 0x18f   :  { %v793_v6 = vadd.f32 0.014752088, %v792_v8  ;;  %v983_v19 = vmul.f32 %v982_v1, %v3260_v63  ;;  %v734_v25 = vmul.f32 %v733_v28, %v3864_v43  ;;  %v1620_v46 = vadd.f32 0.00028619796, %v1619_v48  ;;  %v310_v8 = vpop.f32.mrf.mxu0  ;;  %v3867_v43 = vld [vmem:[#allocation28_spill] sm:$0xff] }
 0x190   :  { %2232 = vrcp.f32 %v3319_v62  ;;  %v1545_v52 = vmul.f32 %v1544_v47, %v3190_v7  ;;  %v945_v12 = vmul.f32 %v944_v38, %v3231_v0  ;;  %v1356_v21 = vmul.f32 %v1355_v13, %v2698_v36 }
 0x191   :  { %v754_v59 = vmul.f32 %v753_v20, %v2726_v41  ;;  %v2089_v39 = vclamps-f32 %v734_v25, 1.0  ;;  %v1703_v33 = vadd.f32 1.0, %v2088_v40  ;;  %v794_v22 = vmul.f32 %v793_v6, %v2904_v61 }
 0x192   :  { %v1391_v27 = vadd.f32 0.001143296, %v1390_v24  ;;  %v3333_v1 = vmul.f32 %v908_v15, %v3865_v49  ;;  %v1585_v48 = vmul.f32 %v1584_v32, %v3238_v44  ;;  %v1357_v18 = vadd.f32 0.4994258, %v1356_v21  ;;  %v3866_v15 = vld [vmem:[#allocation26_spill] sm:$0xff] }
 0x193   :  { %v755_v56 = vadd.f32 0.112945676, %v754_v59  ;;  %v984_v23 = vadd.f32 0.05243302, %v983_v19  ;;  %v1704_v47 = vadd.f32 1.0, %v2089_v39  ;;  %v1621_v38 = vmul.f32 %v1620_v46, %v3301_v4 }
 0x194   :  { %v795_v37 = vadd.f32 0.112945676, %v794_v22  ;;  %v1546_v13 = vadd.f32 0.18741608, %v1545_v52  ;;  %v3338_v28 = vmul.f32 0.5, %v3195_v51  ;;  %v1358_v24 = vmul.f32 %v1357_v18, %v2698_v36 }
 0x195   :  { %v946_v40 = vadd.f32 0.18741608, %v945_v12  ;;  %v1735_v6 = vmul.f32 %v1703_v33, %v3866_v15  ;;  %v1736_v32 = vmul.f32 %v1704_v47, %v3867_v43  ;;  %v3344_v25 = vadd.f32 %v3033_v17, %v310_v8 }
 0x196   :  { %v2233_v20 = vpop.eup %2232  ;;  %v1392_v19 = vmul.f32 %v1391_v27, %v2831_v35  ;;  %v3348_v21 = vadd.f32 1.0, %v1358_v24  ;;  %v756_v51 = vmul.f32 %v755_v56, %v2726_v41  ;;  %v796_v52 = vmul.f32 %v795_v37, %v2904_v61  ;;  %v350_v27 = vpop.f32.mrf.mxu2 }
 0x197   :  { %3868 = vst [vmem:[#allocation32_spill] sm:$0xff] %v3344_v25  ;;  %v1321_v46 = vmul.f32 %v2233_v20, %v3319_v62  ;;  %v1586_v12 = vadd.f32 0.18741608, %v1585_v48  ;;  %v985_v36 = vmul.f32 %v984_v23, %v3260_v63  ;;  %v1764_v59 = vpack.c.bf16 %v1736_v32, %v1735_v6 }
 0x198   :  { %v1622_v39 = vadd.f32 0.0036580483, %v1621_v38  ;;  %v1547_v33 = vmul.f32 %v1546_v13, %v3190_v7  ;;  %v947_v22 = vmul.f32 %v946_v40, %v3231_v0  ;;  %2234 = vrcp.f32 %v3348_v21 }
 0x199   :  { %v1322_v49 = vsub.f32 1.0, %v1321_v46  ;;  %1868 = vmatmul.bf16.gmra.mxu1 %v1764_v59  ;;  %vm1326_vm8 = vweird.f32 %v2233_v20  ;;  %v1329_v18 = vand.u32 2147483647, %v3319_v62  ;;  %v1331_v56 = vand.u32 2147483648, %v3319_v62  ;;  %v3870_v46 = vld [vmem:[#allocation33_spill] sm:$0xff] }
 0x19a   :  { %v1393_v47 = vadd.f32 0.014752088, %v1392_v19  ;;  %v3359_v23 = vmul.f32 0.70710677, %v3344_v25  ;;  %v757_v38 = vadd.f32 0.4994258, %v756_v51  ;;  %v1587_v37 = vmul.f32 %v1586_v12, %v3238_v44 }
 0x19b   :  { %v1323_v48 = vmul.f32 %v2233_v20, %v1322_v49  ;;  %v797_v8 = vadd.f32 0.4994258, %v796_v52  ;;  %v986_v13 = vadd.f32 0.18741608, %v985_v36  ;;  %v1623_v40 = vmul.f32 %v1622_v39, %v3301_v4 }
 0x19c   :  { %v3364_v24 = vadd.f32 %v3033_v17, %v350_v27  ;;  %vm1325_vm9 = vweird.f32 %v3319_v62  ;;  %v758_v6 = vmul.f32 %v757_v38, %v2726_v41  ;;  %vm1330_vm11 = vcmp.eq.f32.partialorder %v1329_v18, 8.507059e+37 }
 0x19d   :  { %v1324_v15 = vadd.f32 %v2233_v20, %v1323_v48  ;;  %v798_v43 = vmul.f32 %v797_v8, %v2904_v61  ;;  %vm1327_vm10 = vmor %vm1325_vm9, %vm1326_vm8  ;;  %v1332_v32 = vor.u32 1.1754944e-38, %v1331_v56  ;;  %v1394_v19 = vmul.f32 %v1393_v47, %v2831_v35 }
 0x19e   :  { %3869 = vst [vmem:[#allocation24_spill] sm:$0xff] %v3364_v24  ;;  %v1430_v51 = vmul.f32 3.8918573e-05, %v3870_v46  ;;  %v2235_v52 = vpop.eup %2234  ;;  %v1017_v17 = vmul.f32 %v3359_v23, %v3359_v23  ;;  %v3374_v36 = vadd.f32 1.0, %v758_v6  ;;  %v948_v41 = vadd.f32 1.1283791, %v947_v22 }
 0x19f   :  { %v1328_v12 = vsel %vm1327_vm10, %v2233_v20, %v1324_v15  ;;  %v3376_v62 = vadd.f32 1.0, %v798_v43  ;;  %v1361_v61 = vmul.f32 %v2235_v52, %v3348_v21  ;;  %v3380_v39 = vmul.f32 0.70710677, %v3364_v24  ;;  %v3873_v22 = vld [vmem:[#allocation13_spill] sm:$0xff] }
 0x1a0   :  { %v1333_v59 = vsel %vm1330_vm11, %v1332_v32, %v1328_v12  ;;  %v987_v49 = vmul.f32 %v986_v13, %v3260_v63  ;;  %v1624_v27 = vadd.f32 0.05243302, %v1623_v40  ;;  %v1369_v18 = vand.u32 2147483647, %v3348_v21 }
 0x1a1   :  { %3871 = vst [vmem:[#allocation25_spill] sm:$0xff] %v3380_v39  ;;  %2236 = vrcp.f32 %v3374_v36  ;;  %v3386_v20 = vmul.f32 0.5, %v3198_v11  ;;  %v1362_v56 = vsub.f32 1.0, %v1361_v61  ;;  %v1395_v47 = vadd.f32 0.112945676, %v1394_v19 }
 0x1a2   :  { %v1431_v48 = vadd.f32 0.001143296, %v1430_v51  ;;  %v1334_v38 = vmul.f32 %v1333_v59, %v3873_v22  ;;  %v1371_v8 = vand.u32 2147483648, %v3348_v21  ;;  %v3390_v15 = vmin.f32 %v1017_v17, 16.0  ;;  %v3874_v22 = vld [vmem:[#allocation19_spill] sm:$0xff] }
 0x1a3   :  { %3872 = vst [vmem:[#allocation18_spill] sm:$0xff] %v3386_v20  ;;  %2238 = vrcp.f32 %v3376_v62  ;;  %v3393_v13 = vadd.f32 1.1283791, %v1547_v33  ;;  %v1363_v40 = vmul.f32 %v2235_v52, %v1362_v56  ;;  %vm1366_vm12 = vweird.f32 %v2235_v52 }
 0x1a4   :  { %v1657_v6 = vmul.f32 %v3380_v39, %v3380_v39  ;;  %v3398_v11 = vmul.f32 %v948_v41, %v3215_v14  ;;  %v3400_v43 = vadd.f32 1.1283791, %v1587_v37  ;;  %v3402_v32 = vadd.f32 1.1283791, %v987_v49 }
 0x1a5   :  { %v3405_v19 = vmul.f32 %v1624_v27, %v3301_v4  ;;  %v1364_v51 = vadd.f32 %v2235_v52, %v1363_v40  ;;  %vm1365_vm13 = vweird.f32 %v3348_v21  ;;  %v1396_v33 = vmul.f32 %v1395_v47, %v2831_v35 }
 0x1a6   :  { %v1432_v12 = vmul.f32 %v1431_v48, %v3870_v46  ;;  %v2104_v59 = vclamps-f32 %v1334_v38, 1.0  ;;  %vm1367_vm14 = vmor %vm1365_vm13, %vm1366_vm12  ;;  %vm1370_vm15 = vcmp.eq.f32.partialorder %v1369_v18, 8.507059e+37  ;;  %v1372_v14 = vor.u32 1.1754944e-38, %v1371_v8 }
 0x1a7   :  { %v2237_v17 = vpop.eup %2236  ;;  %v1019_v37 = vmul.f32 2.1237322e-06, %v3390_v15  ;;  %v1368_v41 = vsel %vm1367_vm14, %v2235_v52, %v1364_v51  ;;  %v3411_v61 = vmin.f32 %v1657_v6, 16.0  ;;  %vm765_vm0 = vweird.f32 %v3374_v36 }
 0x1a8   :  { %v761_v49 = vmul.f32 %v2237_v17, %v3374_v36  ;;  %v1373_v21 = vsel %vm1370_vm15, %v1372_v14, %v1368_v41  ;;  %v769_v56 = vand.u32 2147483647, %v3374_v36  ;;  %v1397_v47 = vadd.f32 0.4994258, %v1396_v33 }
 0x1a9   :  { %v2239_v27 = vpop.eup %2238  ;;  %v1433_v48 = vadd.f32 0.014752088, %v1432_v12  ;;  %v1374_v38 = vmul.f32 %v1373_v21, %v3874_v22  ;;  %v771_v18 = vand.u32 2147483648, %v3374_v36  ;;  %v1719_v52 = vadd.f32 1.0, %v2104_v59 }
 0x1aa   :  { %v762_v40 = vsub.f32 1.0, %v761_v49  ;;  %v801_v8 = vmul.f32 %v2239_v27, %v3376_v62  ;;  %vm805_vm1 = vweird.f32 %v3376_v62  ;;  %v1398_v6 = vmul.f32 %v1397_v47, %v2831_v35  ;;  %v3877_v35 = vld [vmem:[#allocation27_spill] sm:$0xff] }
 0x1ab   :  { %v1434_v51 = vmul.f32 %v1433_v48, %v3870_v46  ;;  %v2105_v24 = vclamps-f32 %v1374_v38, 1.0  ;;  %vm766_vm2 = vweird.f32 %v2237_v17  ;;  %vm3422_vm3 = vcmp.eq.f32.partialorder %v769_v56, 8.507059e+37  ;;  %v3878_v38 = vld [vmem:[#allocation29_spill] sm:$0xff] }
 0x1ac   :  { %v763_v14 = vmul.f32 %v2237_v17, %v762_v40  ;;  %v802_v41 = vsub.f32 1.0, %v801_v8  ;;  %v809_v12 = vand.u32 2147483647, %v3376_v62  ;;  %v811_v49 = vand.u32 2147483648, %v3376_v62  ;;  %vm767_vm5 = vmor %vm765_vm0, %vm766_vm2 }
 0x1ad   :  { %v3428_v21 = vadd.f32 1.0, %v1398_v6  ;;  %v1720_v59 = vadd.f32 1.0, %v2105_v24  ;;  %vm806_vm4 = vweird.f32 %v2239_v27  ;;  %v1751_v47 = vmul.f32 %v1719_v52, %v3877_v35  ;;  %v3879_v52 = vld [vmem:[#allocation12_spill] sm:$0xff] }
 0x1ae   :  { %v764_v22 = vadd.f32 %v2237_v17, %v763_v14  ;;  %v803_v39 = vmul.f32 %v2239_v27, %v802_v41  ;;  %v772_v48 = vor.u32 1.1754944e-38, %v771_v18  ;;  %v1435_v56 = vadd.f32 0.112945676, %v1434_v51  ;;  %vm807_vm6 = vmor %vm805_vm1, %vm806_vm4 }
 0x1af   :  { %2240 = vrcp.f32 %v3428_v21  ;;  %v1752_v40 = vmul.f32 %v1720_v59, %v3878_v38  ;;  %v830_v6 = vmul.f32 3.8918573e-05, %v2938_v60  ;;  %v1020_v25 = vadd.f32 0.00028619796, %v1019_v37 }
 0x1b0   :  { %v768_v8 = vsel %vm767_vm5, %v2237_v17, %v764_v22  ;;  %v804_v42 = vadd.f32 %v2239_v27, %v803_v39  ;;  %v1659_v24 = vmul.f32 2.1237322e-06, %v3411_v61  ;;  %v812_v36 = vor.u32 1.1754944e-38, %v811_v49 }
 0x1b1   :  { %v773_v14 = vsel %vm3422_vm3, %v772_v48, %v768_v8  ;;  %v1772_v18 = vpack.c.bf16 %v1752_v40, %v1751_v47  ;;  %vm810_vm7 = vcmp.eq.f32.partialorder %v809_v12, 8.507059e+37  ;;  %v1409_v39 = vand.u32 2147483647, %v3428_v21 }
 0x1b2   :  { %v774_v41 = vmul.f32 %v773_v14, %v3879_v52  ;;  %v808_v51 = vsel %vm807_vm6, %v2239_v27, %v804_v42  ;;  %v1411_v17 = vand.u32 2147483648, %v3428_v21  ;;  %v1436_v37 = vmul.f32 %v1435_v56, %v3870_v46 }
 0x1b3   :  { %v813_v59 = vsel %vm810_vm7, %v812_v36, %v808_v51  ;;  %1908 = vmatmul.bf16.gmra.mxu3 %v1772_v18  ;;  %v831_v35 = vadd.f32 0.001143296, %v830_v6  ;;  %v870_v62 = vmul.f32 3.8918573e-05, %v3084_v34  ;;  %v1021_v47 = vmul.f32 %v1020_v25, %v3390_v15  ;;  %v3880_v36 = vld [vmem:[#allocation31_spill] sm:$0xff] }
 0x1b4   :  { %v2090_v22 = vclamps-f32 %v774_v41, 1.0  ;;  %v814_v33 = vmul.f32 %v813_v59, %v3176_v57  ;;  %v1437_v48 = vadd.f32 0.4994258, %v1436_v37  ;;  %v1470_v42 = vmul.f32 3.8918573e-05, %v2997_v58 }
 0x1b5   :  { %v2241_v49 = vpop.eup %2240  ;;  %v1510_v27 = vmul.f32 3.8918573e-05, %v3086_v9  ;;  %v832_v57 = vmul.f32 %v831_v35, %v2938_v60  ;;  %v871_v8 = vadd.f32 0.001143296, %v870_v62  ;;  %v910_v35 = vmul.f32 3.8918573e-05, %v3122_v54 }
 0x1b6   :  { %v2091_v12 = vclamps-f32 %v814_v33, 1.0  ;;  %v1705_v38 = vadd.f32 1.0, %v2090_v22  ;;  %v1401_v40 = vmul.f32 %v2241_v49, %v3428_v21  ;;  %vm1406_vm8 = vweird.f32 %v2241_v49  ;;  %v3881_v22 = vld [vmem:[#allocation21_spill] sm:$0xff] }
 0x1b7   :  { %v1438_v56 = vmul.f32 %v1437_v48, %v3870_v46  ;;  %v1471_v6 = vadd.f32 0.001143296, %v1470_v42  ;;  %v1511_v52 = vadd.f32 0.001143296, %v1510_v27  ;;  %v833_v51 = vadd.f32 0.014752088, %v832_v57 }
 0x1b8   :  { %v1706_v14 = vadd.f32 1.0, %v2091_v12  ;;  %v1737_v18 = vmul.f32 %v1705_v38, %v3880_v36  ;;  %v1402_v25 = vsub.f32 1.0, %v1401_v40  ;;  %v872_v59 = vmul.f32 %v871_v8, %v3084_v34 }
 0x1b9   :  { %v3454_v41 = vadd.f32 1.0, %v1438_v56  ;;  %v1472_v37 = vmul.f32 %v1471_v6, %v2997_v58  ;;  %v1512_v46 = vmul.f32 %v1511_v52, %v3086_v9  ;;  %v1022_v62 = vadd.f32 0.0036580483, %v1021_v47 }
 0x1ba   :  { %v1738_v33 = vmul.f32 %v1706_v14, %v3881_v22  ;;  %v1403_v20 = vmul.f32 %v2241_v49, %v1402_v25  ;;  %v3461_v48 = vadd.f32 0.00028619796, %v1659_v24  ;;  %vm1405_vm9 = vweird.f32 %v3428_v21 }
 0x1bb   :  { %2242 = vrcp.f32 %v3454_v41  ;;  %v834_v12 = vmul.f32 %v833_v51, %v2938_v60  ;;  %v873_v38 = vadd.f32 0.014752088, %v872_v59  ;;  %vm1407_vm10 = vmor %vm1405_vm9, %vm1406_vm8  ;;  %vm1410_vm11 = vcmp.eq.f32.partialorder %v1409_v39, 8.507059e+37 }
 0x1bc   :  { %v1765_v42 = vpack.c.bf16 %v1738_v33, %v1737_v18  ;;  %v1404_v27 = vadd.f32 %v2241_v49, %v1403_v20  ;;  %v1412_v40 = vor.u32 1.1754944e-38, %v1411_v17  ;;  %v1473_v56 = vadd.f32 0.014752088, %v1472_v37  ;;  %v3882_v18 = vld [vmem:[#allocation34_spill] sm:$0xff] }
 0x1bd   :  { %v1513_v57 = vadd.f32 0.014752088, %v1512_v46  ;;  %v835_v47 = vadd.f32 0.112945676, %v834_v12  ;;  %v874_v24 = vmul.f32 %v873_v38, %v3084_v34  ;;  %v911_v6 = vadd.f32 0.001143296, %v910_v35 }
 0x1be   :  { %1873 = vmatmul.bf16.gmra.mxu1 %v1765_v42  ;;  %v1408_v8 = vsel %vm1407_vm10, %v2241_v49, %v1404_v27  ;;  %v1474_v14 = vmul.f32 %v1473_v56, %v2997_v58  ;;  %v950_v36 = vmul.f32 3.8918573e-05, %v3231_v0  ;;  %v1023_v49 = vmul.f32 %v1022_v62, %v3390_v15 }
 0x1bf   :  { %v1413_v21 = vsel %vm1410_vm11, %v1412_v40, %v1408_v8  ;;  %v1514_v20 = vmul.f32 %v1513_v57, %v3086_v9  ;;  %v836_v39 = vmul.f32 %v835_v47, %v2938_v60  ;;  %v875_v17 = vadd.f32 0.112945676, %v874_v24 }
 0x1c0   :  { %v1414_v25 = vmul.f32 %v1413_v21, %v3882_v18  ;;  %v912_v52 = vmul.f32 %v911_v6, %v3122_v54  ;;  %v1475_v59 = vadd.f32 0.112945676, %v1474_v14  ;;  %v951_v22 = vadd.f32 0.001143296, %v950_v36 }
 0x1c1   :  { %v2243_v51 = vpop.eup %2242  ;;  %v1515_v37 = vadd.f32 0.112945676, %v1514_v20  ;;  %vm1445_vm12 = vweird.f32 %v3454_v41  ;;  %v1451_v46 = vand.u32 2147483648, %v3454_v41  ;;  %v837_v35 = vadd.f32 0.4994258, %v836_v39 }
 0x1c2   :  { %v1441_v33 = vmul.f32 %v2243_v51, %v3454_v41  ;;  %v876_v42 = vmul.f32 %v875_v17, %v3084_v34  ;;  %v1476_v27 = vmul.f32 %v1475_v59, %v2997_v58  ;;  %v913_v38 = vadd.f32 0.014752088, %v912_v52 }
 0x1c3   :  { %v1516_v12 = vmul.f32 %v1515_v37, %v3086_v9  ;;  %v2106_v40 = vclamps-f32 %v1414_v25, 1.0  ;;  %v838_v62 = vmul.f32 %v837_v35, %v2938_v60  ;;  %v952_v57 = vmul.f32 %v951_v22, %v3231_v0 }
 0x1c4   :  { %v1442_v56 = vsub.f32 1.0, %v1441_v33  ;;  %v877_v8 = vadd.f32 0.4994258, %v876_v42  ;;  %v1477_v47 = vadd.f32 0.4994258, %v1476_v27  ;;  %v914_v6 = vmul.f32 %v913_v38, %v3122_v54 }
 0x1c5   :  { %v1517_v24 = vadd.f32 0.4994258, %v1516_v12  ;;  %vm1446_vm13 = vweird.f32 %v2243_v51  ;;  %v1449_v14 = vand.u32 2147483647, %v3454_v41  ;;  %v3485_v20 = vadd.f32 1.0, %v838_v62  ;;  %v3883_v12 = vld [vmem:[#allocation14_spill] sm:$0xff] }
 0x1c6   :  { %v1443_v21 = vmul.f32 %v2243_v51, %v1442_v56  ;;  %v1452_v36 = vor.u32 1.1754944e-38, %v1451_v46  ;;  %v878_v18 = vmul.f32 %v877_v8, %v3084_v34  ;;  %v1478_v25 = vmul.f32 %v1477_v47, %v2997_v58  ;;  %vm1447_vm14 = vmor %vm1445_vm12, %vm1446_vm13 }
 0x1c7   :  { %v1518_v60 = vmul.f32 %v1517_v24, %v3086_v9  ;;  %v1721_v17 = vadd.f32 1.0, %v2106_v40  ;;  %2244 = vrcp.f32 %v3485_v20  ;;  %v953_v52 = vadd.f32 0.014752088, %v952_v57 }
 0x1c8   :  { %v1444_v39 = vadd.f32 %v2243_v51, %v1443_v21  ;;  %v3493_v59 = vadd.f32 1.0, %v878_v18  ;;  %v3495_v37 = vadd.f32 1.0, %v1478_v25  ;;  %v915_v33 = vadd.f32 0.112945676, %v914_v6 }
 0x1c9   :  { %v3497_v22 = vadd.f32 1.0, %v1518_v60  ;;  %v3500_v34 = vadd.f32 0.18741608, %v3405_v19  ;;  %v3504_v58 = vmul.f32 %v3461_v48, %v3411_v61  ;;  %vm1450_vm15 = vcmp.eq.f32.partialorder %v1449_v14, 8.507059e+37 }
 0x1ca   :  { %v1448_v9 = vsel %vm1447_vm14, %v2243_v51, %v1444_v39  ;;  %v849_v41 = vand.u32 2147483647, %v3485_v20  ;;  %v851_v35 = vand.u32 2147483648, %v3485_v20  ;;  %2246 = vrcp.f32 %v3493_v59  ;;  %v3886_v39 = vld [vmem:[#allocation23_spill] sm:$0xff] }
 0x1cb   :  { %v1453_v46 = vsel %vm1450_vm15, %v1452_v36, %v1448_v9  ;;  %v3509_v42 = vadd.f32 0.05243302, %v1023_v49  ;;  %v891_v19 = vand.u32 2147483648, %v3493_v59  ;;  %2248 = vrcp.f32 %v3495_v37 }
 0x1cc   :  { %v1454_v27 = vmul.f32 %v1453_v46, %v3181_v29  ;;  %v1753_v48 = vmul.f32 %v1721_v17, %v3883_v12  ;;  %2250 = vrcp.f32 %v3497_v22  ;;  %v916_v51 = vmul.f32 %v915_v33, %v3122_v54 }
 0x1cd   :  { %v954_v38 = vmul.f32 %v953_v52, %v3231_v0  ;;  %v2245_v40 = vpop.eup %2244  ;;  %vm845_vm0 = vweird.f32 %v3485_v20  ;;  %v889_v49 = vand.u32 2147483647, %v3493_v59  ;;  %v1491_v29 = vand.u32 2147483648, %v3495_v37 }
 0x1ce   :  { %v2107_v56 = vclamps-f32 %v1454_v27, 1.0  ;;  %v841_v62 = vmul.f32 %v2245_v40, %v3485_v20  ;;  %vm3522_vm1 = vcmp.eq.f32.partialorder %v849_v41, 8.507059e+37  ;;  %v852_v8 = vor.u32 1.1754944e-38, %v851_v35 }
 0x1cf   :  { %v1489_v47 = vand.u32 2147483647, %v3495_v37  ;;  %vm885_vm2 = vweird.f32 %v3493_v59  ;;  %v892_v6 = vor.u32 1.1754944e-38, %v891_v19  ;;  %v1529_v21 = vand.u32 2147483647, %v3497_v22 }
 0x1d0   :  { %v1722_v24 = vadd.f32 1.0, %v2107_v56  ;;  %v2247_v14 = vpop.eup %2246  ;;  %v842_v36 = vsub.f32 1.0, %v841_v62  ;;  %vm846_vm3 = vweird.f32 %v2245_v40  ;;  %vm1485_vm4 = vweird.f32 %v3495_v37 }
 0x1d1   :  { %v917_v18 = vadd.f32 0.4994258, %v916_v51  ;;  %v955_v25 = vadd.f32 0.112945676, %v954_v38  ;;  %v2249_v60 = vpop.eup %2248  ;;  %v881_v52 = vmul.f32 %v2247_v14, %v3493_v59  ;;  %vm3532_vm5 = vcmp.eq.f32.partialorder %v889_v49, 8.507059e+37  ;;  %vm847_vm10 = vmor %vm845_vm0, %vm846_vm3 }
 0x1d2   :  { %v1754_v17 = vmul.f32 %v1722_v24, %v3886_v39  ;;  %v1492_v9 = vor.u32 1.1754944e-38, %v1491_v29  ;;  %vm1525_vm6 = vweird.f32 %v3497_v22  ;;  %v1550_v46 = vmul.f32 3.8918573e-05, %v3190_v7  ;;  %v2251_v41 = vpop.eup %2250 }
 0x1d3   :  { %v843_v35 = vmul.f32 %v2245_v40, %v842_v36  ;;  %vm886_vm7 = vweird.f32 %v2247_v14  ;;  %v1481_v27 = vmul.f32 %v2249_v60, %v3495_v37  ;;  %vm3539_vm8 = vcmp.eq.f32.partialorder %v1489_v47, 8.507059e+37 }
 0x1d4   :  { %v1531_v12 = vand.u32 2147483648, %v3497_v22  ;;  %v1773_v51 = vpack.c.bf16 %v1754_v17, %v1753_v48  ;;  %v882_v38 = vsub.f32 1.0, %v881_v52  ;;  %v1521_v56 = vmul.f32 %v2251_v41, %v3497_v22  ;;  %vm887_vm13 = vmor %vm885_vm2, %vm886_vm7 }
 0x1d5   :  { %vm3545_vm9 = vcmp.eq.f32.partialorder %v1529_v21, 8.507059e+37  ;;  %v844_v29 = vadd.f32 %v2245_v40, %v843_v35  ;;  %v1482_v62 = vsub.f32 1.0, %v1481_v27  ;;  %v918_v24 = vmul.f32 %v917_v18, %v3122_v54 }
 0x1d6   :  { %v956_v36 = vmul.f32 %v955_v25, %v3231_v0  ;;  %1913 = vmatmul.bf16.gmra.mxu3 %v1773_v51  ;;  %v883_v47 = vmul.f32 %v2247_v14, %v882_v38  ;;  %vm1486_vm11 = vweird.f32 %v2249_v60  ;;  %v1522_v48 = vsub.f32 1.0, %v1521_v56 }
 0x1d7   :  { %v1551_v39 = vadd.f32 0.001143296, %v1550_v46  ;;  %v848_v17 = vsel %vm847_vm10, %v2245_v40, %v844_v29  ;;  %v1483_v21 = vmul.f32 %v2249_v60, %v1482_v62  ;;  %v3554_v52 = vadd.f32 1.0, %v918_v24  ;;  %vm1487_vm14 = vmor %vm1485_vm4, %vm1486_vm11 }
 0x1d8   :  { %v957_v50 = vadd.f32 0.4994258, %v956_v36  ;;  %v853_v35 = vsel %vm3522_vm1, %v852_v8, %v848_v17  ;;  %v884_v54 = vadd.f32 %v2247_v14, %v883_v47  ;;  %v1523_v18 = vmul.f32 %v2251_v41, %v1522_v48 }
 0x1d9   :  { %vm1526_vm12 = vweird.f32 %v2251_v41  ;;  %v854_v25 = vmul.f32 %v853_v35, %v3185_v10  ;;  %v1484_v20 = vadd.f32 %v2249_v60, %v1483_v21  ;;  %v1532_v27 = vor.u32 1.1754944e-38, %v1531_v12 }
 0x1da   :  { %2252 = vrcp.f32 %v3554_v52  ;;  %v888_v40 = vsel %vm887_vm13, %v2247_v14, %v884_v54  ;;  %v1524_v57 = vadd.f32 %v2251_v41, %v1523_v18  ;;  %v1552_v8 = vmul.f32 %v1551_v39, %v3190_v7  ;;  %vm1527_vm15 = vmor %vm1525_vm6, %vm1526_vm12  ;;  %v3895_v39 = vld [vmem:[#allocation15_spill] sm:$0xff] }
 0x1db   :  { %v1590_v46 = vmul.f32 3.8918573e-05, %v3238_v44  ;;  %v2092_v51 = vclamps-f32 %v854_v25, 1.0  ;;  %v893_v10 = vsel %vm3532_vm5, %v892_v6, %v888_v40  ;;  %v1488_v59 = vsel %vm1487_vm14, %v2249_v60, %v1484_v20 }
 0x1dc   :  { %v958_v12 = vmul.f32 %v957_v50, %v3231_v0  ;;  %v894_v14 = vmul.f32 %v893_v10, %v3293_v5  ;;  %v1493_v37 = vsel %vm3539_vm8, %v1492_v9, %v1488_v59  ;;  %v1528_v38 = vsel %vm1527_vm15, %v2251_v41, %v1524_v57 }
 0x1dd   :  { %v929_v56 = vand.u32 2147483647, %v3554_v52  ;;  %v3578_v29 = vadd.f32 0.0036580483, %v3504_v58  ;;  %v1494_v33 = vmul.f32 %v1493_v37, %v3201_v2  ;;  %v1533_v6 = vsel %vm3545_vm9, %v1532_v27, %v1528_v38 }
 0x1de   :  { %v931_v22 = vand.u32 2147483648, %v3554_v52  ;;  %v2093_v60 = vclamps-f32 %v894_v14, 1.0  ;;  %v1707_v0 = vadd.f32 1.0, %v2092_v51  ;;  %v1534_v50 = vmul.f32 %v1533_v6, %v3296_v16 }
 0x1df   :  { %v3585_v5 = vadd.f32 1.0, %v958_v12  ;;  %v3589_v41 = vmul.f32 %v3509_v42, %v3390_v15  ;;  %v2108_v58 = vclamps-f32 %v1494_v33, 1.0  ;;  %v1553_v19 = vadd.f32 0.014752088, %v1552_v8 }
 0x1e0   :  { %v2253_v9 = vpop.eup %2252  ;;  %v1591_v62 = vadd.f32 0.001143296, %v1590_v46  ;;  %v1708_v2 = vadd.f32 1.0, %v2093_v60  ;;  %v2109_v24 = vclamps-f32 %v1534_v50, 1.0  ;;  %vm3592_vm0 = vcmp.eq.f32.partialorder %v929_v56, 8.507059e+37 }
 0x1e1   :  { %v921_v49 = vmul.f32 %v2253_v9, %v3554_v52  ;;  %v1723_v47 = vadd.f32 1.0, %v2108_v58  ;;  %v932_v16 = vor.u32 1.1754944e-38, %v931_v22  ;;  %2254 = vrcp.f32 %v3585_v5 }
 0x1e2   :  { %v990_v48 = vmul.f32 3.8918573e-05, %v3260_v63  ;;  %v1739_v42 = vmul.f32 %v1707_v0, %v3895_v39  ;;  %v1740_v17 = vmul.f32 %v1708_v2, %v3188_v31  ;;  %v1724_v21 = vadd.f32 1.0, %v2109_v24 }
 0x1e3   :  { %v922_v35 = vsub.f32 1.0, %v921_v49  ;;  %vm926_vm1 = vweird.f32 %v2253_v9  ;;  %v969_v54 = vand.u32 2147483647, %v3585_v5  ;;  %v1554_v18 = vmul.f32 %v1553_v19, %v3190_v7 }
 0x1e4   :  { %v1592_v25 = vmul.f32 %v1591_v62, %v3238_v44  ;;  %v1766_v20 = vpack.c.bf16 %v1740_v17, %v1739_v42  ;;  %v1755_v27 = vmul.f32 %v1723_v47, %v3167_v45  ;;  %v1756_v40 = vmul.f32 %v1724_v21, %v3204_v26 }
 0x1e5   :  { %v923_v57 = vmul.f32 %v2253_v9, %v922_v35  ;;  %vm925_vm2 = vweird.f32 %v3554_v52  ;;  %v1555_v8 = vadd.f32 0.112945676, %v1554_v18  ;;  %v991_v31 = vadd.f32 0.001143296, %v990_v48 }
 0x1e6   :  { %v1593_v46 = vadd.f32 0.014752088, %v1592_v25  ;;  %1878 = vmatmul.bf16.gmra.mxu1 %v1766_v20  ;;  %v1774_v51 = vpack.c.bf16 %v1756_v40, %v1755_v27  ;;  %v1030_v59 = vmul.f32 3.8918573e-05, %v3390_v15  ;;  %v1630_v12 = vmul.f32 3.8918573e-05, %v3301_v4  ;;  %vm927_vm3 = vmor %vm925_vm2, %vm926_vm1 }
 0x1e7   :  { %v924_v10 = vadd.f32 %v2253_v9, %v923_v57  ;;  %v2255_v14 = vpop.eup %2254  ;;  %v971_v45 = vand.u32 2147483648, %v3585_v5  ;;  %v1556_v26 = vmul.f32 %v1555_v8, %v3190_v7  ;;  %v992_v52 = vmul.f32 %v991_v31, %v3260_v63 }
 0x1e8   :  { %v1594_v37 = vmul.f32 %v1593_v46, %v3238_v44  ;;  %1918 = vmatmul.bf16.gmra.mxu3 %v1774_v51  ;;  %v961_v56 = vmul.f32 %v2255_v14, %v3585_v5  ;;  %v1031_v33 = vadd.f32 0.001143296, %v1030_v59  ;;  %v1670_v6 = vmul.f32 3.8918573e-05, %v3411_v61 }
 0x1e9   :  { %v928_v38 = vsel %vm927_vm3, %v2253_v9, %v924_v10  ;;  %v1557_v60 = vadd.f32 0.4994258, %v1556_v26  ;;  %v993_v50 = vadd.f32 0.014752088, %v992_v52  ;;  %vm966_vm4 = vweird.f32 %v2255_v14 }
 0x1ea   :  { %v933_v22 = vsel %vm3592_vm0, %v932_v16, %v928_v38  ;;  %v1595_v0 = vadd.f32 0.112945676, %v1594_v37  ;;  %v962_v58 = vsub.f32 1.0, %v961_v56  ;;  %v1032_v19 = vmul.f32 %v1031_v33, %v3390_v15 }
 0x1eb   :  { %v1631_v62 = vadd.f32 0.001143296, %v1630_v12  ;;  %v934_v2 = vmul.f32 %v933_v22, %v3333_v1  ;;  %v1558_v9 = vmul.f32 %v1557_v60, %v3190_v7  ;;  %v994_v49 = vmul.f32 %v993_v50, %v3260_v63 }
 0x1ec   :  { %v1596_v24 = vmul.f32 %v1595_v0, %v3238_v44  ;;  %v963_v47 = vmul.f32 %v2255_v14, %v962_v58  ;;  %v1033_v48 = vadd.f32 0.014752088, %v1032_v19  ;;  %v1671_v16 = vadd.f32 0.001143296, %v1670_v6 }
 0x1ed   :  { %v1632_v36 = vmul.f32 %v1631_v62, %v3301_v4  ;;  %v1663_v39 = vmul.f32 %v3578_v29, %v3411_v61  ;;  %v3625_v42 = vadd.f32 1.0, %v1558_v9  ;;  %v995_v21 = vadd.f32 0.112945676, %v994_v49 }
 0x1ee   :  { %v1597_v17 = vadd.f32 0.4994258, %v1596_v24  ;;  %v964_v35 = vadd.f32 %v2255_v14, %v963_v47  ;;  %vm965_vm5 = vweird.f32 %v3585_v5  ;;  %v1034_v7 = vmul.f32 %v1033_v48, %v3390_v15 }
 0x1ef   :  { %v1633_v1 = vadd.f32 0.014752088, %v1632_v36  ;;  %v1026_v18 = vadd.f32 0.18741608, %v3589_v41  ;;  %vm967_vm6 = vmor %vm965_vm5, %vm966_vm4  ;;  %vm970_vm7 = vcmp.eq.f32.partialorder %v969_v54, 8.507059e+37  ;;  %v972_v25 = vor.u32 1.1754944e-38, %v971_v45 }
 0x1f0   :  { %2256 = vrcp.f32 %v3625_v42  ;;  %v2094_v20 = vclamps-f32 %v934_v2, 1.0  ;;  %v968_v29 = vsel %vm967_vm6, %v2255_v14, %v964_v35  ;;  %v1598_v27 = vmul.f32 %v1597_v17, %v3238_v44 }
 0x1f1   :  { %v996_v40 = vmul.f32 %v995_v21, %v3260_v63  ;;  %v1664_v57 = vadd.f32 0.05243302, %v1663_v39  ;;  %v973_v8 = vsel %vm970_vm7, %v972_v25, %v968_v29  ;;  %v1035_v5 = vadd.f32 0.112945676, %v1034_v7 }
 0x1f2   :  { %v1672_v46 = vmul.f32 %v1671_v16, %v3411_v61  ;;  %v974_v31 = vmul.f32 %v973_v8, %v3398_v11  ;;  %v3636_v41 = vadd.f32 1.0, %v1598_v27  ;;  %v1634_v54 = vmul.f32 %v1633_v1, %v3301_v4 }
 0x1f3   :  { %v997_v51 = vadd.f32 0.4994258, %v996_v40  ;;  %v1549_v10 = vmul.f32 %v3393_v13, %v3154_v30  ;;  %v3643_v44 = vmul.f32 %v3400_v43, %v3218_v53  ;;  %v1027_v59 = vmul.f32 %v1026_v18, %v3390_v15 }
 0x1f4   :  { %v1036_v12 = vmul.f32 %v1035_v5, %v3390_v15  ;;  %v3649_v14 = vmul.f32 %v3402_v32, %v3242_v55  ;;  %v2095_v11 = vclamps-f32 %v974_v31, 1.0  ;;  %v1709_v45 = vadd.f32 1.0, %v2094_v20 }
 0x1f5   :  { %2258 = vrcp.f32 %v3636_v41  ;;  %v998_v37 = vmul.f32 %v997_v51, %v3260_v63  ;;  %v1635_v13 = vadd.f32 0.112945676, %v1634_v54  ;;  %v1673_v52 = vadd.f32 0.014752088, %v1672_v46 }
 0x1f6   :  { %v2257_v26 = vpop.eup %2256  ;;  %v1037_v30 = vadd.f32 0.4994258, %v1036_v12  ;;  %v3655_v53 = vmul.f32 %v3500_v34, %v3301_v4  ;;  %v1665_v43 = vmul.f32 %v1664_v57, %v3411_v61  ;;  %v1710_v38 = vadd.f32 1.0, %v2095_v11  ;;  %v1854_v12 = vpop.f32.mrf.mxu1 }
 0x1f7   :  { %v1561_v55 = vmul.f32 %v2257_v26, %v3625_v42  ;;  %v1028_v32 = vadd.f32 1.1283791, %v1027_v59  ;;  %v3659_v56 = vadd.f32 1.0, %v998_v37  ;;  %v1636_v6 = vmul.f32 %v1635_v13, %v3301_v4  ;;  %v3701_v59 = vld [vmem:[%s3783_s4] ss:$0 sm:$0xff]  ;;  %v1894_v11 = vpop.f32.mrf.mxu3  ;;  %s2376_s4 = smov [#allocation8]  }
 0x1f8   :  { %v1038_v33 = vmul.f32 %v1037_v30, %v3390_v15  ;;  %v1741_v63 = vmul.f32 %v1709_v45, %v3207_v3  ;;  %v1742_v22 = vmul.f32 %v1710_v38, %v3338_v28  ;;  %v1571_v34 = vand.u32 2147483648, %v3625_v42  ;;  %s1970_s12 = sshll.u32 %s2376_s4, 4  ;;  %s1971_s12 = int_to_ptr.vmem [resolvable:$true] %s1970_s12 }
 0x1f9   :  { %v1562_v60 = vsub.f32 1.0, %v1561_v55  ;;  %vm1566_vm8 = vweird.f32 %v2257_v26  ;;  %v1569_v0 = vand.u32 2147483647, %v3625_v42  ;;  %2260 = vrcp.f32 %v3659_v56 }
 0x1fa   :  { %v1674_v50 = vmul.f32 %v1673_v52, %v3411_v61  ;;  %v1767_v19 = vpack.c.bf16 %v1742_v22, %v1741_v63  ;;  %v3669_v15 = vadd.f32 1.0, %v1038_v33  ;;  %v1637_v2 = vadd.f32 0.4994258, %v1636_v6 }
 0x1fb   :  { %v2259_v58 = vpop.eup %2258  ;;  %v1563_v62 = vmul.f32 %v2257_v26, %v1562_v60  ;;  %v3672_v3 = vmul.f32 %v1028_v32, %v3359_v23  ;;  %v3674_v28 = vadd.f32 0.18741608, %v1665_v43  ;;  %vm1565_vm9 = vweird.f32 %v3625_v42 }
 0x1fc   :  { %v1601_v9 = vmul.f32 %v2259_v58, %v3636_v41  ;;  %1883 = vmatmul.bf16.gmra.mxu1 %v1767_v19  ;;  %v1572_v49 = vor.u32 1.1754944e-38, %v1571_v34  ;;  %v1609_v47 = vand.u32 2147483647, %v3636_v41  ;;  %2262 = vrcp.f32 %v3669_v15  ;;  %vm1567_vm10 = vmor %vm1565_vm9, %vm1566_vm8 }
 0x1fd   :  { %v1564_v24 = vadd.f32 %v2257_v26, %v1563_v62  ;;  %v1611_v36 = vand.u32 2147483648, %v3636_v41  ;;  %v1638_v23 = vmul.f32 %v1637_v2, %v3301_v4  ;;  %v1675_v16 = vadd.f32 0.112945676, %v1674_v50  ;;  %v3900_v62 = vld [vmem:[#allocation20_spill] sm:$0xff]  ;;  %v3901_v2 = vld [vmem:[#allocation18_spill] sm:$0xff] }
 0x1fe   :  { %v1602_v48 = vsub.f32 1.0, %v1601_v9  ;;  %vm1570_vm11 = vcmp.eq.f32.partialorder %v1569_v0, 8.507059e+37  ;;  %v1009_v42 = vand.u32 2147483647, %v3659_v56  ;;  %v1011_v17 = vand.u32 2147483648, %v3659_v56 }
 0x1ff   :  { %v1568_v39 = vsel %vm1567_vm10, %v2257_v26, %v1564_v24  ;;  %v2261_v21 = vpop.eup %2260  ;;  %vm1606_vm12 = vweird.f32 %v2259_v58  ;;  %v3685_v1 = vadd.f32 1.0, %v1638_v23  ;;  %vm1605_vm13 = vweird.f32 %v3636_v41  ;;  %v1896_v23 = vpop.f32.mrf.mxu3 }
 0x200   :  { %v1573_v35 = vsel %vm1570_vm11, %v1572_v49, %v1568_v39  ;;  %v1603_v7 = vmul.f32 %v2259_v58, %v1602_v48  ;;  %v1001_v25 = vmul.f32 %v2261_v21, %v3659_v56  ;;  %v1676_v4 = vmul.f32 %v1675_v16, %v3411_v61  ;;  %vm1607_vm15 = vmor %vm1605_vm13, %vm1606_vm12 }
 0x201   :  { %v1574_v18 = vmul.f32 %v1573_v35, %v1549_v10  ;;  %vm1610_vm14 = vcmp.eq.f32.partialorder %v1609_v47, 8.507059e+37  ;;  %v1612_v29 = vor.u32 1.1754944e-38, %v1611_v36  ;;  %2264 = vrcp.f32 %v3685_v1 }
 0x202   :  { %v1604_v20 = vadd.f32 %v2259_v58, %v1603_v7  ;;  %v2263_v27 = vpop.eup %2262  ;;  %v1002_v40 = vsub.f32 1.0, %v1001_v25  ;;  %vm1005_vm0 = vweird.f32 %v3659_v56  ;;  %vm3692_vm1 = vcmp.eq.f32.partialorder %v1009_v42, 8.507059e+37 }
 0x203   :  { %v1677_v8 = vadd.f32 0.4994258, %v1676_v4  ;;  %v2110_v5 = vclamps-f32 %v1574_v18, 1.0  ;;  %v1012_v31 = vor.u32 1.1754944e-38, %v1011_v17  ;;  %v1041_v41 = vmul.f32 %v2263_v27, %v3669_v15 }
 0x204   :  { %v1608_v46 = vsel %vm1607_vm15, %v2259_v58, %v1604_v20  ;;  %v1003_v54 = vmul.f32 %v2261_v21, %v1002_v40  ;;  %vm1006_vm2 = vweird.f32 %v2261_v21  ;;  %v1049_v10 = vand.u32 2147483647, %v3669_v15 }
 0x205   :  { %v1613_v51 = vsel %vm1610_vm14, %v1612_v29, %v1608_v46  ;;  %v1042_v26 = vsub.f32 1.0, %v1041_v41  ;;  %v1051_v37 = vand.u32 2147483648, %v3669_v15  ;;  %v1678_v30 = vmul.f32 %v1677_v8, %v3411_v61  ;;  %vm1007_vm4 = vmor %vm1005_vm0, %vm1006_vm2  ;;  %v3902_v29 = vld [vmem:[#allocation16_spill] sm:$0xff] }
 0x206   :  { %v1614_v45 = vmul.f32 %v1613_v51, %v3643_v44  ;;  %v1004_v13 = vadd.f32 %v2261_v21, %v1003_v54  ;;  %vm1046_vm3 = vweird.f32 %v2263_v27  ;;  %v1855_v52 = vadd.f32 %v3701_v59, %v1854_v12 }
 0x207   :  { %v1895_v43 = vadd.f32 %v3701_v59, %v1894_v11  ;;  %v2265_v38 = vpop.eup %2264  ;;  %v1725_v32 = vadd.f32 1.0, %v2110_v5  ;;  %v1043_v33 = vmul.f32 %v2263_v27, %v1042_v26  ;;  %v3711_v44 = vadd.f32 1.0, %v1678_v30  ;;  %v3904_v5 = vld [vmem:[#allocation30_spill] sm:$0xff] }
 0x208   :  { %v2111_v55 = vclamps-f32 %v1614_v45, 1.0  ;;  %v1008_v6 = vsel %vm1007_vm4, %v2261_v21, %v1004_v13  ;;  %vm1045_vm5 = vweird.f32 %v3669_v15  ;;  %vm3714_vm6 = vcmp.eq.f32.partialorder %v1049_v10, 8.507059e+37  ;;  %1934 = vst [vmem:[#allocation8] sm:$0xff] %v1855_v52  ;;  %v1899_v45 = vpop.f32.mrf.mxu3 }
 0x209   :  { %v1641_v22 = vmul.f32 %v2265_v38, %v3685_v1  ;;  %v1013_v34 = vsel %vm3692_vm1, %v1012_v31, %v1008_v6  ;;  %v1044_v0 = vadd.f32 %v2263_v27, %v1043_v33  ;;  %2266 = vrcp.f32 %v3711_v44  ;;  %1950 = vst [vmem:[#allocation8 + $0x80] sm:$0xff] %v1895_v43  ;;  %vm1047_vm7 = vmor %vm1045_vm5, %vm1046_vm3  ;;  %v3905_v43 = vld [vmem:[#allocation25_spill] sm:$0xff] }
 0x20a   :  { %v1726_v60 = vadd.f32 1.0, %v2111_v55  ;;  %v1014_v56 = vmul.f32 %v1013_v34, %v3649_v14  ;;  %v1052_v50 = vor.u32 1.1754944e-38, %v1051_v37  ;;  %v1649_v19 = vand.u32 2147483647, %v3685_v1  ;;  %v1856_v14 = vpop.f32.mrf.mxu1 }
 0x20b   :  { %v1642_v58 = vsub.f32 1.0, %v1641_v22  ;;  %v1757_v15 = vmul.f32 %v1725_v32, %v3900_v62  ;;  %v1048_v24 = vsel %vm1047_vm7, %v2263_v27, %v1044_v0  ;;  %v1651_v49 = vand.u32 2147483648, %v3685_v1  ;;  %v3903_v27 = vld [vmem:[#allocation32_spill] sm:$0xff] }
 0x20c   :  { %v1758_v9 = vmul.f32 %v1726_v60, %v3901_v2  ;;  %v2096_v47 = vclamps-f32 %v1014_v56, 1.0  ;;  %v1053_v48 = vsel %vm3714_vm6, %v1052_v50, %v1048_v24  ;;  %vm1646_vm8 = vweird.f32 %v2265_v38  ;;  %v3906_v56 = vld [vmem:[#allocation22_spill] sm:$0xff] }
 0x20d   :  { %v1643_v36 = vmul.f32 %v2265_v38, %v1642_v58  ;;  %v1054_v39 = vmul.f32 %v1053_v48, %v3672_v3  ;;  %v1857_v42 = vadd.f32 %v3701_v59, %v1856_v14  ;;  %v1628_v17 = vadd.f32 1.1283791, %v3655_v53  ;;  %v3907_v58 = vld [vmem:[#allocation24_spill] sm:$0xff] }
 0x20e   :  { %v1775_v16 = vpack.c.bf16 %v1758_v9, %v1757_v15  ;;  %vm1645_vm9 = vweird.f32 %v3685_v1  ;;  %v1897_v35 = vadd.f32 %v3701_v59, %v1896_v23  ;;  %v1667_v18 = vmul.f32 %v3674_v28, %v3411_v61 }
 0x20f   :  { %v1644_v21 = vadd.f32 %v2265_v38, %v1643_v36  ;;  %v2267_v7 = vpop.eup %2266  ;;  %v2097_v25 = vclamps-f32 %v1054_v39, 1.0  ;;  %v1711_v4 = vadd.f32 1.0, %v2096_v47  ;;  %vm1647_vm10 = vmor %vm1645_vm9, %vm1646_vm8  ;;  %v1652_v20 = vor.u32 1.1754944e-38, %v1651_v49  ;;  %1935 = vst [vmem:[#allocation8 + $0x8] sm:$0xff] %v1857_v42 }
 0x210   :  { %1923 = vmatmul.bf16.gmra.mxu3 %v1775_v16  ;;  %vm1650_vm11 = vcmp.eq.f32.partialorder %v1649_v19, 8.507059e+37  ;;  %v1681_v53 = vmul.f32 %v2267_v7, %v3711_v44  ;;  %1951 = vst [vmem:[#allocation8 + $0x88] sm:$0xff] %v1897_v35  ;;  %v367_v1 = vmul.f32 0.5, %v3902_v29  ;;  %v368_v40 = vmul.f32 0.5, %v3903_v27  ;;  %v1901_v34 = vpop.f32.mrf.mxu3 }
 0x211   :  { %v1648_v3 = vsel %vm1647_vm10, %v2265_v38, %v1644_v21  ;;  %v1712_v57 = vadd.f32 1.0, %v2097_v25  ;;  %v1629_v61 = vmul.f32 %v1628_v17, %v3904_v5  ;;  %v1668_v46 = vadd.f32 1.1283791, %v1667_v18 }
 0x212   :  { %v1653_v8 = vsel %vm1650_vm11, %v1652_v20, %v1648_v3  ;;  %v1682_v28 = vsub.f32 1.0, %v1681_v53  ;;  %v1743_v31 = vmul.f32 %v1711_v4, %v367_v1  ;;  %v1691_v51 = vand.u32 2147483648, %v3711_v44  ;;  %v1859_v11 = vpop.f32.mrf.mxu1 }
 0x213   :  { %v1744_v41 = vmul.f32 %v1712_v57, %v368_v40  ;;  %v1654_v54 = vmul.f32 %v1653_v8, %v1629_v61  ;;  %vm1686_vm12 = vweird.f32 %v2267_v7  ;;  %v1689_v12 = vand.u32 2147483647, %v3711_v44 }
 0x214   :  { %v1683_v10 = vmul.f32 %v2267_v7, %v1682_v28  ;;  %v1860_v37 = vadd.f32 %v3701_v59, %v1859_v11  ;;  %v1900_v30 = vadd.f32 %v3701_v59, %v1899_v45  ;;  %vm1685_vm13 = vweird.f32 %v3711_v44 }
 0x215   :  { %v1768_v26 = vpack.c.bf16 %v1744_v41, %v1743_v31  ;;  %vm1687_vm14 = vmor %vm1685_vm13, %vm1686_vm12  ;;  %v1692_v52 = vor.u32 1.1754944e-38, %v1691_v51  ;;  %v1669_v38 = vmul.f32 %v1668_v46, %v3905_v43  ;;  %v2112_v55 = vclamps-f32 %v1654_v54, 1.0 }
 0x216   :  { %v1684_v13 = vadd.f32 %v2267_v7, %v1683_v10  ;;  %1936 = vst [vmem:[#allocation8 + $0x10] sm:$0xff] %v1860_v37  ;;  %vm1690_vm15 = vcmp.eq.f32.partialorder %v1689_v12, 8.507059e+37  ;;  %v1902_v44 = vadd.f32 %v3701_v59, %v1901_v34  ;;  %v383_v50 = vmul.f32 0.5, %v3906_v56 }
 0x217   :  { %1888 = vmatmul.bf16.gmra.mxu1 %v1768_v26  ;;  %1952 = vst [vmem:[#allocation8 + $0x90] sm:$0xff] %v1900_v30  ;;  %v1727_v22 = vadd.f32 1.0, %v2112_v55  ;;  %v384_v19 = vmul.f32 0.5, %v3907_v58 }
 0x218   :  { %v1688_v32 = vsel %vm1687_vm14, %v2267_v7, %v1684_v13  ;;  %1953 = vst [vmem:[#allocation8 + $0x98] sm:$0xff] %v1902_v44  ;;  %v1904_v49 = vpop.f32.mrf.mxu3 }
 0x219   :  { %v1693_v33 = vsel %vm1690_vm15, %v1692_v52, %v1688_v32  ;;  %v1759_v15 = vmul.f32 %v1727_v22, %v383_v50  ;;  %v1905_v48 = vadd.f32 %v3701_v59, %v1904_v49 }
 0x21a   :  { %v1694_v6 = vmul.f32 %v1693_v33, %v1669_v38  ;;  %v1861_v60 = vpop.f32.mrf.mxu1 }
 0x21b   :  { %v1862_v0 = vadd.f32 %v3701_v59, %v1861_v60  ;;  %1954 = vst [vmem:[#allocation8 + $0xa0] sm:$0xff] %v1905_v48 }
 0x21c   :  { %v2113_v63 = vclamps-f32 %v1694_v6, 1.0 }
 0x21d   :  { %1937 = vst [vmem:[#allocation8 + $0x18] sm:$0xff] %v1862_v0 }
 0x21e   :  { %v1728_v62 = vadd.f32 1.0, %v2113_v63 }
 0x220   :  { %v1760_v2 = vmul.f32 %v1728_v62, %v384_v19  ;;  %v1906_v14 = vpop.f32.mrf.mxu3 }
 0x221   :  { %v1907_v16 = vadd.f32 %v3701_v59, %v1906_v14 }
 0x222   :  { %v1776_v9 = vpack.c.bf16 %v1760_v2, %v1759_v15  ;;  %v1864_v24 = vpop.f32.mrf.mxu1 }
 0x223   :  { %v1865_v47 = vadd.f32 %v3701_v59, %v1864_v24  ;;  %1955 = vst [vmem:[#allocation8 + $0xa8] sm:$0xff] %v1907_v16 }
 0x224   :  { %1928 = vmatmul.bf16.gmra.mxu3 %v1776_v9 }
 0x225   :  { %1938 = vst [vmem:[#allocation8 + $0x20] sm:$0xff] %v1865_v47 }
 0x22a   :  { %v1866_v36 = vpop.f32.mrf.mxu1 }
 0x22b   :  { %v1867_v23 = vadd.f32 %v3701_v59, %v1866_v36 }
 0x22d   :  { %1939 = vst [vmem:[#allocation8 + $0x28] sm:$0xff] %v1867_v23 }
 0x232   :  { %v1869_v39 = vpop.f32.mrf.mxu1 }
 0x233   :  { %v1870_v42 = vadd.f32 %v3701_v59, %v1869_v39 }
 0x235   :  { %1940 = vst [vmem:[#allocation8 + $0x30] sm:$0xff] %v1870_v42 }
 0x236   :  { %v1909_v17 = vpop.f32.mrf.mxu3 }
 0x237   :  { %v1910_v21 = vadd.f32 %v3701_v59, %v1909_v17 }
 0x239   :  { %1956 = vst [vmem:[#allocation8 + $0xb0] sm:$0xff] %v1910_v21 }
 0x23a   :  { %v1871_v35 = vpop.f32.mrf.mxu1 }
 0x23b   :  { %v1872_v7 = vadd.f32 %v3701_v59, %v1871_v35 }
 0x23d   :  { %1941 = vst [vmem:[#allocation8 + $0x38] sm:$0xff] %v1872_v7 }
 0x23e   :  { %v1911_v18 = vpop.f32.mrf.mxu3 }
 0x23f   :  { %v1912_v25 = vadd.f32 %v3701_v59, %v1911_v18 }
 0x241   :  { %1957 = vst [vmem:[#allocation8 + $0xb8] sm:$0xff] %v1912_v25 }
 0x242   :  { %v1874_v4 = vpop.f32.mrf.mxu1 }
 0x243   :  { %v1875_v20 = vadd.f32 %v3701_v59, %v1874_v4 }
 0x245   :  { %1942 = vst [vmem:[#allocation8 + $0x40] sm:$0xff] %v1875_v20 }
 0x24a   :  { %v1876_v3 = vpop.f32.mrf.mxu1 }
 0x24b   :  { %v1877_v53 = vadd.f32 %v3701_v59, %v1876_v3 }
 0x24d   :  { %1943 = vst [vmem:[#allocation8 + $0x48] sm:$0xff] %v1877_v53 }
 0x259   :  { %v1914_v29 = vpop.f32.mrf.mxu3 }
 0x25a   :  { %v1915_v1 = vadd.f32 %v3701_v59, %v1914_v29 }
 0x25c   :  { %1958 = vst [vmem:[#allocation8 + $0xc0] sm:$0xff] %v1915_v1 }
 0x261   :  { %v1916_v27 = vpop.f32.mrf.mxu3 }
 0x262   :  { %v1917_v40 = vadd.f32 %v3701_v59, %v1916_v27 }
 0x263   :  { %v1879_v57 = vpop.f32.mrf.mxu1 }
 0x264   :  { %v1880_v8 = vadd.f32 %v3701_v59, %v1879_v57  ;;  %1959 = vst [vmem:[#allocation8 + $0xc8] sm:$0xff] %v1917_v40 }
 0x266   :  { %1944 = vst [vmem:[#allocation8 + $0x50] sm:$0xff] %v1880_v8 }
 0x26b   :  { %v1881_v5 = vpop.f32.mrf.mxu1  ;;  %v1919_v61 = vpop.f32.mrf.mxu3 }
 0x26c   :  { %v1882_v28 = vadd.f32 %v3701_v59, %v1881_v5  ;;  %v1920_v46 = vadd.f32 %v3701_v59, %v1919_v61 }
 0x26e   :  { %1945 = vst [vmem:[#allocation8 + $0x58] sm:$0xff] %v1882_v28 }
 0x26f   :  { %1960 = vst [vmem:[#allocation8 + $0xd0] sm:$0xff] %v1920_v46 }
 0x273   :  { %v1921_v31 = vpop.f32.mrf.mxu3 }
 0x274   :  { %v1922_v41 = vadd.f32 %v3701_v59, %v1921_v31 }
 0x276   :  { %1961 = vst [vmem:[#allocation8 + $0xd8] sm:$0xff] %v1922_v41 }
 0x279   :  { %v1884_v51 = vpop.f32.mrf.mxu1 }
 0x27a   :  { %v1885_v54 = vadd.f32 %v3701_v59, %v1884_v51 }
 0x27c   :  { %1946 = vst [vmem:[#allocation8 + $0x60] sm:$0xff] %v1885_v54 }
 0x281   :  { %v1886_v10 = vpop.f32.mrf.mxu1 }
 0x282   :  { %v1887_v12 = vadd.f32 %v3701_v59, %v1886_v10 }
 0x284   :  { %1947 = vst [vmem:[#allocation8 + $0x68] sm:$0xff] %v1887_v12 }
 0x293   :  { %v1924_v11 = vpop.f32.mrf.mxu3 }
 0x294   :  { %v1925_v45 = vadd.f32 %v3701_v59, %v1924_v11  ;;  %v1889_v26 = vpop.f32.mrf.mxu1 }
 0x295   :  { %v1890_v37 = vadd.f32 %v3701_v59, %v1889_v26 }
 0x296   :  { %1962 = vst [vmem:[#allocation8 + $0xe0] sm:$0xff] %v1925_v45 }
 0x297   :  { %1948 = vst [vmem:[#allocation8 + $0x70] sm:$0xff] %v1890_v37 }
 0x29b   :  { %v1926_v30 = vpop.f32.mrf.mxu3 }
 0x29c   :  { %v1927_v13 = vadd.f32 %v3701_v59, %v1926_v30  ;;  %v1891_v52 = vpop.f32.mrf.mxu1 }
 0x29d   :  { %v1892_v43 = vadd.f32 %v3701_v59, %v1891_v52 }
 0x29e   :  { %1963 = vst [vmem:[#allocation8 + $0xe8] sm:$0xff] %v1927_v13 }
 0x29f   :  { %1949 = vst [vmem:[#allocation8 + $0x78] sm:$0xff] %v1892_v43 }
 0x2a7   :  { %v1929_v38 = vpop.f32.mrf.mxu3 }
 0x2a8   :  { %v1930_v55 = vadd.f32 %v3701_v59, %v1929_v38 }
 0x2aa   :  { %1964 = vst [vmem:[#allocation8 + $0xf0] sm:$0xff] %v1930_v55 }
 0x2af   :  { %v1931_v32 = vpop.f32.mrf.mxu3 }
 0x2b0   :  { %v1932_v33 = vadd.f32 %v3701_v59, %v1931_v32 }
 0x2b2   :  { %1965 = vst [vmem:[#allocation8 + $0xf8] sm:$0xff] %v1932_v33 }
 0x2b3   :  { %1978 = dma.vmem_to_hbm [thread:$0]  %s1971_s12, 4096, %s1973_s15, [#allocation4], %s2377_s16, %s2377_s16, %s2378_s17  }
 0x2b4   :  { %2369 = dma.done.wait [#allocation4], 4096  }
 0x2b5   :  { %2370 = vsyncadd [#allocation4], 4294963200 }
 0x2b6   :  { %1983 = vsyncpa [#allocation3], 1 }
 0x2b7   :  { %1984 = vsyncpa [#allocation6], 1 }
 0x2b8   :  { %1985 = vsyncpa [#allocation4], 1 }

</bundles_post_ra>
